<compile_context>
chip_gen: v5e
topology: v5e:2x2
jax: 0.10.0
libtpu: 0.0.40
codegen_flags: <defaults>
</compile_context>

<pallas_src>
import math
import jax
import jax.numpy as jnp
from jax import lax
from jax.experimental import pallas as pl
from jax.experimental.pallas import tpu as pltpu


def _num_chunks(B):
    # 2-way parallel grid when possible (v7x has 2 TensorCores), else 1.
    return 2 if (B >= 2 and B % 2 == 0) else 1


# ----------------------------------------------------------------------------
# Kernel 1: fused 3x3 same-conv + BatchNorm(eval) + ReLU + 2x2/2 max-pool
# ----------------------------------------------------------------------------
def _conv_bn_relu_pool_kernel(p_ref, w_ref, scale_ref, shift_ref, o_ref):
    """One batch-chunk per grid step.

    p_ref    : (4, m, K)  bf16  im2col patches; leading axis = pool quadrant
                                (qy, qx), rows = (image, pooled pixel), K = 9*Cin
    w_ref    : (K, Cout)  bf16  conv taps (tap-major, channel-minor rows)
    scale_ref: (1, Cout)  f32   folded BN scale
    shift_ref: (1, Cout)  f32   folded conv-bias + BN shift
    o_ref    : (m, Cout)  f32   pooled output rows = (image, pooled pixel)
    """
    _, m, k = p_ref.shape
    x = p_ref[...].reshape(4 * m, k)                      # trivial leading-dim merge
    acc = jnp.dot(x, w_ref[...], preferred_element_type=jnp.float32)
    y = jnp.maximum(acc * scale_ref[...] + shift_ref[...], 0.0)   # BN + ReLU (f32)
    # 2x2 max-pool == elementwise max over the 4 quadrant row-blocks.
    o_ref[...] = jnp.maximum(jnp.maximum(y[:m], y[m:2 * m]),
                             jnp.maximum(y[2 * m:3 * m], y[3 * m:]))


def conv_bn_relu_pool(x_nhwc, w_oihw, conv_b, gamma, beta, mean, var, eps=1e-5):
    B, H, W, Cin = x_nhwc.shape
    Cout = w_oihw.shape[0]
    Hh, Wh = H // 2, W // 2
    M0 = Hh * Wh
    K = 9 * Cin

    # --- wrapper-side im2col, one patch matrix per 2x2 pool quadrant -------------
    xp = jnp.pad(x_nhwc, ((0, 0), (1, 1), (1, 1), (0, 0)))       # (B, H+2, W+2, Cin)
    quads = []
    for qy in range(2):
        for qx in range(2):
            taps = [xp[:, qy + ky: qy + ky + 2 * Hh: 2,
                         qx + kx: qx + kx + 2 * Wh: 2, :]
                    for ky in range(3) for kx in range(3)]        # 9 x (B, Hh, Wh, Cin)
            quads.append(jnp.concatenate(taps, axis=-1).reshape(B, M0, K))
    patches = jnp.stack(quads, axis=0).reshape(4, B * M0, K).astype(jnp.bfloat16)

    # Weights: row index = tap*Cin + c  (matches the concat order above).
    wmat = jnp.transpose(w_oihw, (2, 3, 1, 0)).reshape(K, Cout).astype(jnp.bfloat16)
    scale = (gamma / jnp.sqrt(var + eps)).astype(jnp.float32)
    shift = ((conv_b - mean) * scale + beta).astype(jnp.float32)

    G = _num_chunks(B)
    m = (B // G) * M0                                             # rows per grid step

    out = pl.pallas_call(
        _conv_bn_relu_pool_kernel,
        out_shape=jax.ShapeDtypeStruct((B * M0, Cout), jnp.float32),
        grid=(G,),
        in_specs=[
            pl.BlockSpec((4, m, K), lambda g: (0, g, 0)),
            pl.BlockSpec((K, Cout), lambda g: (0, 0)),
            pl.BlockSpec((1, Cout), lambda g: (0, 0)),
            pl.BlockSpec((1, Cout), lambda g: (0, 0)),
        ],
        out_specs=pl.BlockSpec((m, Cout), lambda g: (g, 0)),
        compiler_params=pltpu.CompilerParams(dimension_semantics=("parallel",)),
    )(patches, wmat, scale.reshape(1, Cout), shift.reshape(1, Cout))
    return out.reshape(B, Hh, Wh, Cout)                           # NHWC


# ----------------------------------------------------------------------------
# Kernel 2: fused NdLinear((C,H,W)->(h1,h2,h3)) + classifier Linear.
# All three axis transforms, their biases and the classifier weight are folded
# (weights only, exact math) into one matrix + constant in the wrapper.
# ----------------------------------------------------------------------------
def _tail_kernel(x_ref, w_ref, c_ref, o_ref):
    # x_ref: (B, F) bf16; w_ref: (F, ncls) bf16; c_ref: (1, ncls) f32
    o_ref[...] = (jnp.dot(x_ref[...], w_ref[...],
                          preferred_element_type=jnp.float32)
                  + c_ref[...]).astype(o_ref.dtype)


def ndlinear_classifier(feat_nhwc, a1, b1, a2, b2, a3, b3, wc, bc):
    B, H2, W2, C = feat_nhwc.shape
    h1, h2, h3 = a1.shape[0], a2.shape[0], a3.shape[0]
    ncls = wc.shape[0]
    F = H2 * W2 * C

    wc3 = wc.reshape(ncls, h1, h2, h3)
    # Wfused[(h,w,c), j] = sum_{k,m,n} A1[k,c] A2[m,h] A3[n,w] Wc[j,k,m,n]
    wfused = jnp.einsum("kc,mh,nw,jkmn->hwcj", a1, a2, a3, wc3).reshape(F, ncls)
    s2 = jnp.sum(a2, axis=1)
    s3 = jnp.sum(a3, axis=1)
    bias_kmn = (b1[:, None, None] * s2[None, :, None] * s3[None, None, :]
                + b2[None, :, None] * s3[None, None, :]
                + b3[None, None, :])
    const = (bc + jnp.einsum("jkmn,kmn->j", wc3, bias_kmn)).astype(jnp.float32)

    x_flat = feat_nhwc.reshape(B, F).astype(jnp.bfloat16)         # free reshape in HBM
    wfused = wfused.astype(jnp.bfloat16)

    return pl.pallas_call(
        _tail_kernel,
        out_shape=jax.ShapeDtypeStruct((B, ncls), jnp.float32),
        grid=(1,),
        in_specs=[
            pl.BlockSpec((B, F), lambda i: (0, 0)),
            pl.BlockSpec((F, ncls), lambda i: (0, 0)),
            pl.BlockSpec((1, ncls), lambda i: (0, 0)),
        ],
        out_specs=pl.BlockSpec((B, ncls), lambda i: (0, 0)),
    )(x_flat, wfused, const.reshape(1, ncls))


# ----------------------------------------------------------------------------
# Full forward pass
# ----------------------------------------------------------------------------
def hyper_vision_forward(x_nchw, p):
    x = jnp.transpose(x_nchw, (0, 2, 3, 1))                       # NCHW -> NHWC
    x = conv_bn_relu_pool(x, p["conv1_w"], p["conv1_b"],
                          p["bn1_g"], p["bn1_b"], p["bn1_m"], p["bn1_v"])
    # Dropout2d(0.2): identity at inference
    x = conv_bn_relu_pool(x, p["conv2_w"], p["conv2_b"],
                          p["bn2_g"], p["bn2_b"], p["bn2_m"], p["bn2_v"])
    # Dropout2d(0.2): identity at inference
    x = ndlinear_classifier(x, p["a1"], p["nb1"], p["a2"], p["nb2"],
                            p["a3"], p["nb3"], p["wc"], p["bc"])
    # Dropout(0.3): identity at inference
    return x


# ----------------------------------------------------------------------------
# Pure-JAX reference (same semantics as the PyTorch module in eval mode)
# ----------------------------------------------------------------------------
def reference_forward(x, p, eps=1e-5):
    def block(x, w, b, g, beta, m, v):
        y = lax.conv_general_dilated(x, w, (1, 1), "SAME",
                                     dimension_numbers=("NCHW", "OIHW", "NCHW"))
        y = y + b[None, :, None, None]
        y = (y - m[None, :, None, None]) / jnp.sqrt(v + eps)[None, :, None, None]
        y = y * g[None, :, None, None] + beta[None, :, None, None]
        y = jnp.maximum(y, 0.0)
        B, C, H, W = y.shape
        return y.reshape(B, C, H // 2, 2, W // 2, 2).max(axis=(3, 5))

    x = block(x, p["conv1_w"], p["conv1_b"], p["bn1_g"], p["bn1_b"], p["bn1_m"], p["bn1_v"])
    x = block(x, p["conv2_w"], p["conv2_b"], p["bn2_g"], p["bn2_b"], p["bn2_m"], p["bn2_v"])
    t = jnp.einsum("bchw,kc->bkhw", x, p["a1"]) + p["nb1"][None, :, None, None]
    t = jnp.einsum("bkhw,mh->bkmw", t, p["a2"]) + p["nb2"][None, None, :, None]
    t = jnp.einsum("bkmw,nw->bkmn", t, p["a3"]) + p["nb3"][None, None, None, :]
    flat = t.reshape(t.shape[0], -1)
    return flat @ p["wc"].T + p["bc"][None, :]


if __name__ == "__main__":
    B = 2
    hidden_size = (16, 4, 4)
    num_classes = 10
    final_dim = math.prod(hidden_size)

    kp = jax.random.split(jax.random.PRNGKey(0), 24)
    n = lambda k, s, sc=0.1: sc * jax.random.normal(k, s, jnp.float32)
    params = {
        "conv1_w": n(kp[0], (32, 3, 3, 3)),
        "conv1_b": n(kp[1], (32,)),
        "bn1_g": 1.0 + n(kp[2], (32,)),
        "bn1_b": n(kp[3], (32,)),
        "bn1_m": n(kp[4], (32,)),
        "bn1_v": jax.random.uniform(kp[5], (32,), jnp.float32, 0.5, 1.5),
        "conv2_w": n(kp[6], (64, 32, 3, 3)),
        "conv2_b": n(kp[7], (64,)),
        "bn2_g": 1.0 + n(kp[8], (64,)),
        "bn2_b": n(kp[9], (64,)),
        "bn2_m": n(kp[10], (64,)),
        "bn2_v": jax.random.uniform(kp[11], (64,), jnp.float32, 0.5, 1.5),
        "a1": n(kp[12], (hidden_size[0], 64)),
        "nb1": n(kp[13], (hidden_size[0],)),
        "a2": n(kp[14], (hidden_size[1], 8)),
        "nb2": n(kp[15], (hidden_size[1],)),
        "a3": n(kp[16], (hidden_size[2], 8)),
        "nb3": n(kp[17], (hidden_size[2],)),
        "wc": n(kp[18], (num_classes, final_dim)),
        "bc": n(kp[19], (num_classes,)),
    }

    # Input must be (B, 3, 32, 32) so that features come out as (B, 64, 8, 8).
    x = jax.random.normal(kp[20], (B, 3, 32, 32), jnp.float32)

    out = jax.jit(hyper_vision_forward)(x, params)
    out = jax.block_until_ready(out)

    ref = reference_forward(x, params)
    assert out.shape == (B, num_classes)
    assert jnp.allclose(out, ref, rtol=5e-2, atol=5e-2), float(jnp.max(jnp.abs(out - ref)))
    print("KERNEL_OK")
</pallas_src>

<mosaic_0001>
module attributes {stable_mosaic.version = 11 : i64} {
  func.func @_conv_bn_relu_pool_kernel(%arg0: i32, %arg1: memref<4x256x27xbf16, #tpu.memory_space<vmem>>, %arg2: memref<27x32xbf16, #tpu.memory_space<vmem>>, %arg3: memref<1x32xf32, #tpu.memory_space<vmem>>, %arg4: memref<1x32xf32, #tpu.memory_space<vmem>>, %arg5: memref<256x32xf32, #tpu.memory_space<vmem>>) attributes {dimension_semantics = [#tpu.dimension_semantics<parallel>], iteration_bounds = array<i64: 2>, scalar_prefetch = 0 : i64, scratch_operands = 0 : i64, tpu.core_type = #tpu.core_type<tc>, window_params = [{transform_indices = @transform_0, window_bounds = array<i64: 4, 256, 27>}, {pipeline_mode = #tpu.pipeline_mode<synchronous>, transform_indices = @transform_1, window_bounds = array<i64: 27, 32>}, {pipeline_mode = #tpu.pipeline_mode<synchronous>, transform_indices = @transform_2, window_bounds = array<i64: 1, 32>}, {pipeline_mode = #tpu.pipeline_mode<synchronous>, transform_indices = @transform_3, window_bounds = array<i64: 1, 32>}, {transform_indices = @transform_4, window_bounds = array<i64: 256, 32>}]} {
    %c0 = arith.constant 0 : index
    %c0_0 = arith.constant 0 : index
    %c0_1 = arith.constant 0 : index
    %0 = vector.load %arg1[%c0, %c0_0, %c0_1] : memref<4x256x27xbf16, #tpu.memory_space<vmem>>, vector<4x256x27xbf16>
    %1 = vector.shape_cast %0 : vector<4x256x27xbf16> to vector<1024x27xbf16>
    %c0_2 = arith.constant 0 : index
    %c0_3 = arith.constant 0 : index
    %2 = vector.load %arg2[%c0_2, %c0_3] : memref<27x32xbf16, #tpu.memory_space<vmem>>, vector<27x32xbf16>
    %cst = arith.constant dense<0.000000e+00> : vector<1024x32xf32>
    %3 = tpu.matmul %1, %2, %cst {dimension_numbers = #tpu.dot_dimension_numbers<[1], [0], [0], [1], [0, 0, 1, 1], [], []>} : vector<1024x27xbf16>, vector<27x32xbf16>, vector<1024x32xf32> -> vector<1024x32xf32>
    %c0_4 = arith.constant 0 : index
    %c0_5 = arith.constant 0 : index
    %4 = vector.load %arg3[%c0_4, %c0_5] : memref<1x32xf32, #tpu.memory_space<vmem>>, vector<1x32xf32>
    %5 = vector.broadcast %4 : vector<1x32xf32> to vector<1024x32xf32>
    %6 = arith.mulf %3, %5 : vector<1024x32xf32>
    %c0_6 = arith.constant 0 : index
    %c0_7 = arith.constant 0 : index
    %7 = vector.load %arg4[%c0_6, %c0_7] : memref<1x32xf32, #tpu.memory_space<vmem>>, vector<1x32xf32>
    %8 = vector.broadcast %7 : vector<1x32xf32> to vector<1024x32xf32>
    %9 = arith.addf %6, %8 : vector<1024x32xf32>
    %cst_8 = arith.constant 0.000000e+00 : f32
    %10 = vector.broadcast %cst_8 : f32 to vector<1024x32xf32>
    %11 = arith.maximumf %9, %10 : vector<1024x32xf32>
    %12 = vector.extract_strided_slice %11 {offsets = [0, 0], sizes = [256, 32], strides = [1, 1]} : vector<1024x32xf32> to vector<256x32xf32>
    %13 = vector.extract_strided_slice %11 {offsets = [256, 0], sizes = [256, 32], strides = [1, 1]} : vector<1024x32xf32> to vector<256x32xf32>
    %14 = arith.maximumf %12, %13 : vector<256x32xf32>
    %15 = vector.extract_strided_slice %11 {offsets = [512, 0], sizes = [256, 32], strides = [1, 1]} : vector<1024x32xf32> to vector<256x32xf32>
    %16 = vector.extract_strided_slice %11 {offsets = [768, 0], sizes = [256, 32], strides = [1, 1]} : vector<1024x32xf32> to vector<256x32xf32>
    %17 = arith.maximumf %15, %16 : vector<256x32xf32>
    %18 = arith.maximumf %14, %17 : vector<256x32xf32>
    %c0_9 = arith.constant 0 : index
    %c0_10 = arith.constant 0 : index
    %19 = vector.load %arg5[%c0_9, %c0_10] : memref<256x32xf32, #tpu.memory_space<vmem>>, vector<256x32xf32>
    tpu.vector_store %arg5[%c0_9, %c0_10], %18 {strides = array<i32>} : memref<256x32xf32, #tpu.memory_space<vmem>>, vector<256x32xf32>,
    return
  }
  func.func @transform_0(%arg0: i32) -> (i32, i32, i32) {
    %c0_i32 = arith.constant 0 : i32
    %c0_i32_0 = arith.constant 0 : i32
    %c0_i32_1 = arith.constant 0 : i32
    return %c0_i32, %arg0, %c0_i32_0 : i32, i32, i32
  }
  func.func @transform_1(%arg0: i32) -> (i32, i32) {
    %c0_i32 = arith.constant 0 : i32
    %c0_i32_0 = arith.constant 0 : i32
    %c0_i32_1 = arith.constant 0 : i32
    return %c0_i32, %c0_i32_0 : i32, i32
  }
  func.func @transform_2(%arg0: i32) -> (i32, i32) {
    %c0_i32 = arith.constant 0 : i32
    %c0_i32_0 = arith.constant 0 : i32
    %c0_i32_1 = arith.constant 0 : i32
    return %c0_i32, %c0_i32_0 : i32, i32
  }
  func.func @transform_3(%arg0: i32) -> (i32, i32) {
    %c0_i32 = arith.constant 0 : i32
    %c0_i32_0 = arith.constant 0 : i32
    %c0_i32_1 = arith.constant 0 : i32
    return %c0_i32, %c0_i32_0 : i32, i32
  }
  func.func @transform_4(%arg0: i32) -> (i32, i32) {
    %c0_i32 = arith.constant 0 : i32
    %c0_i32_0 = arith.constant 0 : i32
    return %arg0, %c0_i32 : i32, i32
  }
}

module attributes {stable_mosaic.version = 11 : i64} {
  func.func @_conv_bn_relu_pool_kernel(%arg0: i32, %arg1: memref<4x64x288xbf16, #tpu.memory_space<vmem>>, %arg2: memref<288x64xbf16, #tpu.memory_space<vmem>>, %arg3: memref<1x64xf32, #tpu.memory_space<vmem>>, %arg4: memref<1x64xf32, #tpu.memory_space<vmem>>, %arg5: memref<64x64xf32, #tpu.memory_space<vmem>>) attributes {dimension_semantics = [#tpu.dimension_semantics<parallel>], iteration_bounds = array<i64: 2>, scalar_prefetch = 0 : i64, scratch_operands = 0 : i64, tpu.core_type = #tpu.core_type<tc>, window_params = [{transform_indices = @transform_0, window_bounds = array<i64: 4, 64, 288>}, {pipeline_mode = #tpu.pipeline_mode<synchronous>, transform_indices = @transform_1, window_bounds = array<i64: 288, 64>}, {pipeline_mode = #tpu.pipeline_mode<synchronous>, transform_indices = @transform_2, window_bounds = array<i64: 1, 64>}, {pipeline_mode = #tpu.pipeline_mode<synchronous>, transform_indices = @transform_3, window_bounds = array<i64: 1, 64>}, {transform_indices = @transform_4, window_bounds = array<i64: 64, 64>}]} {
    %c0 = arith.constant 0 : index
    %c0_0 = arith.constant 0 : index
    %c0_1 = arith.constant 0 : index
    %0 = vector.load %arg1[%c0, %c0_0, %c0_1] : memref<4x64x288xbf16, #tpu.memory_space<vmem>>, vector<4x64x288xbf16>
    %1 = vector.shape_cast %0 : vector<4x64x288xbf16> to vector<256x288xbf16>
    %c0_2 = arith.constant 0 : index
    %c0_3 = arith.constant 0 : index
    %2 = vector.load %arg2[%c0_2, %c0_3] : memref<288x64xbf16, #tpu.memory_space<vmem>>, vector<288x64xbf16>
    %cst = arith.constant dense<0.000000e+00> : vector<256x64xf32>
    %3 = tpu.matmul %1, %2, %cst {dimension_numbers = #tpu.dot_dimension_numbers<[1], [0], [0], [1], [0, 0, 1, 1], [], []>} : vector<256x288xbf16>, vector<288x64xbf16>, vector<256x64xf32> -> vector<256x64xf32>
    %c0_4 = arith.constant 0 : index
    %c0_5 = arith.constant 0 : index
    %4 = vector.load %arg3[%c0_4, %c0_5] : memref<1x64xf32, #tpu.memory_space<vmem>>, vector<1x64xf32>
    %5 = vector.broadcast %4 : vector<1x64xf32> to vector<256x64xf32>
    %6 = arith.mulf %3, %5 : vector<256x64xf32>
    %c0_6 = arith.constant 0 : index
    %c0_7 = arith.constant 0 : index
    %7 = vector.load %arg4[%c0_6, %c0_7] : memref<1x64xf32, #tpu.memory_space<vmem>>, vector<1x64xf32>
    %8 = vector.broadcast %7 : vector<1x64xf32> to vector<256x64xf32>
    %9 = arith.addf %6, %8 : vector<256x64xf32>
    %cst_8 = arith.constant 0.000000e+00 : f32
    %10 = vector.broadcast %cst_8 : f32 to vector<256x64xf32>
    %11 = arith.maximumf %9, %10 : vector<256x64xf32>
    %12 = vector.extract_strided_slice %11 {offsets = [0, 0], sizes = [64, 64], strides = [1, 1]} : vector<256x64xf32> to vector<64x64xf32>
    %13 = vector.extract_strided_slice %11 {offsets = [64, 0], sizes = [64, 64], strides = [1, 1]} : vector<256x64xf32> to vector<64x64xf32>
    %14 = arith.maximumf %12, %13 : vector<64x64xf32>
    %15 = vector.extract_strided_slice %11 {offsets = [128, 0], sizes = [64, 64], strides = [1, 1]} : vector<256x64xf32> to vector<64x64xf32>
    %16 = vector.extract_strided_slice %11 {offsets = [192, 0], sizes = [64, 64], strides = [1, 1]} : vector<256x64xf32> to vector<64x64xf32>
    %17 = arith.maximumf %15, %16 : vector<64x64xf32>
    %18 = arith.maximumf %14, %17 : vector<64x64xf32>
    %c0_9 = arith.constant 0 : index
    %c0_10 = arith.constant 0 : index
    %19 = vector.load %arg5[%c0_9, %c0_10] : memref<64x64xf32, #tpu.memory_space<vmem>>, vector<64x64xf32>
    tpu.vector_store %arg5[%c0_9, %c0_10], %18 {strides = array<i32>} : memref<64x64xf32, #tpu.memory_space<vmem>>, vector<64x64xf32>,
    return
  }
  func.func @transform_0(%arg0: i32) -> (i32, i32, i32) {
    %c0_i32 = arith.constant 0 : i32
    %c0_i32_0 = arith.constant 0 : i32
    %c0_i32_1 = arith.constant 0 : i32
    return %c0_i32, %arg0, %c0_i32_0 : i32, i32, i32
  }
  func.func @transform_1(%arg0: i32) -> (i32, i32) {
    %c0_i32 = arith.constant 0 : i32
    %c0_i32_0 = arith.constant 0 : i32
    %c0_i32_1 = arith.constant 0 : i32
    return %c0_i32, %c0_i32_0 : i32, i32
  }
  func.func @transform_2(%arg0: i32) -> (i32, i32) {
    %c0_i32 = arith.constant 0 : i32
    %c0_i32_0 = arith.constant 0 : i32
    %c0_i32_1 = arith.constant 0 : i32
    return %c0_i32, %c0_i32_0 : i32, i32
  }
  func.func @transform_3(%arg0: i32) -> (i32, i32) {
    %c0_i32 = arith.constant 0 : i32
    %c0_i32_0 = arith.constant 0 : i32
    %c0_i32_1 = arith.constant 0 : i32
    return %c0_i32, %c0_i32_0 : i32, i32
  }
  func.func @transform_4(%arg0: i32) -> (i32, i32) {
    %c0_i32 = arith.constant 0 : i32
    %c0_i32_0 = arith.constant 0 : i32
    return %arg0, %c0_i32 : i32, i32
  }
}

module attributes {stable_mosaic.version = 11 : i64} {
  func.func @_tail_kernel(%arg0: i32, %arg1: memref<2x4096xbf16, #tpu.memory_space<vmem>>, %arg2: memref<4096x10xbf16, #tpu.memory_space<vmem>>, %arg3: memref<1x10xf32, #tpu.memory_space<vmem>>, %arg4: memref<2x10xf32, #tpu.memory_space<vmem>>) attributes {dimension_semantics = [#tpu.dimension_semantics<arbitrary>], iteration_bounds = array<i64: 1>, scalar_prefetch = 0 : i64, scratch_operands = 0 : i64, tpu.core_type = #tpu.core_type<tc>, window_params = [{pipeline_mode = #tpu.pipeline_mode<synchronous>, transform_indices = @transform_0, window_bounds = array<i64: 2, 4096>}, {pipeline_mode = #tpu.pipeline_mode<synchronous>, transform_indices = @transform_1, window_bounds = array<i64: 4096, 10>}, {pipeline_mode = #tpu.pipeline_mode<synchronous>, transform_indices = @transform_2, window_bounds = array<i64: 1, 10>}, {pipeline_mode = #tpu.pipeline_mode<synchronous>, transform_indices = @transform_3, window_bounds = array<i64: 2, 10>}]} {
    %c0 = arith.constant 0 : index
    %c0_0 = arith.constant 0 : index
    %0 = vector.load %arg1[%c0, %c0_0] : memref<2x4096xbf16, #tpu.memory_space<vmem>>, vector<2x4096xbf16>
    %c0_1 = arith.constant 0 : index
    %c0_2 = arith.constant 0 : index
    %1 = vector.load %arg2[%c0_1, %c0_2] : memref<4096x10xbf16, #tpu.memory_space<vmem>>, vector<4096x10xbf16>
    %cst = arith.constant dense<0.000000e+00> : vector<2x10xf32>
    %2 = tpu.matmul %0, %1, %cst {dimension_numbers = #tpu.dot_dimension_numbers<[1], [0], [0], [1], [0, 0, 1, 1], [], []>} : vector<2x4096xbf16>, vector<4096x10xbf16>, vector<2x10xf32> -> vector<2x10xf32>
    %c0_3 = arith.constant 0 : index
    %c0_4 = arith.constant 0 : index
    %3 = vector.load %arg3[%c0_3, %c0_4] : memref<1x10xf32, #tpu.memory_space<vmem>>, vector<1x10xf32>
    %4 = vector.broadcast %3 : vector<1x10xf32> to vector<2x10xf32>
    %5 = arith.addf %2, %4 : vector<2x10xf32>
    %c0_5 = arith.constant 0 : index
    %c0_6 = arith.constant 0 : index
    %6 = vector.load %arg4[%c0_5, %c0_6] : memref<2x10xf32, #tpu.memory_space<vmem>>, vector<2x10xf32>
    tpu.vector_store %arg4[%c0_5, %c0_6], %5 {strides = array<i32>} : memref<2x10xf32, #tpu.memory_space<vmem>>, vector<2x10xf32>,
    return
  }
  func.func @transform_0(%arg0: i32) -> (i32, i32) {
    %c0_i32 = arith.constant 0 : i32
    %c0_i32_0 = arith.constant 0 : i32
    %c0_i32_1 = arith.constant 0 : i32
    return %c0_i32, %c0_i32_0 : i32, i32
  }
  func.func @transform_1(%arg0: i32) -> (i32, i32) {
    %c0_i32 = arith.constant 0 : i32
    %c0_i32_0 = arith.constant 0 : i32
    %c0_i32_1 = arith.constant 0 : i32
    return %c0_i32, %c0_i32_0 : i32, i32
  }
  func.func @transform_2(%arg0: i32) -> (i32, i32) {
    %c0_i32 = arith.constant 0 : i32
    %c0_i32_0 = arith.constant 0 : i32
    %c0_i32_1 = arith.constant 0 : i32
    return %c0_i32, %c0_i32_0 : i32, i32
  }
  func.func @transform_3(%arg0: i32) -> (i32, i32) {
    %c0_i32 = arith.constant 0 : i32
    %c0_i32_0 = arith.constant 0 : i32
    %c0_i32_1 = arith.constant 0 : i32
    return %c0_i32, %c0_i32_0 : i32, i32
  }
}

</mosaic_0001>

<bundles_post_ra>
// kernel: hyper_vision_forward.3
= control target key start
LH: loop header
LB: loop body
LE: loop exit
PB: predicated region body
PF: predicated region fallthrough
CT: control target
= control target key end

     0   :  { %s2821_s15 = smov 0   ;;  %s2823_s16 = smov 0   ;;  %s3486_s0 = inlined_call_operand.vmem [shape: bf16[4,512,27], index: 0, kind: input, shape index: {}]   ;;  %s3487_s1 = inlined_call_operand.vmem [shape: bf16[27,32], index: 1, kind: input, shape index: {}]   ;;  %s3488_s2 = inlined_call_operand.vmem [shape: f32[1,32], index: 2, kind: input, shape index: {}]   ;;  %s3489_s3 = inlined_call_operand.vmem [shape: f32[1,32], index: 3, kind: input, shape index: {}]   ;;  %s3490_s4 = inlined_call_operand.vmem [shape: f32[512,32], index: 4, kind: output, shape index: {}]  }
   0x1   :  { %s2825_s17 = smov 0  }
   0x2 LB: > { %s2328_s18 = sadd.s32 4294967295, %s2793_s17   ;;  %s2838_s19 = sadd.s32 1, %s2793_s17   ;;  %s2793_s17 = sphi %s2825_s17, %s3493_s17   ;;  %s2789_s16 = sphi %s2823_s16, %s3492_s16   ;;  %s2785_s15 = sphi %s2821_s15, %s3491_s15  }
   0x3   : > { %s18_s20 = ssub.s32 %s2793_s17, %s2838_s19  ;;  %s21_s21 = sadd.s32 1, %s2789_s16 }
   0x4   : > { %p19_p0 = scmp.eq.s32.totalorder %s18_s20, 0  ;;  %p28_p1 = scmp.ne.s32.totalorder %s2789_s16, %s2785_s15 }
   0x5   : > { %p29_p2 = scmp.eq.s32.totalorder %s2793_s17, 0  ;;  %p2331_p4 = scmp.ge.s32.totalorder %s2793_s17, 2 }
   0x6   : > { %s2847_s22 = scalar_select %p19_p0, %s2789_s16, %s21_s21  }
   0x7   : > { %p30_p3 = por %p29_p2, %p28_p1  ;;  %152 = sbr.rel (%p2331_p4) target bundleno = 80 (0x50), region = 28 }
   0xc   : > { %155 = sbr.rel (!%p30_p3) target bundleno = 80 (0x50), region = 32  ;;  %s157_s23 = sand.u32 (%p30_p3), 1, %s2789_s16  }
   0xd   : > { %s2669_s24 = sshll.u32 (%p30_p3), %s2793_s17, 7  ;;  %s2332_s25 = sshll.u32 (%p30_p3), %s157_s23, 9 }
   0xe   : > { %s2855_s28 = scalar_lea.vmem (%p30_p3), %s3486_s0, %s2669_s24  ;;  %s2860_s29 = scalar_lea.vmem (%p30_p3), [#allocation2], %s2332_s25 }
   0xf   : > { %v179_v0 = vld [vmem:[%s2855_s28] sm:$0xff] (%p30_p3)   ;;  %v183_v1 = vld [vmem:[%s2855_s28 + $0x8] sm:$0xff] (%p30_p3)   ;;  %v187_v2 = vld [vmem:[%s2855_s28 + $0x10] sm:$0xff] (%p30_p3)  }
  0x10   : > { %180 = vst [vmem:[%s2860_s29] sm:$0xff] (%p30_p3), %v179_v0   ;;  %v191_v3 = vld [vmem:[%s2855_s28 + $0x18] sm:$0xff] (%p30_p3)   ;;  %v195_v4 = vld [vmem:[%s2855_s28 + $0x20] sm:$0xff] (%p30_p3)   ;;  %v199_v5 = vld [vmem:[%s2855_s28 + $0x28] sm:$0xff] (%p30_p3)  }
  0x11   : > { %184 = vst [vmem:[%s2860_s29 + $0x8] sm:$0xff] %v183_v1   ;;  %v203_v6 = vld [vmem:[%s2855_s28 + $0x30] sm:$0xff]   ;;  %v207_v7 = vld [vmem:[%s2855_s28 + $0x38] sm:$0xff]   ;;  %v211_v8 = vld [vmem:[%s2855_s28 + $0x40] sm:$0xff]  }
  0x12   : > { %188 = vst [vmem:[%s2860_s29 + $0x10] sm:$0xff] %v187_v2   ;;  %v215_v9 = vld [vmem:[%s2855_s28 + $0x48] sm:$0xff]   ;;  %v219_v10 = vld [vmem:[%s2855_s28 + $0x50] sm:$0xff]   ;;  %v223_v11 = vld [vmem:[%s2855_s28 + $0x58] sm:$0xff]  }
  0x13   : > { %192 = vst [vmem:[%s2860_s29 + $0x18] sm:$0xff] %v191_v3   ;;  %v227_v12 = vld [vmem:[%s2855_s28 + $0x60] sm:$0xff]   ;;  %v231_v13 = vld [vmem:[%s2855_s28 + $0x68] sm:$0xff]   ;;  %v235_v14 = vld [vmem:[%s2855_s28 + $0x70] sm:$0xff]  }
  0x14   : > { %196 = vst [vmem:[%s2860_s29 + $0x20] sm:$0xff] %v195_v4   ;;  %v239_v15 = vld [vmem:[%s2855_s28 + $0x78] sm:$0xff]   ;;  %v243_v16 = vld [vmem:[%s2855_s28 + $0x100] sm:$0xff]   ;;  %v247_v17 = vld [vmem:[%s2855_s28 + $0x108] sm:$0xff]  }
  0x15   : > { %200 = vst [vmem:[%s2860_s29 + $0x28] sm:$0xff] %v199_v5   ;;  %v251_v18 = vld [vmem:[%s2855_s28 + $0x110] sm:$0xff]   ;;  %v255_v19 = vld [vmem:[%s2855_s28 + $0x118] sm:$0xff]   ;;  %v259_v20 = vld [vmem:[%s2855_s28 + $0x120] sm:$0xff]  }
  0x16   : > { %204 = vst [vmem:[%s2860_s29 + $0x30] sm:$0xff] %v203_v6   ;;  %v263_v21 = vld [vmem:[%s2855_s28 + $0x128] sm:$0xff]   ;;  %v267_v22 = vld [vmem:[%s2855_s28 + $0x130] sm:$0xff]   ;;  %v271_v23 = vld [vmem:[%s2855_s28 + $0x138] sm:$0xff]  }
  0x17   : > { %208 = vst [vmem:[%s2860_s29 + $0x38] sm:$0xff] %v207_v7   ;;  %v275_v24 = vld [vmem:[%s2855_s28 + $0x140] sm:$0xff]   ;;  %v279_v25 = vld [vmem:[%s2855_s28 + $0x148] sm:$0xff]   ;;  %v283_v26 = vld [vmem:[%s2855_s28 + $0x150] sm:$0xff]  }
  0x18   : > { %212 = vst [vmem:[%s2860_s29 + $0x40] sm:$0xff] %v211_v8   ;;  %v287_v27 = vld [vmem:[%s2855_s28 + $0x158] sm:$0xff]   ;;  %v291_v28 = vld [vmem:[%s2855_s28 + $0x160] sm:$0xff]   ;;  %v295_v29 = vld [vmem:[%s2855_s28 + $0x168] sm:$0xff]  }
  0x19   : > { %216 = vst [vmem:[%s2860_s29 + $0x48] sm:$0xff] %v215_v9   ;;  %v299_v30 = vld [vmem:[%s2855_s28 + $0x170] sm:$0xff]   ;;  %v303_v31 = vld [vmem:[%s2855_s28 + $0x178] sm:$0xff]   ;;  %v307_v32 = vld [vmem:[%s2855_s28 + $0x200] sm:$0xff]  }
  0x1a   : > { %220 = vst [vmem:[%s2860_s29 + $0x50] sm:$0xff] %v219_v10   ;;  %v311_v33 = vld [vmem:[%s2855_s28 + $0x208] sm:$0xff]   ;;  %v315_v34 = vld [vmem:[%s2855_s28 + $0x210] sm:$0xff]   ;;  %v319_v35 = vld [vmem:[%s2855_s28 + $0x218] sm:$0xff]  }
  0x1b   : > { %224 = vst [vmem:[%s2860_s29 + $0x58] sm:$0xff] %v223_v11   ;;  %v323_v36 = vld [vmem:[%s2855_s28 + $0x220] sm:$0xff]   ;;  %v327_v37 = vld [vmem:[%s2855_s28 + $0x228] sm:$0xff]   ;;  %v331_v38 = vld [vmem:[%s2855_s28 + $0x230] sm:$0xff]  }
  0x1c   : > { %228 = vst [vmem:[%s2860_s29 + $0x60] sm:$0xff] %v227_v12   ;;  %v335_v39 = vld [vmem:[%s2855_s28 + $0x238] sm:$0xff]   ;;  %v339_v40 = vld [vmem:[%s2855_s28 + $0x240] sm:$0xff]   ;;  %v343_v41 = vld [vmem:[%s2855_s28 + $0x248] sm:$0xff]  }
  0x1d   : > { %232 = vst [vmem:[%s2860_s29 + $0x68] sm:$0xff] %v231_v13   ;;  %v347_v42 = vld [vmem:[%s2855_s28 + $0x250] sm:$0xff]   ;;  %v351_v43 = vld [vmem:[%s2855_s28 + $0x258] sm:$0xff]   ;;  %v355_v44 = vld [vmem:[%s2855_s28 + $0x260] sm:$0xff]  }
  0x1e   : > { %236 = vst [vmem:[%s2860_s29 + $0x70] sm:$0xff] %v235_v14   ;;  %v359_v45 = vld [vmem:[%s2855_s28 + $0x268] sm:$0xff]   ;;  %v363_v46 = vld [vmem:[%s2855_s28 + $0x270] sm:$0xff]   ;;  %v367_v47 = vld [vmem:[%s2855_s28 + $0x278] sm:$0xff]  }
  0x1f   : > { %240 = vst [vmem:[%s2860_s29 + $0x78] sm:$0xff] %v239_v15   ;;  %v371_v48 = vld [vmem:[%s2855_s28 + $0x300] sm:$0xff]   ;;  %v375_v49 = vld [vmem:[%s2855_s28 + $0x308] sm:$0xff]   ;;  %v379_v50 = vld [vmem:[%s2855_s28 + $0x310] sm:$0xff]  }
  0x20   : > { %244 = vst [vmem:[%s2860_s29 + $0x80] sm:$0xff] %v243_v16   ;;  %v383_v51 = vld [vmem:[%s2855_s28 + $0x318] sm:$0xff]   ;;  %v387_v52 = vld [vmem:[%s2855_s28 + $0x320] sm:$0xff]   ;;  %v391_v53 = vld [vmem:[%s2855_s28 + $0x328] sm:$0xff]  }
  0x21   : > { %248 = vst [vmem:[%s2860_s29 + $0x88] sm:$0xff] %v247_v17   ;;  %v395_v54 = vld [vmem:[%s2855_s28 + $0x330] sm:$0xff]   ;;  %v399_v55 = vld [vmem:[%s2855_s28 + $0x338] sm:$0xff]   ;;  %v403_v56 = vld [vmem:[%s2855_s28 + $0x340] sm:$0xff]  }
  0x22   : > { %252 = vst [vmem:[%s2860_s29 + $0x90] sm:$0xff] %v251_v18   ;;  %v407_v57 = vld [vmem:[%s2855_s28 + $0x348] sm:$0xff]   ;;  %v411_v58 = vld [vmem:[%s2855_s28 + $0x350] sm:$0xff]   ;;  %v415_v59 = vld [vmem:[%s2855_s28 + $0x358] sm:$0xff]  }
  0x23   : > { %256 = vst [vmem:[%s2860_s29 + $0x98] sm:$0xff] %v255_v19   ;;  %v419_v60 = vld [vmem:[%s2855_s28 + $0x360] sm:$0xff]   ;;  %v423_v61 = vld [vmem:[%s2855_s28 + $0x368] sm:$0xff]   ;;  %v427_v62 = vld [vmem:[%s2855_s28 + $0x370] sm:$0xff]  }
  0x24   : > { %260 = vst [vmem:[%s2860_s29 + $0xa0] sm:$0xff] %v259_v20   ;;  %v431_v63 = vld [vmem:[%s2855_s28 + $0x378] sm:$0xff]  }
  0x25   : > { %264 = vst [vmem:[%s2860_s29 + $0xa8] sm:$0xff] %v263_v21  }
  0x26   : > { %268 = vst [vmem:[%s2860_s29 + $0xb0] sm:$0xff] %v267_v22  }
  0x27   : > { %272 = vst [vmem:[%s2860_s29 + $0xb8] sm:$0xff] %v271_v23  }
  0x28   : > { %276 = vst [vmem:[%s2860_s29 + $0xc0] sm:$0xff] %v275_v24  }
  0x29   : > { %280 = vst [vmem:[%s2860_s29 + $0xc8] sm:$0xff] %v279_v25  }
  0x2a   : > { %284 = vst [vmem:[%s2860_s29 + $0xd0] sm:$0xff] %v283_v26  }
  0x2b   : > { %288 = vst [vmem:[%s2860_s29 + $0xd8] sm:$0xff] %v287_v27  }
  0x2c   : > { %292 = vst [vmem:[%s2860_s29 + $0xe0] sm:$0xff] %v291_v28  }
  0x2d   : > { %296 = vst [vmem:[%s2860_s29 + $0xe8] sm:$0xff] %v295_v29  }
  0x2e   : > { %300 = vst [vmem:[%s2860_s29 + $0xf0] sm:$0xff] %v299_v30  }
  0x2f   : > { %304 = vst [vmem:[%s2860_s29 + $0xf8] sm:$0xff] %v303_v31  }
  0x30   : > { %308 = vst [vmem:[%s2860_s29 + $0x100] sm:$0xff] %v307_v32  }
  0x31   : > { %312 = vst [vmem:[%s2860_s29 + $0x108] sm:$0xff] %v311_v33  }
  0x32   : > { %316 = vst [vmem:[%s2860_s29 + $0x110] sm:$0xff] %v315_v34  }
  0x33   : > { %320 = vst [vmem:[%s2860_s29 + $0x118] sm:$0xff] %v319_v35  }
  0x34   : > { %324 = vst [vmem:[%s2860_s29 + $0x120] sm:$0xff] %v323_v36  }
  0x35   : > { %328 = vst [vmem:[%s2860_s29 + $0x128] sm:$0xff] %v327_v37  }
  0x36   : > { %332 = vst [vmem:[%s2860_s29 + $0x130] sm:$0xff] %v331_v38  }
  0x37   : > { %336 = vst [vmem:[%s2860_s29 + $0x138] sm:$0xff] %v335_v39  }
  0x38   : > { %340 = vst [vmem:[%s2860_s29 + $0x140] sm:$0xff] %v339_v40  }
  0x39   : > { %344 = vst [vmem:[%s2860_s29 + $0x148] sm:$0xff] %v343_v41  }
  0x3a   : > { %348 = vst [vmem:[%s2860_s29 + $0x150] sm:$0xff] %v347_v42  }
  0x3b   : > { %352 = vst [vmem:[%s2860_s29 + $0x158] sm:$0xff] %v351_v43  }
  0x3c   : > { %356 = vst [vmem:[%s2860_s29 + $0x160] sm:$0xff] %v355_v44  }
  0x3d   : > { %360 = vst [vmem:[%s2860_s29 + $0x168] sm:$0xff] %v359_v45  }
  0x3e   : > { %364 = vst [vmem:[%s2860_s29 + $0x170] sm:$0xff] %v363_v46  }
  0x3f   : > { %368 = vst [vmem:[%s2860_s29 + $0x178] sm:$0xff] %v367_v47  }
  0x40   : > { %372 = vst [vmem:[%s2860_s29 + $0x180] sm:$0xff] %v371_v48  }
  0x41   : > { %376 = vst [vmem:[%s2860_s29 + $0x188] sm:$0xff] %v375_v49  }
  0x42   : > { %380 = vst [vmem:[%s2860_s29 + $0x190] sm:$0xff] %v379_v50  }
  0x43   : > { %384 = vst [vmem:[%s2860_s29 + $0x198] sm:$0xff] %v383_v51  }
  0x44   : > { %388 = vst [vmem:[%s2860_s29 + $0x1a0] sm:$0xff] %v387_v52  }
  0x45   : > { %392 = vst [vmem:[%s2860_s29 + $0x1a8] sm:$0xff] %v391_v53  }
  0x46   : > { %396 = vst [vmem:[%s2860_s29 + $0x1b0] sm:$0xff] %v395_v54  }
  0x47   : > { %400 = vst [vmem:[%s2860_s29 + $0x1b8] sm:$0xff] %v399_v55  }
  0x48   : > { %404 = vst [vmem:[%s2860_s29 + $0x1c0] sm:$0xff] %v403_v56  }
  0x49   : > { %408 = vst [vmem:[%s2860_s29 + $0x1c8] sm:$0xff] %v407_v57  }
  0x4a   : > { %412 = vst [vmem:[%s2860_s29 + $0x1d0] sm:$0xff] %v411_v58  }
  0x4b   : > { %416 = vst [vmem:[%s2860_s29 + $0x1d8] sm:$0xff] %v415_v59  }
  0x4c   : > { %420 = vst [vmem:[%s2860_s29 + $0x1e0] sm:$0xff] %v419_v60  }
  0x4d   : > { %424 = vst [vmem:[%s2860_s29 + $0x1e8] sm:$0xff] %v423_v61  }
  0x4e   : > { %428 = vst [vmem:[%s2860_s29 + $0x1f0] sm:$0xff] %v427_v62  }
  0x4f   : > { %432 = vst [vmem:[%s2860_s29 + $0x1f8] sm:$0xff] %v431_v63  }
  0x50 PF: > { %p2335_p5 = scmp.ge.s32.totalorder %s2793_s17, 1  ;;  %p713_p6 = scmp.lt.s32.totalorder %s2793_s17, 3 }
  0x52   : > { %p714_p7 = pnand %p2335_p5, %p713_p6 }
  0x53   : > { %s720_s8 = sand.u32 (!%p714_p7), 1, %s2785_s15   ;;  %s2337_s21 = sshll.u32 (!%p714_p7), %s2328_s18, 5 }
  0x54   : > { %717 = sbr.rel (%p714_p7) target bundleno = 494 (0x1ee), region = 73  ;;  %s2336_s9 = sshll.u32 (!%p714_p7), %s720_s8, 9 }
  0x55   : > { %s2999_s12 = scalar_lea.vmem (!%p714_p7), [#allocation2], %s2336_s9  ;;  %p747_p8 = scmp.lt.s32.totalorder (!%p714_p7), %s2337_s21, 63 }
  0x59   : > { %v2601_v0 = vld [vmem:[%s3487_s1 + $0x8] sm:$0xf]  ;;  %v2735_v1 = vld [vmem:[%s3487_s1 + $0x8] sm:$0x30]  ;;  %vm1409_vm0 = vcmask 1044480   ;;  %vm1410_vm1 = vcmask 1045504  }
  0x5a   : > { %v2602_v2 = vor.u32 %v2735_v1, %v2601_v0  ;;  %v2795_v3 = vmov 65535   ;;  %v2734_v7 = vld [vmem:[%s3487_s1] sm:$0xff]  ;;  %vm1216_vm2 = vcmask 220160   ;;  %v2671_v12 = vld [vmem:[%s2999_s12 + $0x8] sm:$0xff]  ;;  %v2672_v16 = vld [vmem:[%s2999_s12 + $0x10] sm:$0xff]  ;;  %s3495_s21 = smov (!%p747_p8, %s2337_s21), 63 }
  0x5b   : > { %v1411_v4 = vsel %vm1409_vm0, 4294967295, %v2795_v3  ;;  %v2670_v8 = vld [vmem:[%s2999_s12] sm:$0xff]  ;;  %v2687_v13 = vld [vmem:[%s2999_s12 + $0x88] sm:$0xff]  ;;  %v2688_v17 = vld [vmem:[%s2999_s12 + $0x90] sm:$0xff]  ;;  %s2338_s17 = sshll.u32 %s3495_s21, 3  ;;  %vm2233_vm3 = vcmask 261120  }
  0x5c   : > { %v1412_v5 = vsel %vm1410_vm1, %v1411_v4, 0  ;;  %v2686_v9 = vld [vmem:[%s2999_s12 + $0x80] sm:$0xff]  ;;  %v2703_v14 = vld [vmem:[%s2999_s12 + $0x108] sm:$0xff]  ;;  %v2704_v18 = vld [vmem:[%s2999_s12 + $0x110] sm:$0xff]  ;;  %s3100_s24 = scalar_lea.vmem %s3490_s4, %s2338_s17 }
  0x5d   : > { %v1414_v6 = vand.u32 %v2602_v2, %v1412_v5  ;;  %v2702_v10 = vld [vmem:[%s2999_s12 + $0x100] sm:$0xff]  ;;  %v2719_v15 = vld [vmem:[%s2999_s12 + $0x188] sm:$0xff]  ;;  %v2720_v19 = vld [vmem:[%s2999_s12 + $0x190] sm:$0xff] }
  0x5e   : > { %v2718_v11 = vld [vmem:[%s2999_s12 + $0x180] sm:$0xff]  ;;  %v2673_v20 = vld [vmem:[%s2999_s12 + $0x18] sm:$0xff]  ;;  %v2675_v28 = vld [vmem:[%s2999_s12 + $0x28] sm:$0xff] }
  0x5f   : > { %1422 = vmatpush.bf16.msra.mxu0 %v1414_v6  ;;  %2736 = vmatpush.bf16.msra.mxu1 %v1414_v6  ;;  %v2689_v21 = vld [vmem:[%s2999_s12 + $0x98] sm:$0xff]  ;;  %v2674_v24 = vld [vmem:[%s2999_s12 + $0x20] sm:$0xff]  ;;  %v2691_v29 = vld [vmem:[%s2999_s12 + $0xa8] sm:$0xff] }
  0x60   : > { %2737 = vmatpush.bf16.msra.mxu2 %v1414_v6  ;;  %2738 = vmatpush.bf16.msra.mxu3 %v1414_v6  ;;  %v2705_v22 = vld [vmem:[%s2999_s12 + $0x118] sm:$0xff]  ;;  %v2690_v25 = vld [vmem:[%s2999_s12 + $0xa0] sm:$0xff]  ;;  %v2707_v30 = vld [vmem:[%s2999_s12 + $0x128] sm:$0xff] }
  0x61   : > { %v2721_v23 = vld [vmem:[%s2999_s12 + $0x198] sm:$0xff]  ;;  %v2706_v26 = vld [vmem:[%s2999_s12 + $0x120] sm:$0xff]  ;;  %v2723_v31 = vld [vmem:[%s2999_s12 + $0x1a8] sm:$0xff] }
  0x62   : > { %v2722_v27 = vld [vmem:[%s2999_s12 + $0x1a0] sm:$0xff]  ;;  %v2676_v32 = vld [vmem:[%s2999_s12 + $0x30] sm:$0xff]  ;;  %v2677_v36 = vld [vmem:[%s2999_s12 + $0x38] sm:$0xff] }
  0x63   : > { %1423 = vmatpush.bf16.msra.mxu0 %v2734_v7  ;;  %2739 = vmatpush.bf16.msra.mxu1 %v2734_v7  ;;  %v2692_v33 = vld [vmem:[%s2999_s12 + $0xb0] sm:$0xff]  ;;  %v2693_v37 = vld [vmem:[%s2999_s12 + $0xb8] sm:$0xff]  ;;  %v3068_v40 = vld [vmem:[%s3488_s2] ss:$0 sm:$0xff] }
  0x64   : > { %2740 = vmatpush.bf16.msra.mxu2 %v2734_v7  ;;  %2741 = vmatpush.bf16.msra.mxu3 %v2734_v7  ;;  %v2708_v34 = vld [vmem:[%s2999_s12 + $0x130] sm:$0xff]  ;;  %v2709_v38 = vld [vmem:[%s2999_s12 + $0x138] sm:$0xff]  ;;  %v2678_v41 = vld [vmem:[%s2999_s12 + $0x40] sm:$0xff] }
  0x65   : > { %v2724_v35 = vld [vmem:[%s2999_s12 + $0x1b0] sm:$0xff]  ;;  %v2725_v39 = vld [vmem:[%s2999_s12 + $0x1b8] sm:$0xff]  ;;  %v2694_v42 = vld [vmem:[%s2999_s12 + $0xc0] sm:$0xff] }
  0x66   : > { %2603 = vmatmul.msk.bf16.vlgmr.msra.gmra.mxu0 %vm1216_vm2, %v2670_v8  ;;  %2619 = vmatmul.msk.bf16.vlgmr.msra.gmra.mxu1 %vm1216_vm2, %v2686_v9  ;;  %v3075_v44 = vld [vmem:[%s3489_s3] ss:$0 sm:$0xff]  ;;  %v2679_v8 = vld [vmem:[%s2999_s12 + $0x48] sm:$0xff] }
  0x67   : > { %2635 = vmatmul.msk.bf16.vlgmr.msra.gmra.mxu2 %vm1216_vm2, %v2702_v10  ;;  %2651 = vmatmul.msk.bf16.vlgmr.msra.gmra.mxu3 %vm1216_vm2, %v2718_v11  ;;  %v2710_v46 = vld [vmem:[%s2999_s12 + $0x140] sm:$0xff]  ;;  %v2695_v9 = vld [vmem:[%s2999_s12 + $0xc8] sm:$0xff] }
  0x68   : > { %v2726_v47 = vld [vmem:[%s2999_s12 + $0x1c0] sm:$0xff] }
  0x76   : > { %2604 = vmatmul.msk.bf16.gmra.mxu0 %vm1216_vm2, %v2671_v12  ;;  %2620 = vmatmul.msk.bf16.gmra.mxu1 %vm1216_vm2, %v2687_v13 }
  0x77   : > { %2636 = vmatmul.msk.bf16.gmra.mxu2 %vm1216_vm2, %v2703_v14  ;;  %2652 = vmatmul.msk.bf16.gmra.mxu3 %vm1216_vm2, %v2719_v15  ;;  %v2711_v15 = vld [vmem:[%s2999_s12 + $0x148] sm:$0xff] }
  0x86   : > { %2605 = vmatmul.msk.bf16.gmra.mxu0 %vm1216_vm2, %v2672_v16  ;;  %2621 = vmatmul.msk.bf16.gmra.mxu1 %vm1216_vm2, %v2688_v17  ;;  %v2727_v16 = vld [vmem:[%s2999_s12 + $0x1c8] sm:$0xff] }
  0x87   : > { %2637 = vmatmul.msk.bf16.gmra.mxu2 %vm1216_vm2, %v2704_v18  ;;  %2653 = vmatmul.msk.bf16.gmra.mxu3 %vm1216_vm2, %v2720_v19 }
  0x96   : > { %2606 = vmatmul.msk.bf16.gmra.mxu0 %vm1216_vm2, %v2673_v20  ;;  %2622 = vmatmul.msk.bf16.gmra.mxu1 %vm1216_vm2, %v2689_v21 }
  0x97   : > { %2638 = vmatmul.msk.bf16.gmra.mxu2 %vm1216_vm2, %v2705_v22  ;;  %2654 = vmatmul.msk.bf16.gmra.mxu3 %vm1216_vm2, %v2721_v23 }
  0xa6   : > { %2607 = vmatmul.msk.bf16.gmra.mxu0 %vm1216_vm2, %v2674_v24  ;;  %2623 = vmatmul.msk.bf16.gmra.mxu1 %vm1216_vm2, %v2690_v25 }
  0xa7   : > { %2639 = vmatmul.msk.bf16.gmra.mxu2 %vm1216_vm2, %v2706_v26  ;;  %2655 = vmatmul.msk.bf16.gmra.mxu3 %vm1216_vm2, %v2722_v27 }
  0xb6   : > { %2608 = vmatmul.msk.bf16.gmra.mxu0 %vm1216_vm2, %v2675_v28  ;;  %2624 = vmatmul.msk.bf16.gmra.mxu1 %vm1216_vm2, %v2691_v29 }
  0xb7   : > { %2640 = vmatmul.msk.bf16.gmra.mxu2 %vm1216_vm2, %v2707_v30  ;;  %2656 = vmatmul.msk.bf16.gmra.mxu3 %vm1216_vm2, %v2723_v31 }
  0xc6   : > { %2609 = vmatmul.msk.bf16.gmra.mxu0 %vm1216_vm2, %v2676_v32  ;;  %2625 = vmatmul.msk.bf16.gmra.mxu1 %vm1216_vm2, %v2692_v33 }
  0xc7   : > { %2641 = vmatmul.msk.bf16.gmra.mxu2 %vm1216_vm2, %v2708_v34  ;;  %2657 = vmatmul.msk.bf16.gmra.mxu3 %vm1216_vm2, %v2724_v35 }
  0xd6   : > { %2610 = vmatmul.msk.bf16.gmra.mxu0 %vm1216_vm2, %v2677_v36  ;;  %2626 = vmatmul.msk.bf16.gmra.mxu1 %vm1216_vm2, %v2693_v37 }
  0xd7   : > { %2642 = vmatmul.msk.bf16.gmra.mxu2 %vm1216_vm2, %v2709_v38  ;;  %2658 = vmatmul.msk.bf16.gmra.mxu3 %vm1216_vm2, %v2725_v39 }
  0xe3   : > { %v1425_v43 = vpop.f32.mrf.mxu0  ;;  %v1505_v45 = vpop.f32.mrf.mxu1 }
  0xe4   : > { %v1749_v48 = vmul.f32 %v3068_v40, %v1425_v43  ;;  %v1781_v49 = vmul.f32 %v3068_v40, %v1505_v45 }
  0xe6   : > { %2611 = vmatmul.msk.bf16.gmra.mxu0 %vm1216_vm2, %v2678_v41  ;;  %2627 = vmatmul.msk.bf16.gmra.mxu1 %vm1216_vm2, %v2694_v42  ;;  %v1881_v50 = vadd.f32 %v3075_v44, %v1749_v48  ;;  %v1913_v51 = vadd.f32 %v3075_v44, %v1781_v49 }
  0xe7   : > { %2643 = vmatmul.msk.bf16.gmra.mxu2 %vm1216_vm2, %v2710_v46  ;;  %2659 = vmatmul.msk.bf16.gmra.mxu3 %vm1216_vm2, %v2726_v47 }
  0xe8   : > { %v2009_v54 = vmax.f32 %v1881_v50, 0.0  ;;  %v2041_v55 = vmax.f32 %v1913_v51, 0.0 }
  0xea   : > { %v1585_v52 = vpop.f32.mrf.mxu2  ;;  %v1665_v53 = vpop.f32.mrf.mxu3  ;;  %v2137_v0 = vmax.f32 %v2009_v54, %v2041_v55 }
  0xeb   : > { %v1813_v56 = vmul.f32 %v3068_v40, %v1585_v52  ;;  %v1845_v57 = vmul.f32 %v3068_v40, %v1665_v53  ;;  %v1427_v58 = vpop.f32.mrf.mxu0  ;;  %v1507_v59 = vpop.f32.mrf.mxu1  ;;  %v2680_v52 = vld [vmem:[%s2999_s12 + $0x50] sm:$0xff] }
  0xec   : > { %v1750_v62 = vmul.f32 %v3068_v40, %v1427_v58  ;;  %v1782_v63 = vmul.f32 %v3068_v40, %v1507_v59  ;;  %v2696_v53 = vld [vmem:[%s2999_s12 + $0xd0] sm:$0xff] }
  0xed   : > { %v1945_v60 = vadd.f32 %v3075_v44, %v1813_v56  ;;  %v1977_v61 = vadd.f32 %v3075_v44, %v1845_v57  ;;  %v2712_v59 = vld [vmem:[%s2999_s12 + $0x150] sm:$0xff] }
  0xee   : > { %v1882_v4 = vadd.f32 %v3075_v44, %v1750_v62  ;;  %v1914_v5 = vadd.f32 %v3075_v44, %v1782_v63 }
  0xef   : > { %v2073_v1 = vmax.f32 %v1945_v60, 0.0  ;;  %v2105_v2 = vmax.f32 %v1977_v61, 0.0  ;;  %v2728_v60 = vld [vmem:[%s2999_s12 + $0x1d0] sm:$0xff] }
  0xf0   : > { %v2010_v19 = vmax.f32 %v1882_v4, 0.0  ;;  %v2042_v20 = vmax.f32 %v1914_v5, 0.0 }
  0xf1   : > { %v2169_v3 = vmax.f32 %v2073_v1, %v2105_v2 }
  0xf2   : > { %v1587_v6 = vpop.f32.mrf.mxu2  ;;  %v1667_v7 = vpop.f32.mrf.mxu3  ;;  %v2138_v27 = vmax.f32 %v2010_v19, %v2042_v20 }
  0xf3   : > { %v2201_v10 = vmax.f32 %v2137_v0, %v2169_v3  ;;  %v1814_v11 = vmul.f32 %v3068_v40, %v1587_v6  ;;  %v1846_v12 = vmul.f32 %v3068_v40, %v1667_v7  ;;  %v1430_v13 = vpop.f32.mrf.mxu0  ;;  %v1510_v14 = vpop.f32.mrf.mxu1 }
  0xf4   : > { %v1751_v17 = vmul.f32 %v3068_v40, %v1430_v13  ;;  %v1783_v18 = vmul.f32 %v3068_v40, %v1510_v14 }
  0xf5   : > { %2234 = vst.msk [vmem:[%s3100_s24] sm:$0xff] %vm2233_vm3, %v2201_v10  ;;  %v1946_v21 = vadd.f32 %v3075_v44, %v1814_v11  ;;  %v1978_v22 = vadd.f32 %v3075_v44, %v1846_v12 }
  0xf6   : > { %v1883_v23 = vadd.f32 %v3075_v44, %v1751_v17  ;;  %2612 = vmatmul.msk.bf16.gmra.mxu0 %vm1216_vm2, %v2679_v8  ;;  %2628 = vmatmul.msk.bf16.gmra.mxu1 %vm1216_vm2, %v2695_v9  ;;  %v1915_v26 = vadd.f32 %v3075_v44, %v1783_v18 }
  0xf7   : > { %v2074_v24 = vmax.f32 %v1946_v21, 0.0  ;;  %v2106_v25 = vmax.f32 %v1978_v22, 0.0  ;;  %2644 = vmatmul.msk.bf16.gmra.mxu2 %vm1216_vm2, %v2711_v15  ;;  %2660 = vmatmul.msk.bf16.gmra.mxu3 %vm1216_vm2, %v2727_v16 }
  0xf8   : > { %v2011_v29 = vmax.f32 %v1883_v23, 0.0  ;;  %v2043_v33 = vmax.f32 %v1915_v26, 0.0 }
  0xf9   : > { %v2170_v28 = vmax.f32 %v2074_v24, %v2106_v25 }
  0xfa   : > { %v1590_v30 = vpop.f32.mrf.mxu2  ;;  %v1670_v31 = vpop.f32.mrf.mxu3  ;;  %v2139_v43 = vmax.f32 %v2011_v29, %v2043_v33 }
  0xfb   : > { %v2202_v32 = vmax.f32 %v2138_v27, %v2170_v28  ;;  %v1815_v34 = vmul.f32 %v3068_v40, %v1590_v30  ;;  %v1847_v35 = vmul.f32 %v3068_v40, %v1670_v31  ;;  %v1432_v36 = vpop.f32.mrf.mxu0  ;;  %v1512_v37 = vpop.f32.mrf.mxu1  ;;  %v2681_v30 = vld [vmem:[%s2999_s12 + $0x58] sm:$0xff] }
  0xfc   : > { %v1752_v41 = vmul.f32 %v3068_v40, %v1432_v36  ;;  %v1784_v42 = vmul.f32 %v3068_v40, %v1512_v37  ;;  %v2697_v31 = vld [vmem:[%s2999_s12 + $0xd8] sm:$0xff] }
  0xfd   : > { %2235 = vst.msk [vmem:[%s3100_s24 + $0x8] sm:$0xff] %vm2233_vm3, %v2202_v32  ;;  %v1947_v38 = vadd.f32 %v3075_v44, %v1815_v34  ;;  %v1979_v39 = vadd.f32 %v3075_v44, %v1847_v35  ;;  %v2713_v37 = vld [vmem:[%s2999_s12 + $0x158] sm:$0xff] }
  0xfe   : > { %v1884_v48 = vadd.f32 %v3075_v44, %v1752_v41  ;;  %v1916_v49 = vadd.f32 %v3075_v44, %v1784_v42 }
  0xff   : > { %v2075_v45 = vmax.f32 %v1947_v38, 0.0  ;;  %v2107_v46 = vmax.f32 %v1979_v39, 0.0  ;;  %v2729_v38 = vld [vmem:[%s2999_s12 + $0x1d8] sm:$0xff] }
 0x100   : > { %v2012_v63 = vmax.f32 %v1884_v48, 0.0  ;;  %v2044_v0 = vmax.f32 %v1916_v49, 0.0 }
 0x101   : > { %v2171_v47 = vmax.f32 %v2075_v45, %v2107_v46 }
 0x102   : > { %v1592_v50 = vpop.f32.mrf.mxu2  ;;  %v1672_v51 = vpop.f32.mrf.mxu3  ;;  %v2140_v7 = vmax.f32 %v2012_v63, %v2044_v0 }
 0x103   : > { %v2203_v54 = vmax.f32 %v2139_v43, %v2171_v47  ;;  %v1816_v55 = vmul.f32 %v3068_v40, %v1592_v50  ;;  %v1848_v56 = vmul.f32 %v3068_v40, %v1672_v51  ;;  %v1435_v57 = vpop.f32.mrf.mxu0  ;;  %v1515_v58 = vpop.f32.mrf.mxu1 }
 0x104   : > { %v1753_v61 = vmul.f32 %v3068_v40, %v1435_v57  ;;  %v1785_v62 = vmul.f32 %v3068_v40, %v1515_v58 }
 0x105   : > { %2236 = vst.msk [vmem:[%s3100_s24 + $0x10] sm:$0xff] %vm2233_vm3, %v2203_v54  ;;  %v1948_v1 = vadd.f32 %v3075_v44, %v1816_v55  ;;  %v1980_v2 = vadd.f32 %v3075_v44, %v1848_v56 }
 0x106   : > { %v1885_v3 = vadd.f32 %v3075_v44, %v1753_v61  ;;  %2613 = vmatmul.msk.bf16.gmra.mxu0 %vm1216_vm2, %v2680_v52  ;;  %2629 = vmatmul.msk.bf16.gmra.mxu1 %vm1216_vm2, %v2696_v53  ;;  %v1917_v6 = vadd.f32 %v3075_v44, %v1785_v62 }
 0x107   : > { %v2076_v4 = vmax.f32 %v1948_v1, 0.0  ;;  %v2108_v5 = vmax.f32 %v1980_v2, 0.0  ;;  %2645 = vmatmul.msk.bf16.gmra.mxu2 %vm1216_vm2, %v2712_v59  ;;  %2661 = vmatmul.msk.bf16.gmra.mxu3 %vm1216_vm2, %v2728_v60 }
 0x108   : > { %v2013_v9 = vmax.f32 %v1885_v3, 0.0  ;;  %v2045_v13 = vmax.f32 %v1917_v6, 0.0 }
 0x109   : > { %v2172_v8 = vmax.f32 %v2076_v4, %v2108_v5 }
 0x10a   : > { %v1595_v10 = vpop.f32.mrf.mxu2  ;;  %v1675_v11 = vpop.f32.mrf.mxu3  ;;  %v2141_v22 = vmax.f32 %v2013_v9, %v2045_v13 }
 0x10b   : > { %v2204_v12 = vmax.f32 %v2140_v7, %v2172_v8  ;;  %v1817_v14 = vmul.f32 %v3068_v40, %v1595_v10  ;;  %v1849_v15 = vmul.f32 %v3068_v40, %v1675_v11  ;;  %v1437_v16 = vpop.f32.mrf.mxu0  ;;  %v1517_v17 = vpop.f32.mrf.mxu1  ;;  %v2682_v10 = vld [vmem:[%s2999_s12 + $0x60] sm:$0xff] }
 0x10c   : > { %v1754_v20 = vmul.f32 %v3068_v40, %v1437_v16  ;;  %v1786_v21 = vmul.f32 %v3068_v40, %v1517_v17  ;;  %v2698_v11 = vld [vmem:[%s2999_s12 + $0xe0] sm:$0xff] }
 0x10d   : > { %2237 = vst.msk [vmem:[%s3100_s24 + $0x18] sm:$0xff] %vm2233_vm3, %v2204_v12  ;;  %v1949_v18 = vadd.f32 %v3075_v44, %v1817_v14  ;;  %v1981_v19 = vadd.f32 %v3075_v44, %v1849_v15  ;;  %v2714_v17 = vld [vmem:[%s2999_s12 + $0x160] sm:$0xff] }
 0x10e   : > { %v1886_v26 = vadd.f32 %v3075_v44, %v1754_v20  ;;  %v1918_v27 = vadd.f32 %v3075_v44, %v1786_v21 }
 0x10f   : > { %v2077_v23 = vmax.f32 %v1949_v18, 0.0  ;;  %v2109_v24 = vmax.f32 %v1981_v19, 0.0  ;;  %v2730_v18 = vld [vmem:[%s2999_s12 + $0x1e0] sm:$0xff] }
 0x110   : > { %v2014_v42 = vmax.f32 %v1886_v26, 0.0  ;;  %v2046_v43 = vmax.f32 %v1918_v27, 0.0 }
 0x111   : > { %v2173_v25 = vmax.f32 %v2077_v23, %v2109_v24 }
 0x112   : > { %v1597_v28 = vpop.f32.mrf.mxu2  ;;  %v1677_v29 = vpop.f32.mrf.mxu3  ;;  %v2142_v51 = vmax.f32 %v2014_v42, %v2046_v43 }
 0x113   : > { %v2205_v32 = vmax.f32 %v2141_v22, %v2173_v25  ;;  %v1818_v33 = vmul.f32 %v3068_v40, %v1597_v28  ;;  %v1850_v34 = vmul.f32 %v3068_v40, %v1677_v29  ;;  %v1440_v35 = vpop.f32.mrf.mxu0  ;;  %v1520_v36 = vpop.f32.mrf.mxu1 }
 0x114   : > { %v1755_v39 = vmul.f32 %v3068_v40, %v1440_v35  ;;  %v1787_v41 = vmul.f32 %v3068_v40, %v1520_v36 }
 0x115   : > { %2238 = vst.msk [vmem:[%s3100_s24 + $0x20] sm:$0xff] %vm2233_vm3, %v2205_v32  ;;  %v1950_v45 = vadd.f32 %v3075_v44, %v1818_v33  ;;  %v1982_v46 = vadd.f32 %v3075_v44, %v1850_v34 }
 0x116   : > { %v1887_v47 = vadd.f32 %v3075_v44, %v1755_v39  ;;  %2614 = vmatmul.msk.bf16.gmra.mxu0 %vm1216_vm2, %v2681_v30  ;;  %2630 = vmatmul.msk.bf16.gmra.mxu1 %vm1216_vm2, %v2697_v31  ;;  %v1919_v50 = vadd.f32 %v3075_v44, %v1787_v41 }
 0x117   : > { %v2078_v48 = vmax.f32 %v1950_v45, 0.0  ;;  %v2110_v49 = vmax.f32 %v1982_v46, 0.0  ;;  %2646 = vmatmul.msk.bf16.gmra.mxu2 %vm1216_vm2, %v2713_v37  ;;  %2662 = vmatmul.msk.bf16.gmra.mxu3 %vm1216_vm2, %v2729_v38 }
 0x118   : > { %v2015_v53 = vmax.f32 %v1887_v47, 0.0  ;;  %v2047_v57 = vmax.f32 %v1919_v50, 0.0 }
 0x119   : > { %v2174_v52 = vmax.f32 %v2078_v48, %v2110_v49 }
 0x11a   : > { %v1600_v54 = vpop.f32.mrf.mxu2  ;;  %v1680_v55 = vpop.f32.mrf.mxu3  ;;  %v2143_v2 = vmax.f32 %v2015_v53, %v2047_v57 }
 0x11b   : > { %v2206_v56 = vmax.f32 %v2142_v51, %v2174_v52  ;;  %v1819_v58 = vmul.f32 %v3068_v40, %v1600_v54  ;;  %v1851_v59 = vmul.f32 %v3068_v40, %v1680_v55  ;;  %v1442_v60 = vpop.f32.mrf.mxu0  ;;  %v1522_v61 = vpop.f32.mrf.mxu1  ;;  %v2683_v54 = vld [vmem:[%s2999_s12 + $0x68] sm:$0xff] }
 0x11c   : > { %v1756_v0 = vmul.f32 %v3068_v40, %v1442_v60  ;;  %v1788_v1 = vmul.f32 %v3068_v40, %v1522_v61  ;;  %v2699_v55 = vld [vmem:[%s2999_s12 + $0xe8] sm:$0xff] }
 0x11d   : > { %2239 = vst.msk [vmem:[%s3100_s24 + $0x28] sm:$0xff] %vm2233_vm3, %v2206_v56  ;;  %v1951_v62 = vadd.f32 %v3075_v44, %v1819_v58  ;;  %v1983_v63 = vadd.f32 %v3075_v44, %v1851_v59  ;;  %v2715_v61 = vld [vmem:[%s2999_s12 + $0x168] sm:$0xff] }
 0x11e   : > { %v1888_v6 = vadd.f32 %v3075_v44, %v1756_v0  ;;  %v1920_v7 = vadd.f32 %v3075_v44, %v1788_v1 }
 0x11f   : > { %v2079_v3 = vmax.f32 %v1951_v62, 0.0  ;;  %v2111_v4 = vmax.f32 %v1983_v63, 0.0  ;;  %v2731_v62 = vld [vmem:[%s2999_s12 + $0x1e8] sm:$0xff] }
 0x120   : > { %v2016_v21 = vmax.f32 %v1888_v6, 0.0  ;;  %v2048_v22 = vmax.f32 %v1920_v7, 0.0 }
 0x121   : > { %v2175_v5 = vmax.f32 %v2079_v3, %v2111_v4 }
 0x122   : > { %v1602_v8 = vpop.f32.mrf.mxu2  ;;  %v1682_v9 = vpop.f32.mrf.mxu3  ;;  %v2144_v29 = vmax.f32 %v2016_v21, %v2048_v22 }
 0x123   : > { %v2207_v12 = vmax.f32 %v2143_v2, %v2175_v5  ;;  %v1820_v13 = vmul.f32 %v3068_v40, %v1602_v8  ;;  %v1852_v14 = vmul.f32 %v3068_v40, %v1682_v9  ;;  %v1445_v15 = vpop.f32.mrf.mxu0  ;;  %v1525_v16 = vpop.f32.mrf.mxu1 }
 0x124   : > { %v1757_v19 = vmul.f32 %v3068_v40, %v1445_v15  ;;  %v1789_v20 = vmul.f32 %v3068_v40, %v1525_v16 }
 0x125   : > { %2240 = vst.msk [vmem:[%s3100_s24 + $0x30] sm:$0xff] %vm2233_vm3, %v2207_v12  ;;  %v1952_v23 = vadd.f32 %v3075_v44, %v1820_v13  ;;  %v1984_v24 = vadd.f32 %v3075_v44, %v1852_v14 }
 0x126   : > { %v1889_v25 = vadd.f32 %v3075_v44, %v1757_v19  ;;  %2615 = vmatmul.msk.bf16.gmra.mxu0 %vm1216_vm2, %v2682_v10  ;;  %2631 = vmatmul.msk.bf16.gmra.mxu1 %vm1216_vm2, %v2698_v11  ;;  %v1921_v28 = vadd.f32 %v3075_v44, %v1789_v20 }
 0x127   : > { %v2080_v26 = vmax.f32 %v1952_v23, 0.0  ;;  %v2112_v27 = vmax.f32 %v1984_v24, 0.0  ;;  %2647 = vmatmul.msk.bf16.gmra.mxu2 %vm1216_vm2, %v2714_v17  ;;  %2663 = vmatmul.msk.bf16.gmra.mxu3 %vm1216_vm2, %v2730_v18 }
 0x128   : > { %v2017_v31 = vmax.f32 %v1889_v25, 0.0  ;;  %v2049_v35 = vmax.f32 %v1921_v28, 0.0 }
 0x129   : > { %v2176_v30 = vmax.f32 %v2080_v26, %v2112_v27 }
 0x12a   : > { %v1605_v32 = vpop.f32.mrf.mxu2  ;;  %v1685_v33 = vpop.f32.mrf.mxu3  ;;  %v2145_v46 = vmax.f32 %v2017_v31, %v2049_v35 }
 0x12b   : > { %v2208_v34 = vmax.f32 %v2144_v29, %v2176_v30  ;;  %v1821_v36 = vmul.f32 %v3068_v40, %v1605_v32  ;;  %v1853_v37 = vmul.f32 %v3068_v40, %v1685_v33  ;;  %v1447_v38 = vpop.f32.mrf.mxu0  ;;  %v1527_v39 = vpop.f32.mrf.mxu1  ;;  %v2684_v32 = vld [vmem:[%s2999_s12 + $0x70] sm:$0xff] }
 0x12c   : > { %v1758_v43 = vmul.f32 %v3068_v40, %v1447_v38  ;;  %v1790_v45 = vmul.f32 %v3068_v40, %v1527_v39  ;;  %v2700_v33 = vld [vmem:[%s2999_s12 + $0xf0] sm:$0xff] }
 0x12d   : > { %2241 = vst.msk [vmem:[%s3100_s24 + $0x38] sm:$0xff] %vm2233_vm3, %v2208_v34  ;;  %v1953_v41 = vadd.f32 %v3075_v44, %v1821_v36  ;;  %v1985_v42 = vadd.f32 %v3075_v44, %v1853_v37  ;;  %v2716_v39 = vld [vmem:[%s2999_s12 + $0x170] sm:$0xff] }
 0x12e   : > { %v1890_v50 = vadd.f32 %v3075_v44, %v1758_v43  ;;  %v1922_v51 = vadd.f32 %v3075_v44, %v1790_v45 }
 0x12f   : > { %v2081_v47 = vmax.f32 %v1953_v41, 0.0  ;;  %v2113_v48 = vmax.f32 %v1985_v42, 0.0  ;;  %v2732_v41 = vld [vmem:[%s2999_s12 + $0x1f0] sm:$0xff] }
 0x130   : > { %v2018_v1 = vmax.f32 %v1890_v50, 0.0  ;;  %v2050_v2 = vmax.f32 %v1922_v51, 0.0 }
 0x131   : > { %v2177_v49 = vmax.f32 %v2081_v47, %v2113_v48 }
 0x132   : > { %v1607_v52 = vpop.f32.mrf.mxu2  ;;  %v1687_v53 = vpop.f32.mrf.mxu3  ;;  %v2146_v9 = vmax.f32 %v2018_v1, %v2050_v2 }
 0x133   : > { %v2209_v56 = vmax.f32 %v2145_v46, %v2177_v49  ;;  %v1822_v57 = vmul.f32 %v3068_v40, %v1607_v52  ;;  %v1854_v58 = vmul.f32 %v3068_v40, %v1687_v53  ;;  %v1450_v59 = vpop.f32.mrf.mxu0  ;;  %v1530_v60 = vpop.f32.mrf.mxu1 }
 0x134   : > { %v1759_v63 = vmul.f32 %v3068_v40, %v1450_v59  ;;  %v1791_v0 = vmul.f32 %v3068_v40, %v1530_v60 }
 0x135   : > { %2242 = vst.msk [vmem:[%s3100_s24 + $0x40] sm:$0xff] %vm2233_vm3, %v2209_v56  ;;  %v1954_v3 = vadd.f32 %v3075_v44, %v1822_v57  ;;  %v1986_v4 = vadd.f32 %v3075_v44, %v1854_v58 }
 0x136   : > { %v1891_v5 = vadd.f32 %v3075_v44, %v1759_v63  ;;  %2616 = vmatmul.msk.bf16.gmra.mxu0 %vm1216_vm2, %v2683_v54  ;;  %2632 = vmatmul.msk.bf16.gmra.mxu1 %vm1216_vm2, %v2699_v55  ;;  %v1923_v8 = vadd.f32 %v3075_v44, %v1791_v0 }
 0x137   : > { %v2082_v6 = vmax.f32 %v1954_v3, 0.0  ;;  %v2114_v7 = vmax.f32 %v1986_v4, 0.0  ;;  %2648 = vmatmul.msk.bf16.gmra.mxu2 %vm1216_vm2, %v2715_v61  ;;  %2664 = vmatmul.msk.bf16.gmra.mxu3 %vm1216_vm2, %v2731_v62 }
 0x138   : > { %v2019_v11 = vmax.f32 %v1891_v5, 0.0  ;;  %v2051_v15 = vmax.f32 %v1923_v8, 0.0 }
 0x139   : > { %v2178_v10 = vmax.f32 %v2082_v6, %v2114_v7 }
 0x13a   : > { %v1610_v12 = vpop.f32.mrf.mxu2  ;;  %v1690_v13 = vpop.f32.mrf.mxu3  ;;  %v2147_v24 = vmax.f32 %v2019_v11, %v2051_v15 }
 0x13b   : > { %v2210_v14 = vmax.f32 %v2146_v9, %v2178_v10  ;;  %v1823_v16 = vmul.f32 %v3068_v40, %v1610_v12  ;;  %v1855_v17 = vmul.f32 %v3068_v40, %v1690_v13  ;;  %v1452_v18 = vpop.f32.mrf.mxu0  ;;  %v1532_v19 = vpop.f32.mrf.mxu1  ;;  %v2685_v12 = vld [vmem:[%s2999_s12 + $0x78] sm:$0xff] }
 0x13c   : > { %v1760_v22 = vmul.f32 %v3068_v40, %v1452_v18  ;;  %v1792_v23 = vmul.f32 %v3068_v40, %v1532_v19  ;;  %v2701_v13 = vld [vmem:[%s2999_s12 + $0xf8] sm:$0xff] }
 0x13d   : > { %2243 = vst.msk [vmem:[%s3100_s24 + $0x48] sm:$0xff] %vm2233_vm3, %v2210_v14  ;;  %v1955_v20 = vadd.f32 %v3075_v44, %v1823_v16  ;;  %v1987_v21 = vadd.f32 %v3075_v44, %v1855_v17  ;;  %v2717_v19 = vld [vmem:[%s2999_s12 + $0x178] sm:$0xff] }
 0x13e   : > { %v1892_v28 = vadd.f32 %v3075_v44, %v1760_v22  ;;  %v1924_v29 = vadd.f32 %v3075_v44, %v1792_v23 }
 0x13f   : > { %v2083_v25 = vmax.f32 %v1955_v20, 0.0  ;;  %v2115_v26 = vmax.f32 %v1987_v21, 0.0  ;;  %v2733_v20 = vld [vmem:[%s2999_s12 + $0x1f8] sm:$0xff] }
 0x140   : > { %v2020_v45 = vmax.f32 %v1892_v28, 0.0  ;;  %v2052_v46 = vmax.f32 %v1924_v29, 0.0 }
 0x141   : > { %v2179_v27 = vmax.f32 %v2083_v25, %v2115_v26 }
 0x142   : > { %v1612_v30 = vpop.f32.mrf.mxu2  ;;  %v1692_v31 = vpop.f32.mrf.mxu3  ;;  %v2148_v53 = vmax.f32 %v2020_v45, %v2052_v46 }
 0x143   : > { %v2211_v34 = vmax.f32 %v2147_v24, %v2179_v27  ;;  %v1824_v35 = vmul.f32 %v3068_v40, %v1612_v30  ;;  %v1856_v36 = vmul.f32 %v3068_v40, %v1692_v31  ;;  %v1455_v37 = vpop.f32.mrf.mxu0  ;;  %v1535_v38 = vpop.f32.mrf.mxu1 }
 0x144   : > { %v1761_v42 = vmul.f32 %v3068_v40, %v1455_v37  ;;  %v1793_v43 = vmul.f32 %v3068_v40, %v1535_v38 }
 0x145   : > { %2244 = vst.msk [vmem:[%s3100_s24 + $0x50] sm:$0xff] %vm2233_vm3, %v2211_v34  ;;  %v1956_v47 = vadd.f32 %v3075_v44, %v1824_v35  ;;  %v1988_v48 = vadd.f32 %v3075_v44, %v1856_v36 }
 0x146   : > { %v1893_v49 = vadd.f32 %v3075_v44, %v1761_v42  ;;  %2617 = vmatmul.msk.bf16.gmra.mxu0 %vm1216_vm2, %v2684_v32  ;;  %2633 = vmatmul.msk.bf16.gmra.mxu1 %vm1216_vm2, %v2700_v33  ;;  %v1925_v52 = vadd.f32 %v3075_v44, %v1793_v43 }
 0x147   : > { %v2084_v50 = vmax.f32 %v1956_v47, 0.0  ;;  %v2116_v51 = vmax.f32 %v1988_v48, 0.0  ;;  %2649 = vmatmul.msk.bf16.gmra.mxu2 %vm1216_vm2, %v2716_v39  ;;  %2665 = vmatmul.msk.bf16.gmra.mxu3 %vm1216_vm2, %v2732_v41 }
 0x148   : > { %v2021_v55 = vmax.f32 %v1893_v49, 0.0  ;;  %v2053_v59 = vmax.f32 %v1925_v52, 0.0 }
 0x149   : > { %v2180_v54 = vmax.f32 %v2084_v50, %v2116_v51 }
 0x14a   : > { %v1615_v56 = vpop.f32.mrf.mxu2  ;;  %v1695_v57 = vpop.f32.mrf.mxu3  ;;  %v2149_v4 = vmax.f32 %v2021_v55, %v2053_v59 }
 0x14b   : > { %v2212_v58 = vmax.f32 %v2148_v53, %v2180_v54  ;;  %v1825_v60 = vmul.f32 %v3068_v40, %v1615_v56  ;;  %v1857_v61 = vmul.f32 %v3068_v40, %v1695_v57  ;;  %v1457_v62 = vpop.f32.mrf.mxu0  ;;  %v1537_v63 = vpop.f32.mrf.mxu1 }
 0x14c   : > { %v1762_v2 = vmul.f32 %v3068_v40, %v1457_v62  ;;  %v1794_v3 = vmul.f32 %v3068_v40, %v1537_v63 }
 0x14d   : > { %2245 = vst.msk [vmem:[%s3100_s24 + $0x58] sm:$0xff] %vm2233_vm3, %v2212_v58  ;;  %v1957_v0 = vadd.f32 %v3075_v44, %v1825_v60  ;;  %v1989_v1 = vadd.f32 %v3075_v44, %v1857_v61 }
 0x14e   : > { %v1894_v8 = vadd.f32 %v3075_v44, %v1762_v2  ;;  %v1926_v9 = vadd.f32 %v3075_v44, %v1794_v3 }
 0x14f   : > { %v2085_v5 = vmax.f32 %v1957_v0, 0.0  ;;  %v2117_v6 = vmax.f32 %v1989_v1, 0.0 }
 0x150   : > { %v2022_v23 = vmax.f32 %v1894_v8, 0.0  ;;  %v2054_v24 = vmax.f32 %v1926_v9, 0.0 }
 0x151   : > { %v2181_v7 = vmax.f32 %v2085_v5, %v2117_v6 }
 0x152   : > { %v1617_v10 = vpop.f32.mrf.mxu2  ;;  %v1697_v11 = vpop.f32.mrf.mxu3  ;;  %v2150_v31 = vmax.f32 %v2022_v23, %v2054_v24 }
 0x153   : > { %v2213_v14 = vmax.f32 %v2149_v4, %v2181_v7  ;;  %v1826_v15 = vmul.f32 %v3068_v40, %v1617_v10  ;;  %v1858_v16 = vmul.f32 %v3068_v40, %v1697_v11  ;;  %v1460_v17 = vpop.f32.mrf.mxu0  ;;  %v1540_v18 = vpop.f32.mrf.mxu1 }
 0x154   : > { %v1763_v21 = vmul.f32 %v3068_v40, %v1460_v17  ;;  %v1795_v22 = vmul.f32 %v3068_v40, %v1540_v18 }
 0x155   : > { %2246 = vst.msk [vmem:[%s3100_s24 + $0x60] sm:$0xff] %vm2233_vm3, %v2213_v14  ;;  %v1958_v25 = vadd.f32 %v3075_v44, %v1826_v15  ;;  %v1990_v26 = vadd.f32 %v3075_v44, %v1858_v16 }
 0x156   : > { %v1895_v27 = vadd.f32 %v3075_v44, %v1763_v21  ;;  %2618 = vmatmul.msk.bf16.gmra.mxu0 %vm1216_vm2, %v2685_v12  ;;  %2634 = vmatmul.msk.bf16.gmra.mxu1 %vm1216_vm2, %v2701_v13  ;;  %v1927_v30 = vadd.f32 %v3075_v44, %v1795_v22 }
 0x157   : > { %v2086_v28 = vmax.f32 %v1958_v25, 0.0  ;;  %v2118_v29 = vmax.f32 %v1990_v26, 0.0  ;;  %2650 = vmatmul.msk.bf16.gmra.mxu2 %vm1216_vm2, %v2717_v19  ;;  %2666 = vmatmul.msk.bf16.gmra.mxu3 %vm1216_vm2, %v2733_v20 }
 0x158   : > { %v2023_v33 = vmax.f32 %v1895_v27, 0.0  ;;  %v2055_v37 = vmax.f32 %v1927_v30, 0.0 }
 0x159   : > { %v2182_v32 = vmax.f32 %v2086_v28, %v2118_v29 }
 0x15a   : > { %v1620_v34 = vpop.f32.mrf.mxu2  ;;  %v1700_v35 = vpop.f32.mrf.mxu3  ;;  %v2151_v48 = vmax.f32 %v2023_v33, %v2055_v37 }
 0x15b   : > { %v2214_v36 = vmax.f32 %v2150_v31, %v2182_v32  ;;  %v1827_v38 = vmul.f32 %v3068_v40, %v1620_v34  ;;  %v1859_v39 = vmul.f32 %v3068_v40, %v1700_v35  ;;  %v1462_v41 = vpop.f32.mrf.mxu0  ;;  %v1542_v42 = vpop.f32.mrf.mxu1 }
 0x15c   : > { %v1764_v46 = vmul.f32 %v3068_v40, %v1462_v41  ;;  %v1796_v47 = vmul.f32 %v3068_v40, %v1542_v42 }
 0x15d   : > { %2247 = vst.msk [vmem:[%s3100_s24 + $0x68] sm:$0xff] %vm2233_vm3, %v2214_v36  ;;  %v1959_v43 = vadd.f32 %v3075_v44, %v1827_v38  ;;  %v1991_v45 = vadd.f32 %v3075_v44, %v1859_v39 }
 0x15e   : > { %v1896_v52 = vadd.f32 %v3075_v44, %v1764_v46  ;;  %v1928_v53 = vadd.f32 %v3075_v44, %v1796_v47 }
 0x15f   : > { %v2087_v49 = vmax.f32 %v1959_v43, 0.0  ;;  %v2119_v50 = vmax.f32 %v1991_v45, 0.0 }
 0x160   : > { %v2024_v63 = vmax.f32 %v1896_v52, 0.0  ;;  %v2056_v0 = vmax.f32 %v1928_v53, 0.0 }
 0x161   : > { %v2183_v51 = vmax.f32 %v2087_v49, %v2119_v50 }
 0x162   : > { %v1622_v54 = vpop.f32.mrf.mxu2  ;;  %v1702_v55 = vpop.f32.mrf.mxu3  ;;  %v2152_v7 = vmax.f32 %v2024_v63, %v2056_v0 }
 0x163   : > { %v2215_v56 = vmax.f32 %v2151_v48, %v2183_v51  ;;  %v1828_v57 = vmul.f32 %v3068_v40, %v1622_v54  ;;  %v1860_v58 = vmul.f32 %v3068_v40, %v1702_v55  ;;  %v1465_v59 = vpop.f32.mrf.mxu0  ;;  %v1545_v60 = vpop.f32.mrf.mxu1 }
 0x164   : > { %v1765_v61 = vmul.f32 %v3068_v40, %v1465_v59  ;;  %v1797_v62 = vmul.f32 %v3068_v40, %v1545_v60 }
 0x165   : > { %2248 = vst.msk [vmem:[%s3100_s24 + $0x70] sm:$0xff] %vm2233_vm3, %v2215_v56  ;;  %v1960_v1 = vadd.f32 %v3075_v44, %v1828_v57  ;;  %v1992_v2 = vadd.f32 %v3075_v44, %v1860_v58 }
 0x166   : > { %v1897_v3 = vadd.f32 %v3075_v44, %v1765_v61  ;;  %v1929_v6 = vadd.f32 %v3075_v44, %v1797_v62 }
 0x167   : > { %v2088_v4 = vmax.f32 %v1960_v1, 0.0  ;;  %v2120_v5 = vmax.f32 %v1992_v2, 0.0 }
 0x168   : > { %v2025_v9 = vmax.f32 %v1897_v3, 0.0  ;;  %v2057_v13 = vmax.f32 %v1929_v6, 0.0 }
 0x169   : > { %v2184_v8 = vmax.f32 %v2088_v4, %v2120_v5 }
 0x16a   : > { %v1625_v10 = vpop.f32.mrf.mxu2  ;;  %v1705_v11 = vpop.f32.mrf.mxu3  ;;  %v2153_v22 = vmax.f32 %v2025_v9, %v2057_v13 }
 0x16b   : > { %v2216_v12 = vmax.f32 %v2152_v7, %v2184_v8  ;;  %v1829_v14 = vmul.f32 %v3068_v40, %v1625_v10  ;;  %v1861_v15 = vmul.f32 %v3068_v40, %v1705_v11  ;;  %v1467_v16 = vpop.f32.mrf.mxu0  ;;  %v1547_v17 = vpop.f32.mrf.mxu1 }
 0x16c   : > { %v1766_v20 = vmul.f32 %v3068_v40, %v1467_v16  ;;  %v1798_v21 = vmul.f32 %v3068_v40, %v1547_v17 }
 0x16d   : > { %2249 = vst.msk [vmem:[%s3100_s24 + $0x78] sm:$0xff] %vm2233_vm3, %v2216_v12  ;;  %v1961_v18 = vadd.f32 %v3075_v44, %v1829_v14  ;;  %v1993_v19 = vadd.f32 %v3075_v44, %v1861_v15 }
 0x16e   : > { %v1898_v26 = vadd.f32 %v3075_v44, %v1766_v20  ;;  %v1930_v27 = vadd.f32 %v3075_v44, %v1798_v21 }
 0x16f   : > { %v2089_v23 = vmax.f32 %v1961_v18, 0.0  ;;  %v2121_v24 = vmax.f32 %v1993_v19, 0.0 }
 0x170   : > { %v2026_v37 = vmax.f32 %v1898_v26, 0.0  ;;  %v2058_v38 = vmax.f32 %v1930_v27, 0.0 }
 0x171   : > { %v2185_v25 = vmax.f32 %v2089_v23, %v2121_v24 }
 0x172   : > { %v1627_v28 = vpop.f32.mrf.mxu2  ;;  %v1707_v29 = vpop.f32.mrf.mxu3  ;;  %v2154_v47 = vmax.f32 %v2026_v37, %v2058_v38 }
 0x173   : > { %v2217_v30 = vmax.f32 %v2153_v22, %v2185_v25  ;;  %v1830_v31 = vmul.f32 %v3068_v40, %v1627_v28  ;;  %v1862_v32 = vmul.f32 %v3068_v40, %v1707_v29  ;;  %v1470_v33 = vpop.f32.mrf.mxu0  ;;  %v1550_v34 = vpop.f32.mrf.mxu1 }
 0x174   : > { %v1767_v35 = vmul.f32 %v3068_v40, %v1470_v33  ;;  %v1799_v36 = vmul.f32 %v3068_v40, %v1550_v34 }
 0x175   : > { %2250 = vst.msk [vmem:[%s3100_s24 + $0x80] sm:$0xff] %vm2233_vm3, %v2217_v30  ;;  %v1962_v39 = vadd.f32 %v3075_v44, %v1830_v31  ;;  %v1994_v41 = vadd.f32 %v3075_v44, %v1862_v32 }
 0x176   : > { %v1899_v42 = vadd.f32 %v3075_v44, %v1767_v35  ;;  %v1931_v46 = vadd.f32 %v3075_v44, %v1799_v36 }
 0x177   : > { %v2090_v43 = vmax.f32 %v1962_v39, 0.0  ;;  %v2122_v45 = vmax.f32 %v1994_v41, 0.0 }
 0x178   : > { %v2027_v49 = vmax.f32 %v1899_v42, 0.0  ;;  %v2059_v53 = vmax.f32 %v1931_v46, 0.0 }
 0x179   : > { %v2186_v48 = vmax.f32 %v2090_v43, %v2122_v45 }
 0x17a   : > { %v1630_v50 = vpop.f32.mrf.mxu2  ;;  %v1710_v51 = vpop.f32.mrf.mxu3  ;;  %v2155_v62 = vmax.f32 %v2027_v49, %v2059_v53 }
 0x17b   : > { %v2218_v52 = vmax.f32 %v2154_v47, %v2186_v48  ;;  %v1831_v54 = vmul.f32 %v3068_v40, %v1630_v50  ;;  %v1863_v55 = vmul.f32 %v3068_v40, %v1710_v51  ;;  %v1472_v56 = vpop.f32.mrf.mxu0  ;;  %v1552_v57 = vpop.f32.mrf.mxu1 }
 0x17c   : > { %v1768_v60 = vmul.f32 %v3068_v40, %v1472_v56  ;;  %v1800_v61 = vmul.f32 %v3068_v40, %v1552_v57 }
 0x17d   : > { %2251 = vst.msk [vmem:[%s3100_s24 + $0x88] sm:$0xff] %vm2233_vm3, %v2218_v52  ;;  %v1963_v58 = vadd.f32 %v3075_v44, %v1831_v54  ;;  %v1995_v59 = vadd.f32 %v3075_v44, %v1863_v55 }
 0x17e   : > { %v1900_v2 = vadd.f32 %v3075_v44, %v1768_v60  ;;  %v1932_v3 = vadd.f32 %v3075_v44, %v1800_v61 }
 0x17f   : > { %v2091_v63 = vmax.f32 %v1963_v58, 0.0  ;;  %v2123_v0 = vmax.f32 %v1995_v59, 0.0 }
 0x180   : > { %v2028_v13 = vmax.f32 %v1900_v2, 0.0  ;;  %v2060_v14 = vmax.f32 %v1932_v3, 0.0  ;;  %v3371_v3 = vld [vmem:[%s3488_s2] ss:$0 sm:$0xff] }
 0x181   : > { %v2187_v1 = vmax.f32 %v2091_v63, %v2123_v0 }
 0x182   : > { %v1632_v4 = vpop.f32.mrf.mxu2  ;;  %v1712_v5 = vpop.f32.mrf.mxu3  ;;  %v2156_v21 = vmax.f32 %v2028_v13, %v2060_v14 }
 0x183   : > { %v2219_v6 = vmax.f32 %v2155_v62, %v2187_v1  ;;  %v1832_v7 = vmul.f32 %v3068_v40, %v1632_v4  ;;  %v1864_v8 = vmul.f32 %v3068_v40, %v1712_v5  ;;  %v1475_v9 = vpop.f32.mrf.mxu0  ;;  %v1555_v10 = vpop.f32.mrf.mxu1 }
 0x184   : > { %v1769_v11 = vmul.f32 %v3068_v40, %v1475_v9  ;;  %v1801_v12 = vmul.f32 %v3068_v40, %v1555_v10 }
 0x185   : > { %2252 = vst.msk [vmem:[%s3100_s24 + $0x90] sm:$0xff] %vm2233_vm3, %v2219_v6  ;;  %v1964_v15 = vadd.f32 %v3075_v44, %v1832_v7  ;;  %v1996_v16 = vadd.f32 %v3075_v44, %v1864_v8 }
 0x186   : > { %v1901_v17 = vadd.f32 %v3075_v44, %v1769_v11  ;;  %v1933_v20 = vadd.f32 %v3075_v44, %v1801_v12 }
 0x187   : > { %v2092_v18 = vmax.f32 %v1964_v15, 0.0  ;;  %v2124_v19 = vmax.f32 %v1996_v16, 0.0 }
 0x188   : > { %v2029_v23 = vmax.f32 %v1901_v17, 0.0  ;;  %v2061_v27 = vmax.f32 %v1933_v20, 0.0 }
 0x189   : > { %v2188_v22 = vmax.f32 %v2092_v18, %v2124_v19 }
 0x18a   : > { %v1635_v24 = vpop.f32.mrf.mxu2  ;;  %v1715_v25 = vpop.f32.mrf.mxu3  ;;  %v2157_v36 = vmax.f32 %v2029_v23, %v2061_v27 }
 0x18b   : > { %v2220_v26 = vmax.f32 %v2156_v21, %v2188_v22  ;;  %v1833_v28 = vmul.f32 %v3068_v40, %v1635_v24  ;;  %v1865_v29 = vmul.f32 %v3068_v40, %v1715_v25  ;;  %v1477_v30 = vpop.f32.mrf.mxu0  ;;  %v1557_v31 = vpop.f32.mrf.mxu1 }
 0x18c   : > { %v1770_v34 = vmul.f32 %v3068_v40, %v1477_v30  ;;  %v1802_v35 = vmul.f32 %v3068_v40, %v1557_v31 }
 0x18d   : > { %2253 = vst.msk [vmem:[%s3100_s24 + $0x98] sm:$0xff] %vm2233_vm3, %v2220_v26  ;;  %v1965_v32 = vadd.f32 %v3075_v44, %v1833_v28  ;;  %v1997_v33 = vadd.f32 %v3075_v44, %v1865_v29 }
 0x18e   : > { %v1902_v41 = vadd.f32 %v3075_v44, %v1770_v34  ;;  %v1934_v42 = vadd.f32 %v3075_v44, %v1802_v35 }
 0x18f   : > { %v2093_v37 = vmax.f32 %v1965_v32, 0.0  ;;  %v2125_v38 = vmax.f32 %v1997_v33, 0.0 }
 0x190   : > { %v2030_v53 = vmax.f32 %v1902_v41, 0.0  ;;  %v2062_v54 = vmax.f32 %v1934_v42, 0.0 }
 0x191   : > { %v2189_v39 = vmax.f32 %v2093_v37, %v2125_v38 }
 0x192   : > { %v1637_v43 = vpop.f32.mrf.mxu2  ;;  %v1717_v45 = vpop.f32.mrf.mxu3  ;;  %v2158_v61 = vmax.f32 %v2030_v53, %v2062_v54 }
 0x193   : > { %v2221_v46 = vmax.f32 %v2157_v36, %v2189_v39  ;;  %v1834_v47 = vmul.f32 %v3068_v40, %v1637_v43  ;;  %v1866_v48 = vmul.f32 %v3068_v40, %v1717_v45  ;;  %v1480_v49 = vpop.f32.mrf.mxu0  ;;  %v1560_v50 = vpop.f32.mrf.mxu1 }
 0x194   : > { %v1771_v51 = vmul.f32 %v3068_v40, %v1480_v49  ;;  %v1803_v52 = vmul.f32 %v3068_v40, %v1560_v50 }
 0x195   : > { %2254 = vst.msk [vmem:[%s3100_s24 + $0xa0] sm:$0xff] %vm2233_vm3, %v2221_v46  ;;  %v1966_v55 = vadd.f32 %v3075_v44, %v1834_v47  ;;  %v1998_v56 = vadd.f32 %v3075_v44, %v1866_v48 }
 0x196   : > { %v1903_v57 = vadd.f32 %v3075_v44, %v1771_v51  ;;  %v1935_v60 = vadd.f32 %v3075_v44, %v1803_v52  ;;  %v3380_v44 = vld [vmem:[%s3489_s3] ss:$0 sm:$0xff] }
 0x197   : > { %v2094_v58 = vmax.f32 %v1966_v55, 0.0  ;;  %v2126_v59 = vmax.f32 %v1998_v56, 0.0 }
 0x198   : > { %v2031_v63 = vmax.f32 %v1903_v57, 0.0  ;;  %v2063_v2 = vmax.f32 %v1935_v60, 0.0 }
 0x199   : > { %v2190_v62 = vmax.f32 %v2094_v58, %v2126_v59 }
 0x19a   : > { %v1640_v0 = vpop.f32.mrf.mxu2  ;;  %v1720_v40 = vpop.f32.mrf.mxu3  ;;  %v2159_v12 = vmax.f32 %v2031_v63, %v2063_v2 }
 0x19b   : > { %v2222_v1 = vmax.f32 %v2158_v61, %v2190_v62  ;;  %v1835_v4 = vmul.f32 %v3371_v3, %v1640_v0  ;;  %v1867_v5 = vmul.f32 %v3371_v3, %v1720_v40  ;;  %v1482_v6 = vpop.f32.mrf.mxu0  ;;  %v1562_v7 = vpop.f32.mrf.mxu1 }
 0x19c   : > { %v1772_v10 = vmul.f32 %v3371_v3, %v1482_v6  ;;  %v1804_v11 = vmul.f32 %v3371_v3, %v1562_v7 }
 0x19d   : > { %2255 = vst.msk [vmem:[%s3100_s24 + $0xa8] sm:$0xff] %vm2233_vm3, %v2222_v1  ;;  %v1967_v8 = vadd.f32 %v3380_v44, %v1835_v4  ;;  %v1999_v9 = vadd.f32 %v3380_v44, %v1867_v5 }
 0x19e   : > { %v1904_v16 = vadd.f32 %v3380_v44, %v1772_v10  ;;  %v1936_v17 = vadd.f32 %v3380_v44, %v1804_v11 }
 0x19f   : > { %v2095_v13 = vmax.f32 %v1967_v8, 0.0  ;;  %v2127_v14 = vmax.f32 %v1999_v9, 0.0 }
 0x1a0   : > { %v2032_v27 = vmax.f32 %v1904_v16, 0.0  ;;  %v2064_v28 = vmax.f32 %v1936_v17, 0.0 }
 0x1a1   : > { %v2191_v15 = vmax.f32 %v2095_v13, %v2127_v14 }
 0x1a2   : > { %v1642_v18 = vpop.f32.mrf.mxu2  ;;  %v1722_v19 = vpop.f32.mrf.mxu3  ;;  %v2160_v35 = vmax.f32 %v2032_v27, %v2064_v28 }
 0x1a3   : > { %v2223_v20 = vmax.f32 %v2159_v12, %v2191_v15  ;;  %v1836_v21 = vmul.f32 %v3371_v3, %v1642_v18  ;;  %v1868_v22 = vmul.f32 %v3371_v3, %v1722_v19  ;;  %v1485_v23 = vpop.f32.mrf.mxu0  ;;  %v1565_v24 = vpop.f32.mrf.mxu1 }
 0x1a4   : > { %v1773_v25 = vmul.f32 %v3371_v3, %v1485_v23  ;;  %v1805_v26 = vmul.f32 %v3371_v3, %v1565_v24 }
 0x1a5   : > { %2256 = vst.msk [vmem:[%s3100_s24 + $0xb0] sm:$0xff] %vm2233_vm3, %v2223_v20  ;;  %v1968_v29 = vadd.f32 %v3380_v44, %v1836_v21  ;;  %v2000_v30 = vadd.f32 %v3380_v44, %v1868_v22 }
 0x1a6   : > { %v1905_v31 = vadd.f32 %v3380_v44, %v1773_v25  ;;  %v1937_v34 = vadd.f32 %v3380_v44, %v1805_v26 }
 0x1a7   : > { %v2096_v32 = vmax.f32 %v1968_v29, 0.0  ;;  %v2128_v33 = vmax.f32 %v2000_v30, 0.0 }
 0x1a8   : > { %v2033_v37 = vmax.f32 %v1905_v31, 0.0  ;;  %v2065_v42 = vmax.f32 %v1937_v34, 0.0 }
 0x1a9   : > { %v2192_v36 = vmax.f32 %v2096_v32, %v2128_v33 }
 0x1aa   : > { %v1645_v38 = vpop.f32.mrf.mxu2  ;;  %v1725_v39 = vpop.f32.mrf.mxu3  ;;  %v2161_v52 = vmax.f32 %v2033_v37, %v2065_v42 }
 0x1ab   : > { %v2224_v41 = vmax.f32 %v2160_v35, %v2192_v36  ;;  %v1837_v43 = vmul.f32 %v3371_v3, %v1645_v38  ;;  %v1869_v45 = vmul.f32 %v3371_v3, %v1725_v39  ;;  %v1487_v46 = vpop.f32.mrf.mxu0  ;;  %v1567_v47 = vpop.f32.mrf.mxu1 }
 0x1ac   : > { %v1774_v50 = vmul.f32 %v3371_v3, %v1487_v46  ;;  %v1806_v51 = vmul.f32 %v3371_v3, %v1567_v47 }
 0x1ad   : > { %2257 = vst.msk [vmem:[%s3100_s24 + $0xb8] sm:$0xff] %vm2233_vm3, %v2224_v41  ;;  %v1969_v48 = vadd.f32 %v3380_v44, %v1837_v43  ;;  %v2001_v49 = vadd.f32 %v3380_v44, %v1869_v45 }
 0x1ae   : > { %v1906_v56 = vadd.f32 %v3380_v44, %v1774_v50  ;;  %v1938_v57 = vadd.f32 %v3380_v44, %v1806_v51 }
 0x1af   : > { %v2097_v53 = vmax.f32 %v1969_v48, 0.0  ;;  %v2129_v54 = vmax.f32 %v2001_v49, 0.0 }
 0x1b0   : > { %v2034_v2 = vmax.f32 %v1906_v56, 0.0  ;;  %v2066_v4 = vmax.f32 %v1938_v57, 0.0 }
 0x1b1   : > { %v2193_v55 = vmax.f32 %v2097_v53, %v2129_v54 }
 0x1b2   : > { %v1647_v58 = vpop.f32.mrf.mxu2  ;;  %v1727_v59 = vpop.f32.mrf.mxu3  ;;  %v2162_v11 = vmax.f32 %v2034_v2, %v2066_v4 }
 0x1b3   : > { %v2225_v60 = vmax.f32 %v2161_v52, %v2193_v55  ;;  %v1838_v61 = vmul.f32 %v3371_v3, %v1647_v58  ;;  %v1870_v62 = vmul.f32 %v3371_v3, %v1727_v59  ;;  %v1490_v63 = vpop.f32.mrf.mxu0  ;;  %v1570_v0 = vpop.f32.mrf.mxu1 }
 0x1b4   : > { %v1775_v40 = vmul.f32 %v3371_v3, %v1490_v63  ;;  %v1807_v1 = vmul.f32 %v3371_v3, %v1570_v0 }
 0x1b5   : > { %2258 = vst.msk [vmem:[%s3100_s24 + $0xc0] sm:$0xff] %vm2233_vm3, %v2225_v60  ;;  %v1970_v5 = vadd.f32 %v3380_v44, %v1838_v61  ;;  %v2002_v6 = vadd.f32 %v3380_v44, %v1870_v62 }
 0x1b6   : > { %v1907_v7 = vadd.f32 %v3380_v44, %v1775_v40  ;;  %v1939_v10 = vadd.f32 %v3380_v44, %v1807_v1 }
 0x1b7   : > { %v2098_v8 = vmax.f32 %v1970_v5, 0.0  ;;  %v2130_v9 = vmax.f32 %v2002_v6, 0.0 }
 0x1b8   : > { %v2035_v13 = vmax.f32 %v1907_v7, 0.0  ;;  %v2067_v17 = vmax.f32 %v1939_v10, 0.0 }
 0x1b9   : > { %v2194_v12 = vmax.f32 %v2098_v8, %v2130_v9 }
 0x1ba   : > { %v1650_v14 = vpop.f32.mrf.mxu2  ;;  %v1730_v15 = vpop.f32.mrf.mxu3  ;;  %v2163_v26 = vmax.f32 %v2035_v13, %v2067_v17 }
 0x1bb   : > { %v2226_v16 = vmax.f32 %v2162_v11, %v2194_v12  ;;  %v1839_v18 = vmul.f32 %v3371_v3, %v1650_v14  ;;  %v1871_v19 = vmul.f32 %v3371_v3, %v1730_v15  ;;  %v1492_v20 = vpop.f32.mrf.mxu0  ;;  %v1572_v21 = vpop.f32.mrf.mxu1 }
 0x1bc   : > { %v1776_v24 = vmul.f32 %v3371_v3, %v1492_v20  ;;  %v1808_v25 = vmul.f32 %v3371_v3, %v1572_v21 }
 0x1bd   : > { %2259 = vst.msk [vmem:[%s3100_s24 + $0xc8] sm:$0xff] %vm2233_vm3, %v2226_v16  ;;  %v1971_v22 = vadd.f32 %v3380_v44, %v1839_v18  ;;  %v2003_v23 = vadd.f32 %v3380_v44, %v1871_v19 }
 0x1be   : > { %v1908_v30 = vadd.f32 %v3380_v44, %v1776_v24  ;;  %v1940_v31 = vadd.f32 %v3380_v44, %v1808_v25 }
 0x1bf   : > { %v2099_v27 = vmax.f32 %v1971_v22, 0.0  ;;  %v2131_v28 = vmax.f32 %v2003_v23, 0.0 }
 0x1c0   : > { %v2036_v42 = vmax.f32 %v1908_v30, 0.0  ;;  %v2068_v43 = vmax.f32 %v1940_v31, 0.0 }
 0x1c1   : > { %v2195_v29 = vmax.f32 %v2099_v27, %v2131_v28 }
 0x1c2   : > { %v1652_v32 = vpop.f32.mrf.mxu2  ;;  %v1732_v33 = vpop.f32.mrf.mxu3  ;;  %v2164_v51 = vmax.f32 %v2036_v42, %v2068_v43 }
 0x1c3   : > { %v2227_v34 = vmax.f32 %v2163_v26, %v2195_v29  ;;  %v1840_v35 = vmul.f32 %v3371_v3, %v1652_v32  ;;  %v1872_v36 = vmul.f32 %v3371_v3, %v1732_v33  ;;  %v1495_v37 = vpop.f32.mrf.mxu0  ;;  %v1575_v38 = vpop.f32.mrf.mxu1 }
 0x1c4   : > { %v1777_v39 = vmul.f32 %v3371_v3, %v1495_v37  ;;  %v1809_v41 = vmul.f32 %v3371_v3, %v1575_v38 }
 0x1c5   : > { %2260 = vst.msk [vmem:[%s3100_s24 + $0xd0] sm:$0xff] %vm2233_vm3, %v2227_v34  ;;  %v1972_v45 = vadd.f32 %v3380_v44, %v1840_v35  ;;  %v2004_v46 = vadd.f32 %v3380_v44, %v1872_v36 }
 0x1c6   : > { %v1909_v47 = vadd.f32 %v3380_v44, %v1777_v39  ;;  %v1941_v50 = vadd.f32 %v3380_v44, %v1809_v41 }
 0x1c7   : > { %v2100_v48 = vmax.f32 %v1972_v45, 0.0  ;;  %v2132_v49 = vmax.f32 %v2004_v46, 0.0 }
 0x1c8   : > { %v2037_v53 = vmax.f32 %v1909_v47, 0.0  ;;  %v2069_v57 = vmax.f32 %v1941_v50, 0.0 }
 0x1c9   : > { %v2196_v52 = vmax.f32 %v2100_v48, %v2132_v49 }
 0x1ca   : > { %v1655_v54 = vpop.f32.mrf.mxu2  ;;  %v1735_v55 = vpop.f32.mrf.mxu3  ;;  %v2165_v1 = vmax.f32 %v2037_v53, %v2069_v57 }
 0x1cb   : > { %v2228_v56 = vmax.f32 %v2164_v51, %v2196_v52  ;;  %v1841_v58 = vmul.f32 %v3371_v3, %v1655_v54  ;;  %v1873_v59 = vmul.f32 %v3371_v3, %v1735_v55  ;;  %v1497_v60 = vpop.f32.mrf.mxu0  ;;  %v1577_v61 = vpop.f32.mrf.mxu1 }
 0x1cc   : > { %v1778_v0 = vmul.f32 %v3371_v3, %v1497_v60  ;;  %v1810_v40 = vmul.f32 %v3371_v3, %v1577_v61 }
 0x1cd   : > { %2261 = vst.msk [vmem:[%s3100_s24 + $0xd8] sm:$0xff] %vm2233_vm3, %v2228_v56  ;;  %v1973_v62 = vadd.f32 %v3380_v44, %v1841_v58  ;;  %v2005_v63 = vadd.f32 %v3380_v44, %v1873_v59 }
 0x1ce   : > { %v1910_v6 = vadd.f32 %v3380_v44, %v1778_v0  ;;  %v1942_v7 = vadd.f32 %v3380_v44, %v1810_v40 }
 0x1cf   : > { %v2101_v2 = vmax.f32 %v1973_v62, 0.0  ;;  %v2133_v4 = vmax.f32 %v2005_v63, 0.0 }
 0x1d0   : > { %v2038_v17 = vmax.f32 %v1910_v6, 0.0  ;;  %v2070_v18 = vmax.f32 %v1942_v7, 0.0 }
 0x1d1   : > { %v2197_v5 = vmax.f32 %v2101_v2, %v2133_v4 }
 0x1d2   : > { %v1657_v8 = vpop.f32.mrf.mxu2  ;;  %v1737_v9 = vpop.f32.mrf.mxu3  ;;  %v2166_v25 = vmax.f32 %v2038_v17, %v2070_v18 }
 0x1d3   : > { %v2229_v10 = vmax.f32 %v2165_v1, %v2197_v5  ;;  %v1842_v11 = vmul.f32 %v3371_v3, %v1657_v8  ;;  %v1874_v12 = vmul.f32 %v3371_v3, %v1737_v9  ;;  %v1500_v13 = vpop.f32.mrf.mxu0  ;;  %v1580_v14 = vpop.f32.mrf.mxu1 }
 0x1d4   : > { %v1779_v15 = vmul.f32 %v3371_v3, %v1500_v13  ;;  %v1811_v16 = vmul.f32 %v3371_v3, %v1580_v14 }
 0x1d5   : > { %2262 = vst.msk [vmem:[%s3100_s24 + $0xe0] sm:$0xff] %vm2233_vm3, %v2229_v10  ;;  %v1974_v19 = vadd.f32 %v3380_v44, %v1842_v11  ;;  %v2006_v20 = vadd.f32 %v3380_v44, %v1874_v12 }
 0x1d6   : > { %v1911_v21 = vadd.f32 %v3380_v44, %v1779_v15  ;;  %v1943_v24 = vadd.f32 %v3380_v44, %v1811_v16 }
 0x1d7   : > { %v2102_v22 = vmax.f32 %v1974_v19, 0.0  ;;  %v2134_v23 = vmax.f32 %v2006_v20, 0.0 }
 0x1d8   : > { %v2039_v27 = vmax.f32 %v1911_v21, 0.0  ;;  %v2071_v31 = vmax.f32 %v1943_v24, 0.0 }
 0x1d9   : > { %v2198_v26 = vmax.f32 %v2102_v22, %v2134_v23 }
 0x1da   : > { %v1660_v28 = vpop.f32.mrf.mxu2  ;;  %v1740_v29 = vpop.f32.mrf.mxu3  ;;  %v2167_v41 = vmax.f32 %v2039_v27, %v2071_v31 }
 0x1db   : > { %v2230_v30 = vmax.f32 %v2166_v25, %v2198_v26  ;;  %v1843_v32 = vmul.f32 %v3371_v3, %v1660_v28  ;;  %v1875_v33 = vmul.f32 %v3371_v3, %v1740_v29  ;;  %v1502_v34 = vpop.f32.mrf.mxu0  ;;  %v1582_v35 = vpop.f32.mrf.mxu1 }
 0x1dc   : > { %v1780_v38 = vmul.f32 %v3371_v3, %v1502_v34  ;;  %v1812_v39 = vmul.f32 %v3371_v3, %v1582_v35 }
 0x1dd   : > { %2263 = vst.msk [vmem:[%s3100_s24 + $0xe8] sm:$0xff] %vm2233_vm3, %v2230_v30  ;;  %v1975_v36 = vadd.f32 %v3380_v44, %v1843_v32  ;;  %v2007_v37 = vadd.f32 %v3380_v44, %v1875_v33 }
 0x1de   : > { %v1912_v46 = vadd.f32 %v3380_v44, %v1780_v38  ;;  %v1944_v47 = vadd.f32 %v3380_v44, %v1812_v39 }
 0x1df   : > { %v2103_v42 = vmax.f32 %v1975_v36, 0.0  ;;  %v2135_v43 = vmax.f32 %v2007_v37, 0.0 }
 0x1e0   : > { %v2040_v53 = vmax.f32 %v1912_v46, 0.0  ;;  %v2072_v54 = vmax.f32 %v1944_v47, 0.0 }
 0x1e1   : > { %v2199_v45 = vmax.f32 %v2103_v42, %v2135_v43 }
 0x1e2   : > { %v1662_v48 = vpop.f32.mrf.mxu2  ;;  %v1742_v49 = vpop.f32.mrf.mxu3  ;;  %v2168_v59 = vmax.f32 %v2040_v53, %v2072_v54 }
 0x1e3   : > { %v2231_v50 = vmax.f32 %v2167_v41, %v2199_v45  ;;  %v1844_v51 = vmul.f32 %v3371_v3, %v1662_v48  ;;  %v1876_v52 = vmul.f32 %v3371_v3, %v1742_v49 }
 0x1e5   : > { %2264 = vst.msk [vmem:[%s3100_s24 + $0xf0] sm:$0xff] %vm2233_vm3, %v2231_v50  ;;  %v1976_v55 = vadd.f32 %v3380_v44, %v1844_v51  ;;  %v2008_v56 = vadd.f32 %v3380_v44, %v1876_v52 }
 0x1e7   : > { %v2104_v57 = vmax.f32 %v1976_v55, 0.0  ;;  %v2136_v58 = vmax.f32 %v2008_v56, 0.0 }
 0x1e9   : > { %v2200_v60 = vmax.f32 %v2104_v57, %v2136_v58 }
 0x1eb   : > { %v2232_v61 = vmax.f32 %v2168_v59, %v2200_v60 }
 0x1ed   : > { %2265 = vst.msk [vmem:[%s3100_s24 + $0xf8] sm:$0xff] %vm2233_vm3, %v2232_v61 }
 0x1ee PF: > { %p11_p9 = scmp.ge.s32.totalorder %s2838_s19, 4   ;;  %s3491_s15 = smov %s2789_s16 }
 0x1ef   : > { %s3492_s16 = smov %s2847_s22  ;;  %s3493_s17 = smov %s2838_s19 }
 0x1f0   :  { %13 = sbr.rel (!%p11_p9) target bundleno = 2 (0x2), region = 112 }

// kernel: hyper_vision_forward.4
= control target key start
LH: loop header
LB: loop body
LE: loop exit
PB: predicated region body
PF: predicated region fallthrough
CT: control target
= control target key end

     0   :  { %s1843_s15 = smov 0   ;;  %s1845_s16 = smov 0   ;;  %s2410_s0 = inlined_call_operand.vmem [shape: bf16[4,128,288], index: 0, kind: input, shape index: {}]   ;;  %s2411_s1 = inlined_call_operand.vmem [shape: bf16[288,64], index: 1, kind: input, shape index: {}]   ;;  %s2412_s2 = inlined_call_operand.vmem [shape: f32[1,64], index: 2, kind: input, shape index: {}]   ;;  %s2413_s3 = inlined_call_operand.vmem [shape: f32[1,64], index: 3, kind: input, shape index: {}]   ;;  %s2414_s4 = inlined_call_operand.vmem [shape: f32[128,64], index: 4, kind: output, shape index: {}]  }
   0x1   :  { %s1847_s17 = smov 0  }
   0x2 LB: > { %s1325_s18 = sadd.s32 4294967295, %s1816_s17   ;;  %s1860_s19 = sadd.s32 1, %s1816_s17   ;;  %s1816_s17 = sphi %s1847_s17, %s2417_s17   ;;  %s1812_s16 = sphi %s1845_s16, %s2416_s16   ;;  %s1808_s15 = sphi %s1843_s15, %s2415_s15  }
   0x3   : > { %s18_s20 = ssub.s32 %s1816_s17, %s1860_s19  ;;  %s21_s21 = sadd.s32 1, %s1812_s16 }
   0x4   : > { %p19_p0 = scmp.eq.s32.totalorder %s18_s20, 0  ;;  %p28_p1 = scmp.ne.s32.totalorder %s1812_s16, %s1808_s15 }
   0x5   : > { %p29_p2 = scmp.eq.s32.totalorder %s1816_s17, 0  ;;  %p1328_p4 = scmp.ge.s32.totalorder %s1816_s17, 2 }
   0x6   : > { %s1869_s22 = scalar_select %p19_p0, %s1812_s16, %s21_s21  }
   0x7   : > { %p30_p3 = por %p29_p2, %p28_p1  ;;  %152 = sbr.rel (%p1328_p4) target bundleno = 81 (0x51), region = 28 }
   0xc   : > { %155 = sbr.rel (!%p30_p3) target bundleno = 81 (0x51), region = 32  ;;  %s157_s23 = sand.u32 (%p30_p3), 1, %s1812_s16  }
   0xd   : > { %s1766_s24 = smul.u32 (%p30_p3), 96, %s1816_s17 }
   0xe   : > { %s1765_s25 = smul.u32 (%p30_p3), 384, %s157_s23 }
   0xf   : > { %s1877_s28 = scalar_lea.vmem (%p30_p3), %s2410_s0, %s1766_s24 }
  0x10   : > { %v178_v0 = vld [vmem:[%s1877_s28] sm:$0xff] (%p30_p3)  ;;  %v180_v1 = vld [vmem:[%s1877_s28 + $0xc] sm:$0xff] (%p30_p3)  ;;  %v182_v2 = vld [vmem:[%s1877_s28 + $0x18] sm:$0xff] (%p30_p3)  ;;  %s1882_s29 = scalar_lea.vmem (%p30_p3), [#allocation2], %s1765_s25 }
  0x11   : > { %179 = vst [vmem:[%s1882_s29] sm:$0xff] %v178_v0  ;;  %v184_v3 = vld [vmem:[%s1877_s28 + $0x24] sm:$0xff]  ;;  %v186_v4 = vld [vmem:[%s1877_s28 + $0x30] sm:$0xff]  ;;  %v188_v5 = vld [vmem:[%s1877_s28 + $0x3c] sm:$0xff] }
  0x12   : > { %181 = vst [vmem:[%s1882_s29 + $0xc] sm:$0xff] %v180_v1  ;;  %v190_v6 = vld [vmem:[%s1877_s28 + $0x48] sm:$0xff]  ;;  %v192_v7 = vld [vmem:[%s1877_s28 + $0x54] sm:$0xff]  ;;  %v194_v8 = vld [vmem:[%s1877_s28 + $0xc0] sm:$0xff] }
  0x13   : > { %183 = vst [vmem:[%s1882_s29 + $0x18] sm:$0xff] %v182_v2  ;;  %v196_v9 = vld [vmem:[%s1877_s28 + $0xcc] sm:$0xff]  ;;  %v198_v10 = vld [vmem:[%s1877_s28 + $0xd8] sm:$0xff]  ;;  %v200_v11 = vld [vmem:[%s1877_s28 + $0xe4] sm:$0xff] }
  0x14   : > { %185 = vst [vmem:[%s1882_s29 + $0x24] sm:$0xff] %v184_v3  ;;  %v202_v12 = vld [vmem:[%s1877_s28 + $0xf0] sm:$0xff]  ;;  %v204_v13 = vld [vmem:[%s1877_s28 + $0xfc] sm:$0xff]  ;;  %v206_v14 = vld [vmem:[%s1877_s28 + $0x108] sm:$0xff] }
  0x15   : > { %187 = vst [vmem:[%s1882_s29 + $0x30] sm:$0xff] %v186_v4  ;;  %v208_v15 = vld [vmem:[%s1877_s28 + $0x114] sm:$0xff]  ;;  %v210_v16 = vld [vmem:[%s1877_s28 + $0x180] sm:$0xff]  ;;  %v212_v17 = vld [vmem:[%s1877_s28 + $0x18c] sm:$0xff] }
  0x16   : > { %189 = vst [vmem:[%s1882_s29 + $0x3c] sm:$0xff] %v188_v5  ;;  %v214_v18 = vld [vmem:[%s1877_s28 + $0x198] sm:$0xff]  ;;  %v216_v19 = vld [vmem:[%s1877_s28 + $0x1a4] sm:$0xff]  ;;  %v218_v20 = vld [vmem:[%s1877_s28 + $0x1b0] sm:$0xff] }
  0x17   : > { %191 = vst [vmem:[%s1882_s29 + $0x48] sm:$0xff] %v190_v6  ;;  %v220_v21 = vld [vmem:[%s1877_s28 + $0x1bc] sm:$0xff]  ;;  %v222_v22 = vld [vmem:[%s1877_s28 + $0x1c8] sm:$0xff]  ;;  %v224_v23 = vld [vmem:[%s1877_s28 + $0x1d4] sm:$0xff] }
  0x18   : > { %193 = vst [vmem:[%s1882_s29 + $0x54] sm:$0xff] %v192_v7  ;;  %v226_v24 = vld [vmem:[%s1877_s28 + $0x240] sm:$0xff]  ;;  %v228_v25 = vld [vmem:[%s1877_s28 + $0x24c] sm:$0xff]  ;;  %v230_v26 = vld [vmem:[%s1877_s28 + $0x258] sm:$0xff] }
  0x19   : > { %195 = vst [vmem:[%s1882_s29 + $0x60] sm:$0xff] %v194_v8  ;;  %v232_v27 = vld [vmem:[%s1877_s28 + $0x264] sm:$0xff]  ;;  %v234_v28 = vld [vmem:[%s1877_s28 + $0x270] sm:$0xff]  ;;  %v236_v29 = vld [vmem:[%s1877_s28 + $0x27c] sm:$0xff] }
  0x1a   : > { %197 = vst [vmem:[%s1882_s29 + $0x6c] sm:$0xff] %v196_v9  ;;  %v238_v30 = vld [vmem:[%s1877_s28 + $0x288] sm:$0xff]  ;;  %v240_v31 = vld [vmem:[%s1877_s28 + $0x294] sm:$0xff]  ;;  %v1336_v34 = vld [vmem:[%s1877_s28 + $0x20] sm:$0xf] }
  0x1b   : > { %199 = vst [vmem:[%s1882_s29 + $0x78] sm:$0xff] %v198_v10  ;;  %v1332_v32 = vld [vmem:[%s1877_s28 + $0x8] sm:$0xf]  ;;  %v1334_v33 = vld [vmem:[%s1877_s28 + $0x14] sm:$0xf] }
  0x1c   : > { %201 = vst [vmem:[%s1882_s29 + $0x84] sm:$0xff] %v200_v11  ;;  %v1338_v35 = vld [vmem:[%s1877_s28 + $0x2c] sm:$0xf]  ;;  %v1340_v36 = vld [vmem:[%s1877_s28 + $0x38] sm:$0xf] }
  0x1d   : > { %203 = vst [vmem:[%s1882_s29 + $0x90] sm:$0xff] %v202_v12  ;;  %v1342_v37 = vld [vmem:[%s1877_s28 + $0x44] sm:$0xf]  ;;  %v1344_v38 = vld [vmem:[%s1877_s28 + $0x50] sm:$0xf] }
  0x1e   : > { %205 = vst [vmem:[%s1882_s29 + $0x9c] sm:$0xff] %v204_v13  ;;  %v1346_v39 = vld [vmem:[%s1877_s28 + $0x5c] sm:$0xf]  ;;  %v1348_v40 = vld [vmem:[%s1877_s28 + $0xc8] sm:$0xf] }
  0x1f   : > { %207 = vst [vmem:[%s1882_s29 + $0xa8] sm:$0xff] %v206_v14  ;;  %v1350_v41 = vld [vmem:[%s1877_s28 + $0xd4] sm:$0xf]  ;;  %v1352_v42 = vld [vmem:[%s1877_s28 + $0xe0] sm:$0xf] }
  0x20   : > { %209 = vst [vmem:[%s1882_s29 + $0xb4] sm:$0xff] %v208_v15  ;;  %v1354_v43 = vld [vmem:[%s1877_s28 + $0xec] sm:$0xf]  ;;  %v1356_v44 = vld [vmem:[%s1877_s28 + $0xf8] sm:$0xf] }
  0x21   : > { %211 = vst [vmem:[%s1882_s29 + $0xc0] sm:$0xff] %v210_v16  ;;  %v1358_v45 = vld [vmem:[%s1877_s28 + $0x104] sm:$0xf]  ;;  %v1360_v46 = vld [vmem:[%s1877_s28 + $0x110] sm:$0xf] }
  0x22   : > { %213 = vst [vmem:[%s1882_s29 + $0xcc] sm:$0xff] %v212_v17  ;;  %v1362_v47 = vld [vmem:[%s1877_s28 + $0x11c] sm:$0xf]  ;;  %v1364_v48 = vld [vmem:[%s1877_s28 + $0x188] sm:$0xf] }
  0x23   : > { %215 = vst [vmem:[%s1882_s29 + $0xd8] sm:$0xff] %v214_v18  ;;  %v1366_v49 = vld [vmem:[%s1877_s28 + $0x194] sm:$0xf]  ;;  %v1368_v50 = vld [vmem:[%s1877_s28 + $0x1a0] sm:$0xf] }
  0x24   : > { %217 = vst [vmem:[%s1882_s29 + $0xe4] sm:$0xff] %v216_v19  ;;  %v1370_v51 = vld [vmem:[%s1877_s28 + $0x1ac] sm:$0xf]  ;;  %v1372_v52 = vld [vmem:[%s1877_s28 + $0x1b8] sm:$0xf] }
  0x25   : > { %219 = vst [vmem:[%s1882_s29 + $0xf0] sm:$0xff] %v218_v20  ;;  %v1374_v53 = vld [vmem:[%s1877_s28 + $0x1c4] sm:$0xf]  ;;  %v1376_v54 = vld [vmem:[%s1877_s28 + $0x1d0] sm:$0xf] }
  0x26   : > { %221 = vst [vmem:[%s1882_s29 + $0xfc] sm:$0xff] %v220_v21  ;;  %v1378_v55 = vld [vmem:[%s1877_s28 + $0x1dc] sm:$0xf]  ;;  %v1380_v56 = vld [vmem:[%s1877_s28 + $0x248] sm:$0xf] }
  0x27   : > { %223 = vst [vmem:[%s1882_s29 + $0x108] sm:$0xff] %v222_v22  ;;  %v1382_v57 = vld [vmem:[%s1877_s28 + $0x254] sm:$0xf]  ;;  %v1384_v58 = vld [vmem:[%s1877_s28 + $0x260] sm:$0xf] }
  0x28   : > { %225 = vst [vmem:[%s1882_s29 + $0x114] sm:$0xff] %v224_v23  ;;  %v1386_v59 = vld [vmem:[%s1877_s28 + $0x26c] sm:$0xf]  ;;  %v1388_v60 = vld [vmem:[%s1877_s28 + $0x278] sm:$0xf] }
  0x29   : > { %227 = vst [vmem:[%s1882_s29 + $0x120] sm:$0xff] %v226_v24  ;;  %v1390_v61 = vld [vmem:[%s1877_s28 + $0x284] sm:$0xf]  ;;  %v1392_v62 = vld [vmem:[%s1877_s28 + $0x290] sm:$0xf] }
  0x2a   : > { %229 = vst [vmem:[%s1882_s29 + $0x12c] sm:$0xff] %v228_v25  ;;  %v1394_v63 = vld [vmem:[%s1877_s28 + $0x29c] sm:$0xf] }
  0x2b   : > { %231 = vst [vmem:[%s1882_s29 + $0x138] sm:$0xff] %v230_v26 }
  0x2c   : > { %233 = vst [vmem:[%s1882_s29 + $0x144] sm:$0xff] %v232_v27 }
  0x2d   : > { %235 = vst [vmem:[%s1882_s29 + $0x150] sm:$0xff] %v234_v28 }
  0x2e   : > { %237 = vst [vmem:[%s1882_s29 + $0x15c] sm:$0xff] %v236_v29 }
  0x2f   : > { %239 = vst [vmem:[%s1882_s29 + $0x168] sm:$0xff] %v238_v30 }
  0x30   : > { %241 = vst [vmem:[%s1882_s29 + $0x174] sm:$0xff] %v240_v31 }
  0x31   : > { %1333 = vst [vmem:[%s1882_s29 + $0x8] sm:$0xf] %v1332_v32 }
  0x32   : > { %1335 = vst [vmem:[%s1882_s29 + $0x14] sm:$0xf] %v1334_v33 }
  0x33   : > { %1337 = vst [vmem:[%s1882_s29 + $0x20] sm:$0xf] %v1336_v34 }
  0x34   : > { %1339 = vst [vmem:[%s1882_s29 + $0x2c] sm:$0xf] %v1338_v35 }
  0x35   : > { %1341 = vst [vmem:[%s1882_s29 + $0x38] sm:$0xf] %v1340_v36 }
  0x36   : > { %1343 = vst [vmem:[%s1882_s29 + $0x44] sm:$0xf] %v1342_v37 }
  0x37   : > { %1345 = vst [vmem:[%s1882_s29 + $0x50] sm:$0xf] %v1344_v38 }
  0x38   : > { %1347 = vst [vmem:[%s1882_s29 + $0x5c] sm:$0xf] %v1346_v39 }
  0x39   : > { %1349 = vst [vmem:[%s1882_s29 + $0x68] sm:$0xf] %v1348_v40 }
  0x3a   : > { %1351 = vst [vmem:[%s1882_s29 + $0x74] sm:$0xf] %v1350_v41 }
  0x3b   : > { %1353 = vst [vmem:[%s1882_s29 + $0x80] sm:$0xf] %v1352_v42 }
  0x3c   : > { %1355 = vst [vmem:[%s1882_s29 + $0x8c] sm:$0xf] %v1354_v43 }
  0x3d   : > { %1357 = vst [vmem:[%s1882_s29 + $0x98] sm:$0xf] %v1356_v44 }
  0x3e   : > { %1359 = vst [vmem:[%s1882_s29 + $0xa4] sm:$0xf] %v1358_v45 }
  0x3f   : > { %1361 = vst [vmem:[%s1882_s29 + $0xb0] sm:$0xf] %v1360_v46 }
  0x40   : > { %1363 = vst [vmem:[%s1882_s29 + $0xbc] sm:$0xf] %v1362_v47 }
  0x41   : > { %1365 = vst [vmem:[%s1882_s29 + $0xc8] sm:$0xf] %v1364_v48 }
  0x42   : > { %1367 = vst [vmem:[%s1882_s29 + $0xd4] sm:$0xf] %v1366_v49 }
  0x43   : > { %1369 = vst [vmem:[%s1882_s29 + $0xe0] sm:$0xf] %v1368_v50 }
  0x44   : > { %1371 = vst [vmem:[%s1882_s29 + $0xec] sm:$0xf] %v1370_v51 }
  0x45   : > { %1373 = vst [vmem:[%s1882_s29 + $0xf8] sm:$0xf] %v1372_v52 }
  0x46   : > { %1375 = vst [vmem:[%s1882_s29 + $0x104] sm:$0xf] %v1374_v53 }
  0x47   : > { %1377 = vst [vmem:[%s1882_s29 + $0x110] sm:$0xf] %v1376_v54 }
  0x48   : > { %1379 = vst [vmem:[%s1882_s29 + $0x11c] sm:$0xf] %v1378_v55 }
  0x49   : > { %1381 = vst [vmem:[%s1882_s29 + $0x128] sm:$0xf] %v1380_v56 }
  0x4a   : > { %1383 = vst [vmem:[%s1882_s29 + $0x134] sm:$0xf] %v1382_v57 }
  0x4b   : > { %1385 = vst [vmem:[%s1882_s29 + $0x140] sm:$0xf] %v1384_v58 }
  0x4c   : > { %1387 = vst [vmem:[%s1882_s29 + $0x14c] sm:$0xf] %v1386_v59 }
  0x4d   : > { %1389 = vst [vmem:[%s1882_s29 + $0x158] sm:$0xf] %v1388_v60 }
  0x4e   : > { %1391 = vst [vmem:[%s1882_s29 + $0x164] sm:$0xf] %v1390_v61 }
  0x4f   : > { %1393 = vst [vmem:[%s1882_s29 + $0x170] sm:$0xf] %v1392_v62 }
  0x50   : > { %1395 = vst [vmem:[%s1882_s29 + $0x17c] sm:$0xf] %v1394_v63 }
  0x51 PF: > { %p1396_p5 = scmp.ge.s32.totalorder %s1816_s17, 1  ;;  %p318_p6 = scmp.lt.s32.totalorder %s1816_s17, 3 }
  0x53   : > { %p319_p7 = pnand %p1396_p5, %p318_p6 }
  0x54   : > { %s325_s10 = sand.u32 (!%p319_p7), 1, %s1808_s15   ;;  %s1397_s5 = sshll.u32 (!%p319_p7), %s1325_s18, 3 }
  0x55   : > { %322 = sbr.rel (%p319_p7) target bundleno = 460 (0x1cc), region = 58  ;;  %p352_p8 = scmp.lt.s32.totalorder (!%p319_p7), %s1397_s5, 15 }
  0x56   : > { %s1767_s11 = smul.u32 (!%p319_p7), 384, %s325_s10 }
  0x58   : > { %s2038_s15 = scalar_lea.vmem (!%p319_p7), [#allocation2], %s1767_s11 }
  0x5a   : > { %v1736_v0 = vld [vmem:[%s2411_s1 + $0x38] sm:$0xff]  ;;  %v2022_v2 = vld [vmem:[%s2411_s1 + $0x88] sm:$0xff]  ;;  %v1735_v3 = vld [vmem:[%s2411_s1 + $0x30] sm:$0xff]  ;;  %vm806_vm0 = vcmask 261120   ;;  %s2419_s5 = smov (!%p352_p8, %s1397_s5), 15  ;;  %vm1250_vm1 = vcmask 523264  }
  0x5b   : > { %v2017_v1 = vld [vmem:[%s2411_s1 + $0x78] sm:$0xff]  ;;  %855 = vmatpush.bf16.msra.mxu0 %v1736_v0  ;;  %1747 = vmatpush.bf16.msra.mxu3 %v1736_v0  ;;  %v1743_v4 = vld [vmem:[%s2411_s1 + $0x70] sm:$0xff]  ;;  %v2036_v5 = vld [vmem:[%s2411_s1 + $0x80] sm:$0xff]  ;;  %s1398_s17 = sshll.u32 %s2419_s5, 3 }
  0x5c   : > { %944 = vmatpush.bf16.msra.mxu1 %v2017_v1  ;;  %1039 = vmatpush.bf16.msra.mxu2 %v2022_v2  ;;  %v1409_v6 = vld [vmem:[%s2038_s15 + $0x8] sm:$0xf]  ;;  %v1683_v7 = vld [vmem:[%s2038_s15 + $0x10] sm:$0xf0]  ;;  %v1733_v11 = vld [vmem:[%s2411_s1 + $0x20] sm:$0xff]  ;;  %s2335_s7 = scalar_lea.vmem %s2414_s4, %s1398_s17 }
  0x5d   : > { %v1410_v8 = vor.u32 %v1683_v7, %v1409_v6  ;;  %v1734_v9 = vld [vmem:[%s2411_s1 + $0x28] sm:$0xff]  ;;  %v1741_v12 = vld [vmem:[%s2411_s1 + $0x60] sm:$0xff]  ;;  %v1732_v13 = vld [vmem:[%s2411_s1 + $0x18] sm:$0xff] }
  0x5e   : > { %v1742_v10 = vld [vmem:[%s2411_s1 + $0x68] sm:$0xff]  ;;  %v1740_v14 = vld [vmem:[%s2411_s1 + $0x58] sm:$0xff]  ;;  %v1731_v15 = vld [vmem:[%s2411_s1 + $0x10] sm:$0xff] }
  0x5f   : > { %856 = vmatpush.bf16.msra.mxu0 %v1735_v3  ;;  %1748 = vmatpush.bf16.msra.mxu3 %v1735_v3  ;;  %v1739_v16 = vld [vmem:[%s2411_s1 + $0x50] sm:$0xff]  ;;  %v1421_v17 = vld [vmem:[%s2038_s15 + $0x20] sm:$0xf]  ;;  %v1686_v18 = vld [vmem:[%s2038_s15 + $0x28] sm:$0xf0] }
  0x60   : > { %945 = vmatpush.bf16.msra.mxu1 %v1743_v4  ;;  %1040 = vmatpush.bf16.msra.mxu2 %v2036_v5  ;;  %v1422_v19 = vor.u32 %v1686_v18, %v1421_v17  ;;  %v1730_v20 = vld [vmem:[%s2411_s1 + $0x8] sm:$0xff]  ;;  %v1729_v22 = vld [vmem:[%s2411_s1] sm:$0xff]  ;;  %v1403_v29 = vld [vmem:[%s2038_s15 + $0xc] sm:$0xf0] }
  0x61   : > { %v1738_v21 = vld [vmem:[%s2411_s1 + $0x48] sm:$0xff]  ;;  %v1737_v23 = vld [vmem:[%s2411_s1 + $0x40] sm:$0xff]  ;;  %v1433_v33 = vld [vmem:[%s2038_s15 + $0x38] sm:$0xf] }
  0x62   : > { %v1401_v24 = vld [vmem:[%s2038_s15] sm:$0xf]  ;;  %v1682_v25 = vld [vmem:[%s2038_s15 + $0x8] sm:$0xf0]  ;;  %v1681_v28 = vld [vmem:[%s2038_s15 + $0x4] sm:$0xf] }
  0x63   : > { %1663 = vmatmul.msk.bf16.vlgmr.msra.gmra.mxu2 %vm806_vm0, %v1410_v8  ;;  %857 = vmatpush.bf16.msra.mxu0 %v1734_v9  ;;  %v1545_v26 = vld [vmem:[%s2038_s15 + $0x120] sm:$0xf]  ;;  %v1718_v27 = vld [vmem:[%s2038_s15 + $0x128] sm:$0xf0]  ;;  %v1402_v30 = vor.u32 %v1682_v25, %v1401_v24  ;;  %v1406_v32 = vor.u32 %v1681_v28, %v1403_v29  ;;  %v1689_v34 = vld [vmem:[%s2038_s15 + $0x40] sm:$0xf0] }
  0x64   : > { %1749 = vmatpush.bf16.msra.mxu3 %v1734_v9  ;;  %946 = vmatpush.bf16.msra.mxu1 %v1742_v10  ;;  %v1546_v31 = vor.u32 %v1718_v27, %v1545_v26  ;;  %v1434_v35 = vor.u32 %v1689_v34, %v1433_v33  ;;  %v1413_v36 = vld [vmem:[%s2038_s15 + $0x18] sm:$0xf]  ;;  %v1685_v37 = vld [vmem:[%s2038_s15 + $0x20] sm:$0xf0]  ;;  %v1684_v40 = vld [vmem:[%s2038_s15 + $0x1c] sm:$0xf] }
  0x65   : > { %v1557_v38 = vld [vmem:[%s2038_s15 + $0x138] sm:$0xf]  ;;  %v1721_v39 = vld [vmem:[%s2038_s15 + $0x140] sm:$0xf0]  ;;  %v1415_v41 = vld [vmem:[%s2038_s15 + $0x24] sm:$0xf0]  ;;  %v1414_v42 = vor.u32 %v1685_v37, %v1413_v36 }
  0x66   : > { %v1558_v43 = vor.u32 %v1721_v39, %v1557_v38  ;;  %v1418_v44 = vor.u32 %v1684_v40, %v1415_v41  ;;  %v1445_v45 = vld [vmem:[%s2038_s15 + $0x50] sm:$0xf]  ;;  %v1692_v46 = vld [vmem:[%s2038_s15 + $0x58] sm:$0xf0]  ;;  %v1687_v52 = vld [vmem:[%s2038_s15 + $0x34] sm:$0xf] }
  0x67   : > { %858 = vmatpush.bf16.msra.mxu0 %v1733_v11  ;;  %v1446_v47 = vor.u32 %v1692_v46, %v1445_v45  ;;  %v1425_v48 = vld [vmem:[%s2038_s15 + $0x30] sm:$0xf]  ;;  %v1688_v49 = vld [vmem:[%s2038_s15 + $0x38] sm:$0xf0]  ;;  %v1427_v53 = vld [vmem:[%s2038_s15 + $0x3c] sm:$0xf0] }
  0x68   : > { %1750 = vmatpush.bf16.msra.mxu3 %v1733_v11  ;;  %947 = vmatpush.bf16.msra.mxu1 %v1741_v12  ;;  %v1569_v50 = vld [vmem:[%s2038_s15 + $0x150] sm:$0xf]  ;;  %v1724_v51 = vld [vmem:[%s2038_s15 + $0x158] sm:$0xf0]  ;;  %v1426_v54 = vor.u32 %v1688_v49, %v1425_v48  ;;  %v1430_v56 = vor.u32 %v1687_v52, %v1427_v53  ;;  %v1457_v57 = vld [vmem:[%s2038_s15 + $0x68] sm:$0xf] }
  0x69   : > { %v1570_v55 = vor.u32 %v1724_v51, %v1569_v50  ;;  %v1695_v58 = vld [vmem:[%s2038_s15 + $0x70] sm:$0xf0]  ;;  %v1437_v60 = vld [vmem:[%s2038_s15 + $0x48] sm:$0xf]  ;;  %v1690_v0 = vld [vmem:[%s2038_s15 + $0x4c] sm:$0xf] }
  0x6a   : > { %v1458_v59 = vor.u32 %v1695_v58, %v1457_v57  ;;  %v1691_v61 = vld [vmem:[%s2038_s15 + $0x50] sm:$0xf0]  ;;  %v1581_v62 = vld [vmem:[%s2038_s15 + $0x168] sm:$0xf]  ;;  %v1698_v6 = vld [vmem:[%s2038_s15 + $0x88] sm:$0xf0] }
  0x6b   : > { %859 = vmatpush.bf16.msra.mxu0 %v1732_v13  ;;  %v1727_v63 = vld [vmem:[%s2038_s15 + $0x170] sm:$0xf0]  ;;  %v1449_v8 = vld [vmem:[%s2038_s15 + $0x60] sm:$0xf]  ;;  %v1694_v9 = vld [vmem:[%s2038_s15 + $0x68] sm:$0xf0] }
  0x6c   : > { %1751 = vmatpush.bf16.msra.mxu3 %v1732_v13  ;;  %948 = vmatpush.bf16.msra.mxu1 %v1740_v14  ;;  %v1582_v3 = vor.u32 %v1727_v63, %v1581_v62  ;;  %v1451_v11 = vld [vmem:[%s2038_s15 + $0x6c] sm:$0xf0]  ;;  %v1481_v17 = vld [vmem:[%s2038_s15 + $0x98] sm:$0xf]  ;;  %v1701_v18 = vld [vmem:[%s2038_s15 + $0xa0] sm:$0xf0] }
  0x6d   : > { %v1547_v13 = vld [vmem:[%s2038_s15 + $0x12c] sm:$0xf0]  ;;  %v1720_v24 = vld [vmem:[%s2038_s15 + $0x13c] sm:$0xf]  ;;  %v1559_v25 = vld [vmem:[%s2038_s15 + $0x144] sm:$0xf0] }
  0x6e   : > { %v1562_v28 = vor.u32 %v1720_v24, %v1559_v25  ;;  %v1493_v29 = vld [vmem:[%s2038_s15 + $0xb0] sm:$0xf]  ;;  %v1700_v33 = vld [vmem:[%s2038_s15 + $0x98] sm:$0xf0]  ;;  %v1699_v34 = vld [vmem:[%s2038_s15 + $0x94] sm:$0xf] }
  0x6f   : > { %860 = vmatpush.bf16.msra.mxu0 %v1731_v15  ;;  %v1723_v36 = vld [vmem:[%s2038_s15 + $0x154] sm:$0xf]  ;;  %v1571_v37 = vld [vmem:[%s2038_s15 + $0x15c] sm:$0xf0]  ;;  %v1505_v41 = vld [vmem:[%s2038_s15 + $0xc8] sm:$0xf] }
  0x70   : > { %1752 = vmatpush.bf16.msra.mxu3 %v1731_v15  ;;  %949 = vmatpush.bf16.msra.mxu1 %v1739_v16  ;;  %v1574_v40 = vor.u32 %v1723_v36, %v1571_v37  ;;  %v1703_v45 = vld [vmem:[%s2038_s15 + $0xb0] sm:$0xf0]  ;;  %v1702_v46 = vld [vmem:[%s2038_s15 + $0xac] sm:$0xf]  ;;  %v1583_v49 = vld [vmem:[%s2038_s15 + $0x174] sm:$0xf0] }
  0x71   : > { %v1726_v48 = vld [vmem:[%s2038_s15 + $0x16c] sm:$0xf]  ;;  %v1497_v58 = vld [vmem:[%s2038_s15 + $0xc0] sm:$0xf]  ;;  %v1577_v62 = vld [vmem:[%s2038_s15 + $0x158] sm:$0xf] }
  0x72   : > { %v1586_v53 = vor.u32 %v1726_v48, %v1583_v49  ;;  %v1725_v63 = vld [vmem:[%s2038_s15 + $0x160] sm:$0xf0] }
  0x73   : > { %1664 = vmatmul.msk.bf16.gmra.mxu2 %vm806_vm0, %v1422_v19  ;;  %861 = vmatpush.bf16.msra.mxu0 %v1730_v20  ;;  %v1482_v19 = vor.u32 %v1701_v18, %v1481_v17  ;;  %v1509_v17 = vld [vmem:[%s2038_s15 + $0xd8] sm:$0xf]  ;;  %v1709_v18 = vld [vmem:[%s2038_s15 + $0xe0] sm:$0xf0] }
  0x74   : > { %1753 = vmatpush.bf16.msra.mxu3 %v1730_v20  ;;  %950 = vmatpush.bf16.msra.mxu1 %v1738_v21  ;;  %v1461_v20 = vld [vmem:[%s2038_s15 + $0x78] sm:$0xf]  ;;  %v1510_v25 = vor.u32 %v1709_v18, %v1509_v17 }
  0x77   : > { %862 = vmatpush.bf16.msra.mxu0 %v1729_v22 }
  0x78   : > { %1754 = vmatpush.bf16.msra.mxu3 %v1729_v22  ;;  %951 = vmatpush.bf16.msra.mxu1 %v1737_v23  ;;  %v1696_v22 = vld [vmem:[%s2038_s15 + $0x7c] sm:$0xf] }
  0x7a   : > { %863 = vmatmul.bf16.vlgmr.msra.gmra.mxu0 %v1402_v30  ;;  %v1704_v30 = vld [vmem:[%s2038_s15 + $0xb8] sm:$0xf0] }
  0x7b   : > { %923 = vmatmul.bf16.vlgmr.msra.gmra.mxu3 %v1546_v31  ;;  %952 = vmatmul.bf16.vlgmr.msra.gmra.mxu1 %v1406_v32  ;;  %v1494_v31 = vor.u32 %v1704_v30, %v1493_v29  ;;  %v1473_v32 = vld [vmem:[%s2038_s15 + $0x90] sm:$0xf] }
  0x7c   : > { %1755 = vmatpush.bf16.msrb.mxu3 %v2017_v1  ;;  %v1439_v1 = vld [vmem:[%s2038_s15 + $0x54] sm:$0xf0]  ;;  %v1474_v38 = vor.u32 %v1700_v33, %v1473_v32  ;;  %v1541_v32 = vld [vmem:[%s2038_s15 + $0x110] sm:$0xf]  ;;  %v1716_v33 = vld [vmem:[%s2038_s15 + $0x118] sm:$0xf0] }
  0x7d   : > { %v1542_v37 = vor.u32 %v1716_v33, %v1541_v32 }
  0x80   : > { %1756 = vmatpush.bf16.msrb.mxu3 %v1743_v4  ;;  %v1442_v4 = vor.u32 %v1690_v0, %v1439_v1 }
  0x83   : > { %1665 = vmatmul.msk.bf16.gmra.mxu2 %vm806_vm0, %v1434_v35  ;;  %v1475_v35 = vld [vmem:[%s2038_s15 + $0x9c] sm:$0xf0] }
  0x84   : > { %1757 = vmatpush.bf16.msrb.mxu3 %v1742_v10  ;;  %v1693_v10 = vld [vmem:[%s2038_s15 + $0x64] sm:$0xf]  ;;  %v1478_v39 = vor.u32 %v1699_v34, %v1475_v35 }
  0x85   : > { %v1454_v15 = vor.u32 %v1693_v10, %v1451_v11 }
  0x88   : > { %1758 = vmatpush.bf16.msrb.mxu3 %v1741_v12  ;;  %v1717_v12 = vld [vmem:[%s2038_s15 + $0x124] sm:$0xf] }
  0x8a   : > { %868 = vmatmul.bf16.gmra.mxu0 %v1414_v42  ;;  %v1707_v42 = vld [vmem:[%s2038_s15 + $0xd0] sm:$0xf0] }
  0x8b   : > { %928 = vmatmul.bf16.gmra.mxu3 %v1558_v43  ;;  %957 = vmatmul.bf16.gmra.mxu1 %v1418_v44  ;;  %v1506_v43 = vor.u32 %v1707_v42, %v1505_v41  ;;  %v1485_v44 = vld [vmem:[%s2038_s15 + $0xa8] sm:$0xf]  ;;  %v1521_v41 = vld [vmem:[%s2038_s15 + $0xf0] sm:$0xf]  ;;  %v1712_v42 = vld [vmem:[%s2038_s15 + $0xf8] sm:$0xf0] }
  0x8c   : > { %1759 = vmatpush.bf16.msrb.mxu3 %v1740_v14  ;;  %v1450_v14 = vor.u32 %v1694_v9, %v1449_v8  ;;  %v1486_v51 = vor.u32 %v1703_v45, %v1485_v44  ;;  %v1529_v8 = vld [vmem:[%s2038_s15 + $0xf8] sm:$0xf]  ;;  %v1713_v9 = vld [vmem:[%s2038_s15 + $0x100] sm:$0xf0]  ;;  %v1523_v44 = vld [vmem:[%s2038_s15 + $0xfc] sm:$0xf0] }
  0x90   : > { %1760 = vmatpush.bf16.msrb.mxu3 %v1739_v16  ;;  %v1550_v16 = vor.u32 %v1717_v12, %v1547_v13  ;;  %v1530_v13 = vor.u32 %v1713_v9, %v1529_v8 }
  0x93   : > { %1666 = vmatmul.msk.bf16.gmra.mxu2 %vm806_vm0, %v1446_v47  ;;  %v1487_v47 = vld [vmem:[%s2038_s15 + $0xb4] sm:$0xf0] }
  0x94   : > { %1761 = vmatpush.bf16.msrb.mxu3 %v1738_v21  ;;  %v1697_v21 = vld [vmem:[%s2038_s15 + $0x80] sm:$0xf0]  ;;  %v1490_v52 = vor.u32 %v1702_v46, %v1487_v47  ;;  %v1522_v47 = vor.u32 %v1712_v42, %v1521_v41 }
  0x95   : > { %v1462_v26 = vor.u32 %v1697_v21, %v1461_v20  ;;  %v1511_v20 = vld [vmem:[%s2038_s15 + $0xe4] sm:$0xf0]  ;;  %v1589_v21 = vld [vmem:[%s2038_s15 + $0x170] sm:$0xf] }
  0x98   : > { %1762 = vmatpush.bf16.msrb.mxu3 %v1737_v23  ;;  %v1463_v23 = vld [vmem:[%s2038_s15 + $0x84] sm:$0xf0] }
  0x99   : > { %v1466_v27 = vor.u32 %v1696_v22, %v1463_v23  ;;  %v1728_v22 = vld [vmem:[%s2038_s15 + $0x178] sm:$0xf0] }
  0x9a   : > { %873 = vmatmul.bf16.gmra.mxu0 %v1426_v54  ;;  %v1517_v54 = vld [vmem:[%s2038_s15 + $0xe0] sm:$0xf] }
  0x9b   : > { %933 = vmatmul.bf16.gmra.mxu3 %v1570_v55  ;;  %962 = vmatmul.bf16.gmra.mxu1 %v1430_v56  ;;  %v1710_v55 = vld [vmem:[%s2038_s15 + $0xe8] sm:$0xf0] }
  0x9c   : > { %1763 = vmatpush.bf16.msra.mxu3 %v2022_v2  ;;  %v1438_v2 = vor.u32 %v1691_v61, %v1437_v60  ;;  %v1518_v57 = vor.u32 %v1710_v55, %v1517_v54  ;;  %v1705_v60 = vld [vmem:[%s2038_s15 + $0xc4] sm:$0xf]  ;;  %v1499_v61 = vld [vmem:[%s2038_s15 + $0xcc] sm:$0xf0]  ;;  %v1719_v54 = vld [vmem:[%s2038_s15 + $0x130] sm:$0xf0] }
  0xa0   : > { %1764 = vmatpush.bf16.msra.mxu3 %v2036_v5  ;;  %v1469_v5 = vld [vmem:[%s2038_s15 + $0x80] sm:$0xf] }
  0xa1   : > { %v1470_v7 = vor.u32 %v1698_v6, %v1469_v5 }
  0xa3   : > { %1667 = vmatmul.msk.bf16.gmra.mxu2 %vm806_vm0, %v1458_v59  ;;  %v1706_v59 = vld [vmem:[%s2038_s15 + $0xc8] sm:$0xf0] }
  0xa4   : > { %v1498_v1 = vor.u32 %v1706_v59, %v1497_v58 }
  0xaa   : > { %878 = vmatmul.bf16.gmra.mxu0 %v1438_v2 }
  0xab   : > { %938 = vmatmul.bf16.gmra.mxu3 %v1582_v3  ;;  %967 = vmatmul.bf16.gmra.mxu1 %v1442_v4  ;;  %v1502_v3 = vor.u32 %v1705_v60, %v1499_v61  ;;  %v1578_v4 = vor.u32 %v1725_v63, %v1577_v62  ;;  %v1533_v62 = vld [vmem:[%s2038_s15 + $0x108] sm:$0xf]  ;;  %v1715_v63 = vld [vmem:[%s2038_s15 + $0x110] sm:$0xf0] }
  0xb3   : > { %1668 = vmatmul.msk.bf16.gmra.mxu2 %vm806_vm0, %v1470_v7 }
  0xba   : > { %883 = vmatmul.bf16.gmra.mxu0 %v1450_v14 }
  0xbb   : > { %972 = vmatmul.bf16.gmra.mxu1 %v1454_v15  ;;  %1012 = vmatmul.bf16.vlgmr.msrb.gmra.mxu3 %v1550_v16 }
  0xc3   : > { %1669 = vmatmul.msk.bf16.gmra.mxu2 %vm806_vm0, %v1482_v19  ;;  %v1708_v19 = vld [vmem:[%s2038_s15 + $0xdc] sm:$0xf] }
  0xca   : > { %888 = vmatmul.bf16.gmra.mxu0 %v1462_v26 }
  0xcb   : > { %977 = vmatmul.bf16.gmra.mxu1 %v1466_v27  ;;  %1017 = vmatmul.bf16.gmra.mxu3 %v1562_v28  ;;  %v1514_v27 = vor.u32 %v1708_v19, %v1511_v20  ;;  %v1590_v28 = vor.u32 %v1728_v22, %v1589_v21  ;;  %v2225_v22 = vld [vmem:[%s2412_s2] ss:$0 sm:$0xff] }
  0xd3   : > { %1670 = vmatmul.msk.bf16.gmra.mxu2 %vm806_vm0, %v1494_v31 }
  0xda   : > { %893 = vmatmul.bf16.gmra.mxu0 %v1474_v38 }
  0xdb   : > { %982 = vmatmul.bf16.gmra.mxu1 %v1478_v39  ;;  %1022 = vmatmul.bf16.gmra.mxu3 %v1574_v40 }
  0xe3   : > { %1671 = vmatmul.msk.bf16.gmra.mxu2 %vm806_vm0, %v1506_v43  ;;  %v1711_v43 = vld [vmem:[%s2038_s15 + $0xf4] sm:$0xf] }
  0xe4   : > { %v1526_v49 = vor.u32 %v1711_v43, %v1523_v44 }
  0xe6   : > { %v1042_v50 = vpop.f32.mrf.mxu2 }
  0xea   : > { %898 = vmatmul.bf16.gmra.mxu0 %v1486_v51 }
  0xeb   : > { %987 = vmatmul.bf16.gmra.mxu1 %v1490_v52  ;;  %1027 = vmatmul.bf16.gmra.mxu3 %v1586_v53  ;;  %v1553_v53 = vld [vmem:[%s2038_s15 + $0x128] sm:$0xf] }
  0xec   : > { %v1554_v58 = vor.u32 %v1719_v54, %v1553_v53 }
  0xee   : > { %v1044_v56 = vpop.f32.mrf.mxu2 }
  0xf3   : > { %1672 = vmatmul.msk.bf16.gmra.mxu2 %vm806_vm0, %v1518_v57 }
  0xf6   : > { %v1047_v0 = vpop.f32.mrf.mxu2 }
  0xf7   : > { %v864_v2 = vpop.f32.mrf.mxu0 }
  0xf8   : > { %v953_v5 = vpop.f32.mrf.mxu1 }
  0xf9   : > { %v954_v6 = vadd.f32 %v953_v5, %v864_v2 }
  0xfa   : > { %903 = vmatmul.bf16.gmra.mxu0 %v1498_v1  ;;  %v1535_v1 = vld [vmem:[%s2038_s15 + $0x114] sm:$0xf0] }
  0xfb   : > { %v2164_v7 = vadd.f32 %v1042_v50, %v954_v6  ;;  %992 = vmatmul.bf16.gmra.mxu1 %v1502_v3  ;;  %1677 = vmatmul.msk.bf16.vlgmr.msra.gmra.mxu3 %vm806_vm0, %v1578_v4  ;;  %v1534_v4 = vor.u32 %v1715_v63, %v1533_v62 }
  0xfe   : > { %v2169_v10 = vpop.f32.mrf.mxu3  ;;  %v1049_v11 = vpop.f32.mrf.mxu2 }
  0xff   : > { %v866_v12 = vpop.f32.mrf.mxu0 }
 0x100   : > { %v955_v14 = vpop.f32.mrf.mxu1 }
 0x101   : > { %v956_v15 = vadd.f32 %v955_v14, %v866_v12  ;;  %v1565_v12 = vld [vmem:[%s2038_s15 + $0x140] sm:$0xf] }
 0x103   : > { %v2171_v16 = vadd.f32 %v1044_v56, %v956_v15  ;;  %1673 = vmatmul.msk.bf16.gmra.mxu2 %vm806_vm0, %v1530_v13  ;;  %v1722_v13 = vld [vmem:[%s2038_s15 + $0x148] sm:$0xf0] }
 0x104   : > { %v1566_v18 = vor.u32 %v1722_v13, %v1565_v12 }
 0x105   : > { %v1127_v43 = vmul.f32 %v2225_v22, %v2171_v16 }
 0x106   : > { %v2180_v23 = vpop.f32.mrf.mxu3  ;;  %v1052_v24 = vpop.f32.mrf.mxu2 }
 0x107   : > { %v869_v26 = vpop.f32.mrf.mxu0 }
 0x108   : > { %v958_v29 = vpop.f32.mrf.mxu1 }
 0x109   : > { %v959_v30 = vadd.f32 %v958_v29, %v869_v26  ;;  %v2234_v29 = vld [vmem:[%s2413_s3] ss:$0 sm:$0xff] }
 0x10a   : > { %908 = vmatmul.bf16.gmra.mxu0 %v1510_v25 }
 0x10b   : > { %v2182_v31 = vadd.f32 %v1047_v0, %v959_v30  ;;  %997 = vmatmul.bf16.gmra.mxu1 %v1514_v27  ;;  %1678 = vmatmul.msk.bf16.gmra.mxu3 %vm806_vm0, %v1590_v28  ;;  %v1714_v0 = vld [vmem:[%s2038_s15 + $0x10c] sm:$0xf]  ;;  %v1126_v28 = vmul.f32 %v2225_v22, %v2164_v7 }
 0x10c   : > { %v1538_v6 = vor.u32 %v1714_v0, %v1535_v1 }
 0x10d   : > { %v1162_v33 = vadd.f32 %v2234_v29, %v1126_v28  ;;  %v1128_v16 = vmul.f32 %v2225_v22, %v2182_v31 }
 0x10e   : > { %v2187_v34 = vpop.f32.mrf.mxu3  ;;  %v1054_v35 = vpop.f32.mrf.mxu2 }
 0x10f   : > { %v871_v36 = vpop.f32.mrf.mxu0  ;;  %v1194_v42 = vmax.f32 %v1162_v33, 0.0  ;;  %v1164_v0 = vadd.f32 %v2234_v29, %v1128_v16 }
 0x110   : > { %v960_v38 = vpop.f32.mrf.mxu1 }
 0x111   : > { %v961_v39 = vadd.f32 %v960_v38, %v871_v36 }
 0x113   : > { %v2189_v40 = vadd.f32 %v1049_v11, %v961_v39  ;;  %1674 = vmatmul.msk.bf16.gmra.mxu2 %vm806_vm0, %v1542_v37 }
 0x115   : > { %v1129_v31 = vmul.f32 %v2225_v22, %v2189_v40 }
 0x116   : > { %v2196_v45 = vpop.f32.mrf.mxu3  ;;  %v1057_v46 = vpop.f32.mrf.mxu2 }
 0x117   : > { %v874_v48 = vpop.f32.mrf.mxu0 }
 0x118   : > { %v963_v50 = vpop.f32.mrf.mxu1 }
 0x119   : > { %v964_v51 = vadd.f32 %v963_v50, %v874_v48 }
 0x11a   : > { %913 = vmatmul.bf16.gmra.mxu0 %v1522_v47 }
 0x11b   : > { %v2198_v52 = vadd.f32 %v1052_v24, %v964_v51  ;;  %1002 = vmatmul.bf16.gmra.mxu1 %v1526_v49  ;;  %v1163_v49 = vadd.f32 %v2234_v29, %v1127_v43 }
 0x11d   : > { %v1130_v40 = vmul.f32 %v2225_v22, %v2198_v52 }
 0x11e   : > { %v2202_v55 = vpop.f32.mrf.mxu3  ;;  %v1059_v56 = vpop.f32.mrf.mxu2 }
 0x11f   : > { %v876_v57 = vpop.f32.mrf.mxu0 }
 0x120   : > { %v965_v59 = vpop.f32.mrf.mxu1 }
 0x121   : > { %v966_v60 = vadd.f32 %v965_v59, %v876_v57 }
 0x123   : > { %v2204_v61 = vadd.f32 %v1054_v35, %v966_v60  ;;  %1675 = vmatmul.msk.bf16.gmra.mxu2 %vm806_vm0, %v1554_v58  ;;  %v1195_v58 = vmax.f32 %v1163_v49, 0.0 }
 0x126   : > { %v2211_v2 = vpop.f32.mrf.mxu3  ;;  %v1062_v3 = vpop.f32.mrf.mxu2 }
 0x127   : > { %v879_v5 = vpop.f32.mrf.mxu0 }
 0x128   : > { %v968_v8 = vpop.f32.mrf.mxu1 }
 0x129   : > { %v969_v9 = vadd.f32 %v968_v8, %v879_v5 }
 0x12a   : > { %918 = vmatmul.bf16.gmra.mxu0 %v1534_v4 }
 0x12b   : > { %v2213_v11 = vadd.f32 %v1057_v46, %v969_v9  ;;  %1007 = vmatmul.bf16.gmra.mxu1 %v1538_v6  ;;  %v1196_v9 = vmax.f32 %v1164_v0, 0.0 }
 0x12e   : > { %v2217_v14 = vpop.f32.mrf.mxu3  ;;  %v1064_v15 = vpop.f32.mrf.mxu2 }
 0x12f   : > { %v881_v17 = vpop.f32.mrf.mxu0 }
 0x130   : > { %v970_v19 = vpop.f32.mrf.mxu1 }
 0x131   : > { %v971_v20 = vadd.f32 %v970_v19, %v881_v17 }
 0x133   : > { %v2219_v21 = vadd.f32 %v1059_v56, %v971_v20  ;;  %1676 = vmatmul.msk.bf16.gmra.mxu2 %vm806_vm0, %v1566_v18  ;;  %v1165_v18 = vadd.f32 %v2234_v29, %v1129_v31 }
 0x136   : > { %v2227_v24 = vpop.f32.mrf.mxu3  ;;  %v1067_v25 = vpop.f32.mrf.mxu2 }
 0x137   : > { %v884_v26 = vpop.f32.mrf.mxu0 }
 0x138   : > { %v973_v27 = vpop.f32.mrf.mxu1 }
 0x139   : > { %v974_v30 = vadd.f32 %v973_v27, %v884_v26 }
 0x13b   : > { %v1063_v32 = vadd.f32 %v1062_v3, %v974_v30  ;;  %v1197_v30 = vmax.f32 %v1165_v18, 0.0 }
 0x13d   : > { %v1134_v35 = vmul.f32 %v2225_v22, %v1063_v32 }
 0x13e   : > { %v1013_v36 = vpop.f32.mrf.mxu3  ;;  %v1069_v37 = vpop.f32.mrf.mxu2 }
 0x13f   : > { %v1170_v38 = vadd.f32 %v2234_v29, %v1134_v35  ;;  %v2240_v39 = vadd.f32 %v1013_v36, %v2169_v10  ;;  %v886_v41 = vpop.f32.mrf.mxu0 }
 0x140   : > { %v975_v7 = vpop.f32.mrf.mxu1 }
 0x141   : > { %v1202_v44 = vmax.f32 %v1170_v38, 0.0  ;;  %v976_v46 = vadd.f32 %v975_v7, %v886_v41 }
 0x143   : > { %v2244_v47 = vmax.f32 %v1194_v42, %v1202_v44  ;;  %v1065_v48 = vadd.f32 %v1064_v15, %v976_v46  ;;  %v1131_v44 = vmul.f32 %v2225_v22, %v2204_v61  ;;  %v1132_v61 = vmul.f32 %v2225_v22, %v2213_v11 }
 0x144   : > { %v1133_v11 = vmul.f32 %v2225_v22, %v2219_v21 }
 0x145   : > { %v1135_v50 = vmul.f32 %v2225_v22, %v1065_v48 }
 0x146   : > { %v1015_v51 = vpop.f32.mrf.mxu3  ;;  %v1072_v53 = vpop.f32.mrf.mxu2 }
 0x147   : > { %v1171_v10 = vadd.f32 %v2234_v29, %v1135_v50  ;;  %v2250_v54 = vadd.f32 %v1015_v51, %v2180_v23  ;;  %v889_v56 = vpop.f32.mrf.mxu0  ;;  %v1167_v51 = vadd.f32 %v2234_v29, %v1131_v44 }
 0x148   : > { %v978_v57 = vpop.f32.mrf.mxu1 }
 0x149   : > { %v1203_v59 = vmax.f32 %v1171_v10, 0.0  ;;  %v979_v60 = vadd.f32 %v978_v57, %v889_v56  ;;  %v1199_v16 = vmax.f32 %v1167_v51, 0.0 }
 0x14b   : > { %v2254_v62 = vmax.f32 %v1195_v58, %v1203_v59  ;;  %v1068_v63 = vadd.f32 %v1067_v25, %v979_v60 }
 0x14d   : > { %v1136_v1 = vmul.f32 %v2225_v22, %v1068_v63 }
 0x14e   : > { %v1018_v3 = vpop.f32.mrf.mxu3  ;;  %v1074_v4 = vpop.f32.mrf.mxu2 }
 0x14f   : > { %v1172_v23 = vadd.f32 %v2234_v29, %v1136_v1  ;;  %v2260_v5 = vadd.f32 %v1018_v3, %v2187_v34  ;;  %v891_v6 = vpop.f32.mrf.mxu0  ;;  %v1168_v1 = vadd.f32 %v2234_v29, %v1132_v61 }
 0x150   : > { %v980_v8 = vpop.f32.mrf.mxu1 }
 0x151   : > { %v1204_v12 = vmax.f32 %v1172_v23, 0.0  ;;  %v981_v13 = vadd.f32 %v980_v8, %v891_v6  ;;  %v1200_v31 = vmax.f32 %v1168_v1, 0.0 }
 0x153   : > { %v2264_v15 = vmax.f32 %v1196_v9, %v1204_v12  ;;  %v1070_v17 = vadd.f32 %v1069_v37, %v981_v13  ;;  %v1166_v37 = vadd.f32 %v2234_v29, %v1130_v40 }
 0x155   : > { %v1137_v19 = vmul.f32 %v2225_v22, %v1070_v17  ;;  %v1198_v43 = vmax.f32 %v1166_v37, 0.0 }
 0x156   : > { %v1020_v20 = vpop.f32.mrf.mxu3  ;;  %v1077_v25 = vpop.f32.mrf.mxu2 }
 0x157   : > { %v1173_v34 = vadd.f32 %v2234_v29, %v1137_v19  ;;  %v2270_v26 = vadd.f32 %v1020_v20, %v2196_v45  ;;  %v894_v27 = vpop.f32.mrf.mxu0  ;;  %v1169_v19 = vadd.f32 %v2234_v29, %v1133_v11 }
 0x158   : > { %v983_v28 = vpop.f32.mrf.mxu1 }
 0x159   : > { %v1205_v32 = vmax.f32 %v1173_v34, 0.0  ;;  %v984_v33 = vadd.f32 %v983_v28, %v894_v27  ;;  %v1201_v40 = vmax.f32 %v1169_v19, 0.0 }
 0x15b   : > { %v2274_v35 = vmax.f32 %v1197_v30, %v1205_v32  ;;  %v1073_v36 = vadd.f32 %v1072_v53, %v984_v33 }
 0x15d   : > { %v1138_v38 = vmul.f32 %v2225_v22, %v1073_v36 }
 0x15e   : > { %v1079_v41 = vpop.f32.mrf.mxu2  ;;  %v1023_v49 = vpop.f32.mrf.mxu3 }
 0x15f   : > { %v1174_v7 = vadd.f32 %v2234_v29, %v1138_v38  ;;  %v896_v45 = vpop.f32.mrf.mxu0 }
 0x160   : > { %v985_v42 = vpop.f32.mrf.mxu1 }
 0x161   : > { %v1206_v46 = vmax.f32 %v1174_v7, 0.0  ;;  %v986_v52 = vadd.f32 %v985_v42, %v896_v45 }
 0x163   : > { %v2281_v48 = vmax.f32 %v1198_v43, %v1206_v46  ;;  %v1075_v50 = vadd.f32 %v1074_v4, %v986_v52  ;;  %v1024_v52 = vadd.f32 %v1023_v49, %v2202_v55 }
 0x165   : > { %v1139_v53 = vmul.f32 %v2225_v22, %v1075_v50 }
 0x166   : > { %v2285_v10 = vpop.f32.mrf.mxu2  ;;  %v1025_v3 = vpop.f32.mrf.mxu3 }
 0x167   : > { %v1175_v56 = vadd.f32 %v2234_v29, %v1139_v53  ;;  %v899_v57 = vpop.f32.mrf.mxu0  ;;  %v1026_v61 = vadd.f32 %v1025_v3, %v2211_v2 }
 0x168   : > { %v988_v58 = vpop.f32.mrf.mxu1 }
 0x169   : > { %v1207_v59 = vmax.f32 %v1175_v56, 0.0  ;;  %v989_v60 = vadd.f32 %v988_v58, %v899_v57 }
 0x16b   : > { %v2290_v63 = vmax.f32 %v1199_v16, %v1207_v59  ;;  %v1078_v0 = vadd.f32 %v1077_v25, %v989_v60 }
 0x16d   : > { %v1140_v4 = vmul.f32 %v2225_v22, %v1078_v0 }
 0x16e   : > { %v2294_v23 = vpop.f32.mrf.mxu2  ;;  %v1028_v34 = vpop.f32.mrf.mxu3 }
 0x16f   : > { %v1176_v6 = vadd.f32 %v2234_v29, %v1140_v4  ;;  %v901_v8 = vpop.f32.mrf.mxu0 }
 0x170   : > { %v990_v9 = vpop.f32.mrf.mxu1 }
 0x171   : > { %v1208_v12 = vmax.f32 %v1176_v6, 0.0  ;;  %v991_v13 = vadd.f32 %v990_v9, %v901_v8 }
 0x173   : > { %v2299_v17 = vmax.f32 %v1200_v31, %v1208_v12  ;;  %v1080_v18 = vadd.f32 %v1079_v41, %v991_v13  ;;  %v1029_v13 = vadd.f32 %v1028_v34, %v2217_v14 }
 0x175   : > { %v1141_v20 = vmul.f32 %v2225_v22, %v1080_v18 }
 0x176   : > { %v2303_v25 = vpop.f32.mrf.mxu2  ;;  %v1030_v38 = vpop.f32.mrf.mxu3 }
 0x177   : > { %v1177_v27 = vadd.f32 %v2234_v29, %v1141_v20  ;;  %v904_v28 = vpop.f32.mrf.mxu0 }
 0x178   : > { %v993_v30 = vpop.f32.mrf.mxu1 }
 0x179   : > { %v1209_v32 = vmax.f32 %v1177_v27, 0.0  ;;  %v994_v60 = vadd.f32 %v993_v30, %v904_v28 }
 0x17b   : > { %v2306_v33 = vmax.f32 %v1201_v40, %v1209_v32  ;;  %v1083_v9 = vadd.f32 %v2285_v10, %v994_v60 }
 0x17d   : > { %v1142_v20 = vmul.f32 %v2225_v22, %v1083_v9 }
 0x17e   : > { %v2308_v21 = vpop.f32.mrf.mxu2  ;;  %v1112_v42 = vpop.f32.mrf.mxu3 }
 0x17f   : > { %v906_v36 = vpop.f32.mrf.mxu0  ;;  %v1113_v50 = vadd.f32 %v1112_v42, %v1024_v52 }
 0x180   : > { %v995_v37 = vpop.f32.mrf.mxu1 }
 0x181   : > { %v1154_v58 = vmul.f32 %v2225_v22, %v1113_v50  ;;  %v996_v27 = vadd.f32 %v995_v37, %v906_v36  ;;  %v1178_v37 = vadd.f32 %v2234_v29, %v1142_v20 }
 0x183   : > { %v1190_v0 = vadd.f32 %v2234_v29, %v1154_v58 }
 0x185   : > { %v1222_v11 = vmax.f32 %v1190_v0, 0.0  ;;  %v1210_v0 = vmax.f32 %v1178_v37, 0.0 }
 0x186   : > { %v1092_v41 = vpop.f32.mrf.mxu2  ;;  %v1114_v51 = vpop.f32.mrf.mxu3 }
 0x187   : > { %v2310_v7 = vpop.f32.mrf.mxu0  ;;  %v1115_v1 = vadd.f32 %v1114_v51, %v1026_v61 }
 0x188   : > { %v2312_v45 = vpop.f32.mrf.mxu1 }
 0x189   : > { %v1155_v2 = vmul.f32 %v2225_v22, %v1115_v1 }
 0x18b   : > { %v1191_v10 = vadd.f32 %v2234_v29, %v1155_v2 }
 0x18d   : > { %v1223_v52 = vmax.f32 %v1191_v10, 0.0 }
 0x18e   : > { %v1094_v43 = vpop.f32.mrf.mxu2  ;;  %v1117_v4 = vpop.f32.mrf.mxu3 }
 0x18f   : > { %v2314_v44 = vpop.f32.mrf.mxu0  ;;  %v1118_v28 = vadd.f32 %v1117_v4, %v1029_v13 }
 0x190   : > { %v2316_v46 = vpop.f32.mrf.mxu1 }
 0x191   : > { %v1156_v42 = vmul.f32 %v2225_v22, %v1118_v28  ;;  %v1001_v20 = vadd.f32 %v2316_v46, %v2314_v44 }
 0x193   : > { %v1090_v44 = vadd.f32 %v2308_v21, %v1001_v20 }
 0x196   : > { %v1097_v53 = vpop.f32.mrf.mxu2  ;;  %v1119_v50 = vpop.f32.mrf.mxu3 }
 0x197   : > { %v914_v56 = vpop.f32.mrf.mxu0 }
 0x198   : > { %v1003_v57 = vpop.f32.mrf.mxu1 }
 0x199   : > { %v1004_v16 = vadd.f32 %v1003_v57, %v914_v56  ;;  %v1031_v57 = vadd.f32 %v1030_v38, %v2227_v24 }
 0x19b   : > { %v1093_v59 = vadd.f32 %v1092_v41, %v1004_v16  ;;  %v1085_v41 = vadd.f32 %v2294_v23, %v996_v27  ;;  %v999_v23 = vadd.f32 %v2312_v45, %v2310_v7  ;;  %v1120_v60 = vadd.f32 %v1119_v50, %v1031_v57 }
 0x19d   : > { %v1146_v55 = vmul.f32 %v2225_v22, %v1093_v59  ;;  %v1143_v61 = vmul.f32 %v2225_v22, %v1085_v41  ;;  %v1192_v59 = vadd.f32 %v2234_v29, %v1156_v42  ;;  %v1088_v45 = vadd.f32 %v2303_v25, %v999_v23 }
 0x19e   : > { %v2325_v49 = vpop.f32.mrf.mxu2 }
 0x19f   : > { %v1182_v6 = vadd.f32 %v2234_v29, %v1146_v55  ;;  %v916_v8 = vpop.f32.mrf.mxu0  ;;  %v1179_v7 = vadd.f32 %v2234_v29, %v1143_v61  ;;  %v1224_v9 = vmax.f32 %v1192_v59, 0.0  ;;  %v1144_v25 = vmul.f32 %v2225_v22, %v1088_v45 }
 0x1a0   : > { %v1005_v31 = vpop.f32.mrf.mxu1 }
 0x1a1   : > { %v1214_v3 = vmax.f32 %v1182_v6, 0.0  ;;  %v1006_v12 = vadd.f32 %v1005_v31, %v916_v8 }
 0x1a3   : > { %v1238_v18 = vmax.f32 %v1214_v3, %v1222_v11  ;;  %v1095_v19 = vadd.f32 %v1094_v43, %v1006_v12 }
 0x1a5   : > { %v1246_v30 = vmax.f32 %v2281_v48, %v1238_v18  ;;  %v1147_v40 = vmul.f32 %v2225_v22, %v1095_v19  ;;  %v1211_v19 = vmax.f32 %v1179_v7, 0.0 }
 0x1a6   : > { %v1102_v14 = vpop.f32.mrf.mxu2 }
 0x1a7   : > { %1255 = vst.msk [vmem:[%s2335_s7 + $0x20] sm:$0xff] %vm1250_vm1, %v1246_v30  ;;  %v1183_v34 = vadd.f32 %v2234_v29, %v1147_v40  ;;  %v1103_v32 = vadd.f32 %v1102_v14, %v2240_v39  ;;  %v919_v36 = vpop.f32.mrf.mxu0 }
 0x1a8   : > { %v1008_v43 = vpop.f32.mrf.mxu1 }
 0x1a9   : > { %v1215_v48 = vmax.f32 %v1183_v34, 0.0  ;;  %v1150_v51 = vmul.f32 %v2225_v22, %v1103_v32  ;;  %v1009_v56 = vadd.f32 %v1008_v43, %v919_v36  ;;  %v1180_v34 = vadd.f32 %v2234_v29, %v1144_v25 }
 0x1aa   : > { %v1145_v43 = vmul.f32 %v2225_v22, %v1090_v44 }
 0x1ab   : > { %v1239_v58 = vmax.f32 %v1215_v48, %v1223_v52  ;;  %v1186_v39 = vadd.f32 %v2234_v29, %v1150_v51  ;;  %v1098_v16 = vadd.f32 %v1097_v53, %v1009_v56  ;;  %v1212_v42 = vmax.f32 %v1180_v34, 0.0 }
 0x1ac   : > { %v1181_v48 = vadd.f32 %v2234_v29, %v1145_v43 }
 0x1ad   : > { %v1247_v1 = vmax.f32 %v2290_v63, %v1239_v58  ;;  %v1218_v55 = vmax.f32 %v1186_v39, 0.0  ;;  %v1148_v4 = vmul.f32 %v2225_v22, %v1098_v16  ;;  %v1157_v63 = vmul.f32 %v2225_v22, %v1120_v60 }
 0x1ae   : > { %v1104_v24 = vpop.f32.mrf.mxu2  ;;  %v1213_v58 = vmax.f32 %v1181_v48, 0.0 }
 0x1af   : > { %1256 = vst.msk [vmem:[%s2335_s7 + $0x28] sm:$0xff] %vm1250_vm1, %v1247_v1  ;;  %v1234_v38 = vmax.f32 %v1210_v0, %v1218_v55  ;;  %v1184_v53 = vadd.f32 %v2234_v29, %v1148_v4  ;;  %v1105_v6 = vadd.f32 %v1104_v24, %v2250_v54  ;;  %v921_v8 = vpop.f32.mrf.mxu0 }
 0x1b0   : > { %v1010_v31 = vpop.f32.mrf.mxu1 }
 0x1b1   : > { %v1242_v11 = vmax.f32 %v2244_v47, %v1234_v38  ;;  %v1216_v2 = vmax.f32 %v1184_v53, 0.0  ;;  %v1151_v3 = vmul.f32 %v2225_v22, %v1105_v6  ;;  %v1011_v12 = vadd.f32 %v1010_v31, %v921_v8 }
 0x1b2   : > { %v1193_v47 = vadd.f32 %v2234_v29, %v1157_v63 }
 0x1b3   : > { %1251 = vst.msk [vmem:[%s2335_s7] sm:$0xff] %vm1250_vm1, %v1242_v11  ;;  %v1240_v13 = vmax.f32 %v1216_v2, %v1224_v9  ;;  %v1187_v54 = vadd.f32 %v2234_v29, %v1151_v3  ;;  %v1100_v18 = vadd.f32 %v2325_v49, %v1011_v12 }
 0x1b4   : > { %v1225_v46 = vmax.f32 %v1193_v47, 0.0 }
 0x1b5   : > { %v1248_v27 = vmax.f32 %v2299_v17, %v1240_v13  ;;  %v1219_v28 = vmax.f32 %v1187_v54, 0.0  ;;  %v1149_v10 = vmul.f32 %v2225_v22, %v1100_v18 }
 0x1b6   : > { %v1107_v30 = vpop.f32.mrf.mxu2 }
 0x1b7   : > { %1257 = vst.msk [vmem:[%s2335_s7 + $0x30] sm:$0xff] %vm1250_vm1, %v1248_v27  ;;  %v1235_v40 = vmax.f32 %v1211_v19, %v1219_v28  ;;  %v1185_v49 = vadd.f32 %v2234_v29, %v1149_v10  ;;  %v1108_v14 = vadd.f32 %v1107_v30, %v2260_v5 }
 0x1b9   : > { %v1243_v32 = vmax.f32 %v2254_v62, %v1235_v40  ;;  %v1217_v17 = vmax.f32 %v1185_v49, 0.0  ;;  %v1152_v36 = vmul.f32 %v2225_v22, %v1108_v14 }
 0x1bb   : > { %1252 = vst.msk [vmem:[%s2335_s7 + $0x8] sm:$0xff] %vm1250_vm1, %v1243_v32  ;;  %v1241_v37 = vmax.f32 %v1217_v17, %v1225_v46  ;;  %v1188_v41 = vadd.f32 %v2234_v29, %v1152_v36 }
 0x1bd   : > { %v1249_v5 = vmax.f32 %v2306_v33, %v1241_v37  ;;  %v1220_v52 = vmax.f32 %v1188_v41, 0.0 }
 0x1be   : > { %v1109_v21 = vpop.f32.mrf.mxu2 }
 0x1bf   : > { %1258 = vst.msk [vmem:[%s2335_s7 + $0x38] sm:$0xff] %vm1250_vm1, %v1249_v5  ;;  %v1236_v62 = vmax.f32 %v1212_v42, %v1220_v52  ;;  %v1110_v50 = vadd.f32 %v1109_v21, %v2270_v26 }
 0x1c1   : > { %v1244_v51 = vmax.f32 %v2264_v15, %v1236_v62  ;;  %v1153_v56 = vmul.f32 %v2225_v22, %v1110_v50 }
 0x1c3   : > { %1253 = vst.msk [vmem:[%s2335_s7 + $0x10] sm:$0xff] %vm1250_vm1, %v1244_v51  ;;  %v1189_v57 = vadd.f32 %v2234_v29, %v1153_v56 }
 0x1c5   : > { %v1221_v39 = vmax.f32 %v1189_v57, 0.0 }
 0x1c7   : > { %v1237_v33 = vmax.f32 %v1213_v58, %v1221_v39 }
 0x1c9   : > { %v1245_v16 = vmax.f32 %v2274_v35, %v1237_v33 }
 0x1cb   : > { %1254 = vst.msk [vmem:[%s2335_s7 + $0x18] sm:$0xff] %vm1250_vm1, %v1245_v16 }
 0x1cc PF: > { %p11_p9 = scmp.ge.s32.totalorder %s1860_s19, 4   ;;  %s2415_s15 = smov %s1812_s16 }
 0x1cd   : > { %s2416_s16 = smov %s1869_s22  ;;  %s2417_s17 = smov %s1860_s19 }
 0x1ce   :  { %13 = sbr.rel (!%p11_p9) target bundleno = 2 (0x2), region = 103 }

// kernel: hyper_vision_forward.5
= control target key start
LH: loop header
LB: loop body
LE: loop exit
PB: predicated region body
PF: predicated region fallthrough
CT: control target
= control target key end

     0   :  { %s4695_s0 = inlined_call_operand.vmem [shape: bf16[2,4096], index: 0, kind: input, shape index: {}]   ;;  %s4696_s1 = inlined_call_operand.vmem [shape: bf16[4096,10], index: 1, kind: input, shape index: {}]   ;;  %s4697_s2 = inlined_call_operand.vmem [shape: f32[1,10], index: 2, kind: input, shape index: {}]   ;;  %s4698_s3 = inlined_call_operand.hbm [shape: f32[2,10], index: 3, kind: output, shape index: {}]  }
   0x1   :  { %v3608_v0 = vld [vmem:[%s4696_s1 + $0x38] sm:$0xff]  ;;  %v3607_v4 = vld [vmem:[%s4696_s1 + $0x30] sm:$0xff]  ;;  %v3606_v8 = vld [vmem:[%s4696_s1 + $0x28] sm:$0xff] }
   0x2   :  { %v3616_v1 = vld [vmem:[%s4696_s1 + $0x78] sm:$0xff]  ;;  %2143 = vmatpush.bf16.msra.mxu0 %v3608_v0  ;;  %v3615_v5 = vld [vmem:[%s4696_s1 + $0x70] sm:$0xff]  ;;  %v3614_v9 = vld [vmem:[%s4696_s1 + $0x68] sm:$0xff] }
   0x3   :  { %v3624_v2 = vld [vmem:[%s4696_s1 + $0xb8] sm:$0xff]  ;;  %2156 = vmatpush.bf16.msra.mxu1 %v3616_v1  ;;  %v3623_v6 = vld [vmem:[%s4696_s1 + $0xb0] sm:$0xff]  ;;  %v3622_v10 = vld [vmem:[%s4696_s1 + $0xa8] sm:$0xff] }
   0x4   :  { %v3632_v3 = vld [vmem:[%s4696_s1 + $0xf8] sm:$0xff]  ;;  %2169 = vmatpush.bf16.msra.mxu2 %v3624_v2  ;;  %v3631_v7 = vld [vmem:[%s4696_s1 + $0xf0] sm:$0xff]  ;;  %v3630_v11 = vld [vmem:[%s4696_s1 + $0xe8] sm:$0xff] }
   0x5   :  { %2182 = vmatpush.bf16.msra.mxu3 %v3632_v3  ;;  %v3605_v12 = vld [vmem:[%s4696_s1 + $0x20] sm:$0xff]  ;;  %v3604_v16 = vld [vmem:[%s4696_s1 + $0x18] sm:$0xff]  ;;  %v3603_v20 = vld [vmem:[%s4696_s1 + $0x10] sm:$0xff] }
   0x6   :  { %2144 = vmatpush.bf16.msra.mxu0 %v3607_v4  ;;  %v3613_v13 = vld [vmem:[%s4696_s1 + $0x60] sm:$0xff]  ;;  %v3612_v17 = vld [vmem:[%s4696_s1 + $0x58] sm:$0xff]  ;;  %v3611_v21 = vld [vmem:[%s4696_s1 + $0x50] sm:$0xff] }
   0x7   :  { %2157 = vmatpush.bf16.msra.mxu1 %v3615_v5  ;;  %v3621_v14 = vld [vmem:[%s4696_s1 + $0xa0] sm:$0xff]  ;;  %v3620_v18 = vld [vmem:[%s4696_s1 + $0x98] sm:$0xff] }
   0x8   :  { %2170 = vmatpush.bf16.msra.mxu2 %v3623_v6  ;;  %v3629_v15 = vld [vmem:[%s4696_s1 + $0xe0] sm:$0xff]  ;;  %v3628_v19 = vld [vmem:[%s4696_s1 + $0xd8] sm:$0xff] }
   0x9   :  { %2183 = vmatpush.bf16.msra.mxu3 %v3631_v7  ;;  %v15_v22 = vld [vmem:[%s4695_s0] sm:$0xff] }
   0xa   :  { %2145 = vmatpush.bf16.msra.mxu0 %v3606_v8  ;;  %536 = vst [vmem:[#allocation1] ss:$9 sm:$0xff] %v15_v22 }
   0xb   :  { %2158 = vmatpush.bf16.msra.mxu1 %v3614_v9 }
   0xc   :  { %2171 = vmatpush.bf16.msra.mxu2 %v3622_v10 }
   0xd   :  { %2184 = vmatpush.bf16.msra.mxu3 %v3630_v11 }
   0xe   :  { %2146 = vmatpush.bf16.msra.mxu0 %v3605_v12 }
   0xf   :  { %2159 = vmatpush.bf16.msra.mxu1 %v3613_v13 }
  0x10   :  { %2172 = vmatpush.bf16.msra.mxu2 %v3621_v14 }
  0x11   :  { %2185 = vmatpush.bf16.msra.mxu3 %v3629_v15 }
  0x12   :  { %2147 = vmatpush.bf16.msra.mxu0 %v3604_v16 }
  0x13   :  { %2160 = vmatpush.bf16.msra.mxu1 %v3612_v17 }
  0x14   :  { %8 = vsyncpa [#allocation3], 0  ;;  %2173 = vmatpush.bf16.msra.mxu2 %v3620_v18  ;;  %v3619_v23 = vld [vmem:[%s4696_s1 + $0x90] sm:$0xff]  ;;  %v3602_v25 = vld [vmem:[%s4696_s1 + $0x8] sm:$0xff]  ;;  %s2568_s13 = sshll.u32 %s4698_s3, 4  ;;  %vm2559_vm0 = vcmask 74752   ;;  %s2569_s13 = int_to_ptr.hbm [resolvable:$true] %s2568_s13 }
  0x15   :  { %2186 = vmatpush.bf16.msra.mxu3 %v3628_v19  ;;  %v3627_v24 = vld [vmem:[%s4696_s1 + $0xd0] sm:$0xff]  ;;  %v3610_v26 = vld [vmem:[%s4696_s1 + $0x48] sm:$0xff]  ;;  %v3601_v29 = vld [vmem:[%s4696_s1] sm:$0xff] }
  0x16   :  { %2148 = vmatpush.bf16.msra.mxu0 %v3603_v20  ;;  %v3618_v27 = vld [vmem:[%s4696_s1 + $0x88] sm:$0xff]  ;;  %v3609_v30 = vld [vmem:[%s4696_s1 + $0x40] sm:$0xff]  ;;  %v3640_v33 = vld [vmem:[%s4696_s1 + $0x138] sm:$0xff] }
  0x17   :  { %2161 = vmatpush.bf16.msra.mxu1 %v3611_v21  ;;  %v3626_v28 = vld [vmem:[%s4696_s1 + $0xc8] sm:$0xff]  ;;  %v3617_v31 = vld [vmem:[%s4696_s1 + $0x80] sm:$0xff]  ;;  %v3648_v34 = vld [vmem:[%s4696_s1 + $0x178] sm:$0xff] }
  0x18   :  { %2174 = vmatpush.bf16.msra.mxu2 %v3619_v23  ;;  %v3625_v32 = vld [vmem:[%s4696_s1 + $0xc0] sm:$0xff]  ;;  %v3656_v35 = vld [vmem:[%s4696_s1 + $0x1b8] sm:$0xff]  ;;  %v3639_v37 = vld [vmem:[%s4696_s1 + $0x130] sm:$0xff] }
  0x19   :  { %2187 = vmatpush.bf16.msra.mxu3 %v3627_v24  ;;  %v3664_v36 = vld [vmem:[%s4696_s1 + $0x1f8] sm:$0xff]  ;;  %v537_v39 = vld [vmem:[#allocation1] sm:$0xff]  ;;  %v3647_v40 = vld [vmem:[%s4696_s1 + $0x170] sm:$0xff] }
  0x1a   :  { %2149 = vmatpush.bf16.msra.mxu0 %v3602_v25  ;;  %v539_v38 = vld [vmem:[#allocation1 + $0x12] sm:$0xff]  ;;  %v540_v41 = vld [vmem:[#allocation1 + $0x1b] sm:$0xff]  ;;  %v538_v42 = vld [vmem:[#allocation1 + $0x9] sm:$0xff] }
  0x1b   :  { %2162 = vmatpush.bf16.msra.mxu1 %v3610_v26  ;;  %v3655_v43 = vld [vmem:[%s4696_s1 + $0x1b0] sm:$0xff]  ;;  %v3638_v45 = vld [vmem:[%s4696_s1 + $0x128] sm:$0xff]  ;;  %v544_v51 = vld [vmem:[#allocation1 + $0x3f] sm:$0xff] }
  0x1c   :  { %2175 = vmatpush.bf16.msra.mxu2 %v3618_v27  ;;  %v3663_v44 = vld [vmem:[%s4696_s1 + $0x1f0] sm:$0xff]  ;;  %v3646_v46 = vld [vmem:[%s4696_s1 + $0x168] sm:$0xff]  ;;  %v3637_v54 = vld [vmem:[%s4696_s1 + $0x120] sm:$0xff] }
  0x1d   :  { %2188 = vmatpush.bf16.msra.mxu3 %v3626_v28  ;;  %v3654_v47 = vld [vmem:[%s4696_s1 + $0x1a8] sm:$0xff]  ;;  %v543_v49 = vld [vmem:[#allocation1 + $0x36] sm:$0xff]  ;;  %v3645_v55 = vld [vmem:[%s4696_s1 + $0x160] sm:$0xff] }
  0x1e   :  { %2150 = vmatpush.bf16.msra.mxu0 %v3601_v29  ;;  %v3662_v48 = vld [vmem:[%s4696_s1 + $0x1e8] sm:$0xff]  ;;  %v3653_v56 = vld [vmem:[%s4696_s1 + $0x1a0] sm:$0xff]  ;;  %v3636_v58 = vld [vmem:[%s4696_s1 + $0x118] sm:$0xff] }
  0x1f   :  { %2163 = vmatpush.bf16.msra.mxu1 %v3609_v30  ;;  %v541_v50 = vld [vmem:[#allocation1 + $0x24] sm:$0xff]  ;;  %v542_v53 = vld [vmem:[#allocation1 + $0x2d] sm:$0xff]  ;;  %v3644_v59 = vld [vmem:[%s4696_s1 + $0x158] sm:$0xff] }
  0x20   :  { %2176 = vmatpush.bf16.msra.mxu2 %v3617_v31  ;;  %v16_v52 = vld [vmem:[%s4695_s0 + $0x8] sm:$0xff]  ;;  %v3661_v57 = vld [vmem:[%s4696_s1 + $0x1e0] sm:$0xff]  ;;  %v3652_v60 = vld [vmem:[%s4696_s1 + $0x198] sm:$0xff] }
  0x21   :  { %2189 = vmatpush.bf16.msra.mxu3 %v3625_v32  ;;  %2151 = vmatmul.bf16.vlgmr.msra.gmra.mxu0 %v537_v39  ;;  %546 = vst [vmem:[#allocation1] ss:$9 sm:$0xff] %v16_v52  ;;  %v3660_v61 = vld [vmem:[%s4696_s1 + $0x1d8] sm:$0xff]  ;;  %v3635_v62 = vld [vmem:[%s4696_s1 + $0x110] sm:$0xff]  ;;  %v3634_v2 = vld [vmem:[%s4696_s1 + $0x108] sm:$0xff] }
  0x22   :  { %2195 = vmatpush.bf16.msrb.mxu0 %v3640_v33  ;;  %2164 = vmatmul.bf16.vlgmr.msra.gmra.mxu1 %v538_v42  ;;  %v3643_v63 = vld [vmem:[%s4696_s1 + $0x150] sm:$0xff]  ;;  %v3642_v3 = vld [vmem:[%s4696_s1 + $0x148] sm:$0xff]  ;;  %v3633_v6 = vld [vmem:[%s4696_s1 + $0x100] sm:$0xff] }
  0x23   :  { %2208 = vmatpush.bf16.msrb.mxu1 %v3648_v34  ;;  %2177 = vmatmul.bf16.vlgmr.msra.gmra.mxu2 %v539_v38  ;;  %v3651_v0 = vld [vmem:[%s4696_s1 + $0x190] sm:$0xff]  ;;  %v3650_v4 = vld [vmem:[%s4696_s1 + $0x188] sm:$0xff]  ;;  %v3641_v7 = vld [vmem:[%s4696_s1 + $0x140] sm:$0xff] }
  0x24   :  { %2221 = vmatpush.bf16.msrb.mxu2 %v3656_v35  ;;  %2190 = vmatmul.bf16.vlgmr.msra.gmra.mxu3 %v540_v41  ;;  %v3659_v1 = vld [vmem:[%s4696_s1 + $0x1d0] sm:$0xff]  ;;  %v3658_v5 = vld [vmem:[%s4696_s1 + $0x1c8] sm:$0xff]  ;;  %v3649_v8 = vld [vmem:[%s4696_s1 + $0x180] sm:$0xff] }
  0x25   :  { %2234 = vmatpush.bf16.msrb.mxu3 %v3664_v36  ;;  %v3657_v9 = vld [vmem:[%s4696_s1 + $0x1c0] sm:$0xff]  ;;  %v3672_v10 = vld [vmem:[%s4696_s1 + $0x238] sm:$0xff]  ;;  %v3671_v14 = vld [vmem:[%s4696_s1 + $0x230] sm:$0xff] }
  0x26   :  { %2196 = vmatpush.bf16.msrb.mxu0 %v3639_v37  ;;  %v3680_v11 = vld [vmem:[%s4696_s1 + $0x278] sm:$0xff]  ;;  %v3679_v15 = vld [vmem:[%s4696_s1 + $0x270] sm:$0xff]  ;;  %v3670_v18 = vld [vmem:[%s4696_s1 + $0x228] sm:$0xff] }
  0x27   :  { %2209 = vmatpush.bf16.msrb.mxu1 %v3647_v40  ;;  %v3688_v12 = vld [vmem:[%s4696_s1 + $0x2b8] sm:$0xff]  ;;  %v3687_v16 = vld [vmem:[%s4696_s1 + $0x2b0] sm:$0xff]  ;;  %v3678_v19 = vld [vmem:[%s4696_s1 + $0x268] sm:$0xff] }
  0x28   :  { %2222 = vmatpush.bf16.msrb.mxu2 %v3655_v43  ;;  %v3696_v13 = vld [vmem:[%s4696_s1 + $0x2f8] sm:$0xff]  ;;  %v3695_v17 = vld [vmem:[%s4696_s1 + $0x2f0] sm:$0xff]  ;;  %v3686_v20 = vld [vmem:[%s4696_s1 + $0x2a8] sm:$0xff] }
  0x29   :  { %2235 = vmatpush.bf16.msrb.mxu3 %v3663_v44  ;;  %v3694_v21 = vld [vmem:[%s4696_s1 + $0x2e8] sm:$0xff]  ;;  %v3669_v22 = vld [vmem:[%s4696_s1 + $0x220] sm:$0xff]  ;;  %v3668_v26 = vld [vmem:[%s4696_s1 + $0x218] sm:$0xff] }
  0x2a   :  { %2197 = vmatpush.bf16.msrb.mxu0 %v3638_v45  ;;  %v3677_v23 = vld [vmem:[%s4696_s1 + $0x260] sm:$0xff]  ;;  %v3676_v27 = vld [vmem:[%s4696_s1 + $0x258] sm:$0xff]  ;;  %v3667_v30 = vld [vmem:[%s4696_s1 + $0x210] sm:$0xff] }
  0x2b   :  { %2210 = vmatpush.bf16.msrb.mxu1 %v3646_v46  ;;  %v3685_v24 = vld [vmem:[%s4696_s1 + $0x2a0] sm:$0xff]  ;;  %v3684_v28 = vld [vmem:[%s4696_s1 + $0x298] sm:$0xff]  ;;  %v3675_v31 = vld [vmem:[%s4696_s1 + $0x250] sm:$0xff] }
  0x2c   :  { %2223 = vmatpush.bf16.msrb.mxu2 %v3654_v47  ;;  %v3693_v25 = vld [vmem:[%s4696_s1 + $0x2e0] sm:$0xff]  ;;  %v3692_v29 = vld [vmem:[%s4696_s1 + $0x2d8] sm:$0xff]  ;;  %v3683_v32 = vld [vmem:[%s4696_s1 + $0x290] sm:$0xff] }
  0x2d   :  { %2236 = vmatpush.bf16.msrb.mxu3 %v3662_v48  ;;  %v3691_v33 = vld [vmem:[%s4696_s1 + $0x2d0] sm:$0xff]  ;;  %v3666_v34 = vld [vmem:[%s4696_s1 + $0x208] sm:$0xff]  ;;  %v3665_v38 = vld [vmem:[%s4696_s1 + $0x200] sm:$0xff] }
  0x2e   :  { %2198 = vmatpush.bf16.msrb.mxu0 %v3637_v54  ;;  %v3674_v35 = vld [vmem:[%s4696_s1 + $0x248] sm:$0xff]  ;;  %v3673_v39 = vld [vmem:[%s4696_s1 + $0x240] sm:$0xff]  ;;  %v3704_v42 = vld [vmem:[%s4696_s1 + $0x338] sm:$0xff] }
  0x2f   :  { %2211 = vmatpush.bf16.msrb.mxu1 %v3645_v55  ;;  %v3682_v36 = vld [vmem:[%s4696_s1 + $0x288] sm:$0xff]  ;;  %v3681_v40 = vld [vmem:[%s4696_s1 + $0x280] sm:$0xff]  ;;  %v3712_v43 = vld [vmem:[%s4696_s1 + $0x378] sm:$0xff] }
  0x30   :  { %2224 = vmatpush.bf16.msrb.mxu2 %v3653_v56  ;;  %v3690_v37 = vld [vmem:[%s4696_s1 + $0x2c8] sm:$0xff]  ;;  %v3689_v41 = vld [vmem:[%s4696_s1 + $0x2c0] sm:$0xff]  ;;  %v3720_v44 = vld [vmem:[%s4696_s1 + $0x3b8] sm:$0xff] }
  0x31   :  { %2237 = vmatpush.bf16.msrb.mxu3 %v3661_v57  ;;  %v3728_v45 = vld [vmem:[%s4696_s1 + $0x3f8] sm:$0xff]  ;;  %v547_v46 = vld [vmem:[#allocation1] sm:$0xff]  ;;  %v548_v48 = vld [vmem:[#allocation1 + $0x9] sm:$0xff] }
  0x32   :  { %2199 = vmatpush.bf16.msrb.mxu0 %v3636_v58  ;;  %v549_v47 = vld [vmem:[#allocation1 + $0x12] sm:$0xff]  ;;  %v3702_v54 = vld [vmem:[%s4696_s1 + $0x328] sm:$0xff]  ;;  %v3701_v58 = vld [vmem:[%s4696_s1 + $0x320] sm:$0xff] }
  0x33   :  { %2212 = vmatpush.bf16.msrb.mxu1 %v3644_v59  ;;  %v3719_v52 = vld [vmem:[%s4696_s1 + $0x3b0] sm:$0xff]  ;;  %v3710_v55 = vld [vmem:[%s4696_s1 + $0x368] sm:$0xff]  ;;  %v3709_v59 = vld [vmem:[%s4696_s1 + $0x360] sm:$0xff] }
  0x34   :  { %2225 = vmatpush.bf16.msrb.mxu2 %v3652_v60  ;;  %v3718_v56 = vld [vmem:[%s4696_s1 + $0x3a8] sm:$0xff]  ;;  %v3717_v60 = vld [vmem:[%s4696_s1 + $0x3a0] sm:$0xff] }
  0x35   :  { %2238 = vmatpush.bf16.msrb.mxu3 %v3660_v61  ;;  %v3726_v57 = vld [vmem:[%s4696_s1 + $0x3e8] sm:$0xff]  ;;  %v3725_v61 = vld [vmem:[%s4696_s1 + $0x3e0] sm:$0xff] }
  0x36   :  { %2200 = vmatpush.bf16.msrb.mxu0 %v3635_v62  ;;  %v3700_v62 = vld [vmem:[%s4696_s1 + $0x318] sm:$0xff] }
  0x37   :  { %2213 = vmatpush.bf16.msrb.mxu1 %v3643_v63  ;;  %v3708_v63 = vld [vmem:[%s4696_s1 + $0x358] sm:$0xff] }
  0x38   :  { %2226 = vmatpush.bf16.msrb.mxu2 %v3651_v0  ;;  %v3716_v0 = vld [vmem:[%s4696_s1 + $0x398] sm:$0xff] }
  0x39   :  { %2239 = vmatpush.bf16.msrb.mxu3 %v3659_v1  ;;  %v3724_v1 = vld [vmem:[%s4696_s1 + $0x3d8] sm:$0xff] }
  0x3a   :  { %2201 = vmatpush.bf16.msrb.mxu0 %v3634_v2  ;;  %v3699_v2 = vld [vmem:[%s4696_s1 + $0x310] sm:$0xff] }
  0x3b   :  { %2214 = vmatpush.bf16.msrb.mxu1 %v3642_v3  ;;  %v3707_v3 = vld [vmem:[%s4696_s1 + $0x350] sm:$0xff] }
  0x3c   :  { %2227 = vmatpush.bf16.msrb.mxu2 %v3650_v4  ;;  %v3715_v4 = vld [vmem:[%s4696_s1 + $0x390] sm:$0xff] }
  0x3d   :  { %2240 = vmatpush.bf16.msrb.mxu3 %v3658_v5  ;;  %v3723_v5 = vld [vmem:[%s4696_s1 + $0x3d0] sm:$0xff] }
  0x3e   :  { %2202 = vmatpush.bf16.msrb.mxu0 %v3633_v6  ;;  %v3698_v6 = vld [vmem:[%s4696_s1 + $0x308] sm:$0xff] }
  0x3f   :  { %2215 = vmatpush.bf16.msrb.mxu1 %v3641_v7  ;;  %v3706_v7 = vld [vmem:[%s4696_s1 + $0x348] sm:$0xff] }
  0x40   :  { %2228 = vmatpush.bf16.msrb.mxu2 %v3649_v8  ;;  %v3714_v8 = vld [vmem:[%s4696_s1 + $0x388] sm:$0xff] }
  0x41   :  { %2241 = vmatpush.bf16.msrb.mxu3 %v3657_v9  ;;  %2203 = vmatmul.bf16.vlgmr.msrb.gmra.mxu0 %v541_v50  ;;  %v3703_v50 = vld [vmem:[%s4696_s1 + $0x330] sm:$0xff]  ;;  %v3722_v9 = vld [vmem:[%s4696_s1 + $0x3c8] sm:$0xff] }
  0x42   :  { %2247 = vmatpush.bf16.msra.mxu0 %v3672_v10  ;;  %2216 = vmatmul.bf16.vlgmr.msrb.gmra.mxu1 %v542_v53  ;;  %v3727_v53 = vld [vmem:[%s4696_s1 + $0x3f0] sm:$0xff]  ;;  %v551_v10 = vld [vmem:[#allocation1 + $0x24] sm:$0xff] }
  0x43   :  { %2260 = vmatpush.bf16.msra.mxu1 %v3680_v11  ;;  %2229 = vmatmul.bf16.vlgmr.msrb.gmra.mxu2 %v543_v49  ;;  %v550_v49 = vld [vmem:[#allocation1 + $0x1b] sm:$0xff] }
  0x44   :  { %2273 = vmatpush.bf16.msra.mxu2 %v3688_v12  ;;  %2242 = vmatmul.bf16.vlgmr.msrb.gmra.mxu3 %v544_v51  ;;  %v3711_v51 = vld [vmem:[%s4696_s1 + $0x370] sm:$0xff] }
  0x45   :  { %2286 = vmatpush.bf16.msra.mxu3 %v3696_v13  ;;  %v553_v11 = vld [vmem:[#allocation1 + $0x36] sm:$0xff]  ;;  %v552_v12 = vld [vmem:[#allocation1 + $0x2d] sm:$0xff]  ;;  %v554_v13 = vld [vmem:[#allocation1 + $0x3f] sm:$0xff] }
  0x46   :  { %2248 = vmatpush.bf16.msra.mxu0 %v3671_v14  ;;  %v17_v14 = vld [vmem:[%s4695_s0 + $0x10] sm:$0xff] }
  0x47   :  { %2261 = vmatpush.bf16.msra.mxu1 %v3679_v15  ;;  %556 = vst [vmem:[#allocation1] ss:$9 sm:$0xff] %v17_v14  ;;  %v3697_v15 = vld [vmem:[%s4696_s1 + $0x300] sm:$0xff]  ;;  %v3780_v14 = vld [vmem:[%s4696_s1 + $0x598] sm:$0xff] }
  0x48   :  { %2274 = vmatpush.bf16.msra.mxu2 %v3687_v16  ;;  %v3705_v16 = vld [vmem:[%s4696_s1 + $0x340] sm:$0xff] }
  0x49   :  { %2287 = vmatpush.bf16.msra.mxu3 %v3695_v17  ;;  %v3713_v17 = vld [vmem:[%s4696_s1 + $0x380] sm:$0xff] }
  0x4a   :  { %2249 = vmatpush.bf16.msra.mxu0 %v3670_v18  ;;  %v3721_v18 = vld [vmem:[%s4696_s1 + $0x3c0] sm:$0xff] }
  0x4b   :  { %2262 = vmatpush.bf16.msra.mxu1 %v3678_v19  ;;  %v3736_v19 = vld [vmem:[%s4696_s1 + $0x438] sm:$0xff] }
  0x4c   :  { %2275 = vmatpush.bf16.msra.mxu2 %v3686_v20  ;;  %v3744_v20 = vld [vmem:[%s4696_s1 + $0x478] sm:$0xff] }
  0x4d   :  { %2288 = vmatpush.bf16.msra.mxu3 %v3694_v21  ;;  %v3752_v21 = vld [vmem:[%s4696_s1 + $0x4b8] sm:$0xff] }
  0x4e   :  { %2250 = vmatpush.bf16.msra.mxu0 %v3669_v22  ;;  %v3760_v22 = vld [vmem:[%s4696_s1 + $0x4f8] sm:$0xff] }
  0x4f   :  { %2263 = vmatpush.bf16.msra.mxu1 %v3677_v23  ;;  %v3735_v23 = vld [vmem:[%s4696_s1 + $0x430] sm:$0xff] }
  0x50   :  { %2276 = vmatpush.bf16.msra.mxu2 %v3685_v24  ;;  %v3743_v24 = vld [vmem:[%s4696_s1 + $0x470] sm:$0xff] }
  0x51   :  { %2289 = vmatpush.bf16.msra.mxu3 %v3693_v25  ;;  %v3751_v25 = vld [vmem:[%s4696_s1 + $0x4b0] sm:$0xff] }
  0x52   :  { %2251 = vmatpush.bf16.msra.mxu0 %v3668_v26  ;;  %v3759_v26 = vld [vmem:[%s4696_s1 + $0x4f0] sm:$0xff] }
  0x53   :  { %2264 = vmatpush.bf16.msra.mxu1 %v3676_v27  ;;  %v3734_v27 = vld [vmem:[%s4696_s1 + $0x428] sm:$0xff] }
  0x54   :  { %2277 = vmatpush.bf16.msra.mxu2 %v3684_v28  ;;  %v3742_v28 = vld [vmem:[%s4696_s1 + $0x468] sm:$0xff] }
  0x55   :  { %2290 = vmatpush.bf16.msra.mxu3 %v3692_v29  ;;  %v3750_v29 = vld [vmem:[%s4696_s1 + $0x4a8] sm:$0xff] }
  0x56   :  { %2252 = vmatpush.bf16.msra.mxu0 %v3667_v30  ;;  %v3758_v30 = vld [vmem:[%s4696_s1 + $0x4e8] sm:$0xff] }
  0x57   :  { %2265 = vmatpush.bf16.msra.mxu1 %v3675_v31  ;;  %v3733_v31 = vld [vmem:[%s4696_s1 + $0x420] sm:$0xff] }
  0x58   :  { %2278 = vmatpush.bf16.msra.mxu2 %v3683_v32  ;;  %v3741_v32 = vld [vmem:[%s4696_s1 + $0x460] sm:$0xff] }
  0x59   :  { %2291 = vmatpush.bf16.msra.mxu3 %v3691_v33  ;;  %v3749_v33 = vld [vmem:[%s4696_s1 + $0x4a0] sm:$0xff] }
  0x5a   :  { %2253 = vmatpush.bf16.msra.mxu0 %v3666_v34  ;;  %v3757_v34 = vld [vmem:[%s4696_s1 + $0x4e0] sm:$0xff] }
  0x5b   :  { %2266 = vmatpush.bf16.msra.mxu1 %v3674_v35  ;;  %v3732_v35 = vld [vmem:[%s4696_s1 + $0x418] sm:$0xff] }
  0x5c   :  { %2279 = vmatpush.bf16.msra.mxu2 %v3682_v36  ;;  %v3740_v36 = vld [vmem:[%s4696_s1 + $0x458] sm:$0xff] }
  0x5d   :  { %2292 = vmatpush.bf16.msra.mxu3 %v3690_v37  ;;  %v3748_v37 = vld [vmem:[%s4696_s1 + $0x498] sm:$0xff] }
  0x5e   :  { %2254 = vmatpush.bf16.msra.mxu0 %v3665_v38  ;;  %v3756_v38 = vld [vmem:[%s4696_s1 + $0x4d8] sm:$0xff] }
  0x5f   :  { %2267 = vmatpush.bf16.msra.mxu1 %v3673_v39  ;;  %v3731_v39 = vld [vmem:[%s4696_s1 + $0x410] sm:$0xff] }
  0x60   :  { %2280 = vmatpush.bf16.msra.mxu2 %v3681_v40  ;;  %v3739_v40 = vld [vmem:[%s4696_s1 + $0x450] sm:$0xff] }
  0x61   :  { %2293 = vmatpush.bf16.msra.mxu3 %v3689_v41  ;;  %2255 = vmatmul.bf16.vlgmr.msra.gmra.mxu0 %v547_v46  ;;  %v3747_v41 = vld [vmem:[%s4696_s1 + $0x490] sm:$0xff]  ;;  %v3754_v46 = vld [vmem:[%s4696_s1 + $0x4c8] sm:$0xff] }
  0x62   :  { %2299 = vmatpush.bf16.msrb.mxu0 %v3704_v42  ;;  %2268 = vmatmul.bf16.vlgmr.msra.gmra.mxu1 %v548_v48  ;;  %v3755_v42 = vld [vmem:[%s4696_s1 + $0x4d0] sm:$0xff]  ;;  %v3737_v48 = vld [vmem:[%s4696_s1 + $0x440] sm:$0xff] }
  0x63   :  { %2312 = vmatpush.bf16.msrb.mxu1 %v3712_v43  ;;  %2281 = vmatmul.bf16.vlgmr.msra.gmra.mxu2 %v549_v47  ;;  %v3730_v43 = vld [vmem:[%s4696_s1 + $0x408] sm:$0xff]  ;;  %v3729_v47 = vld [vmem:[%s4696_s1 + $0x400] sm:$0xff] }
  0x64   :  { %2325 = vmatpush.bf16.msrb.mxu2 %v3720_v44  ;;  %2294 = vmatmul.bf16.vlgmr.msra.gmra.mxu3 %v550_v49  ;;  %v3738_v44 = vld [vmem:[%s4696_s1 + $0x448] sm:$0xff]  ;;  %v3745_v49 = vld [vmem:[%s4696_s1 + $0x480] sm:$0xff] }
  0x65   :  { %2338 = vmatpush.bf16.msrb.mxu3 %v3728_v45  ;;  %v3746_v45 = vld [vmem:[%s4696_s1 + $0x488] sm:$0xff] }
  0x66   :  { %2300 = vmatpush.bf16.msrb.mxu0 %v3703_v50  ;;  %v3753_v50 = vld [vmem:[%s4696_s1 + $0x4c0] sm:$0xff] }
  0x67   :  { %2313 = vmatpush.bf16.msrb.mxu1 %v3711_v51  ;;  %v3768_v51 = vld [vmem:[%s4696_s1 + $0x538] sm:$0xff] }
  0x68   :  { %2326 = vmatpush.bf16.msrb.mxu2 %v3719_v52  ;;  %v3776_v52 = vld [vmem:[%s4696_s1 + $0x578] sm:$0xff] }
  0x69   :  { %2339 = vmatpush.bf16.msrb.mxu3 %v3727_v53  ;;  %v3784_v53 = vld [vmem:[%s4696_s1 + $0x5b8] sm:$0xff] }
  0x6a   :  { %2301 = vmatpush.bf16.msrb.mxu0 %v3702_v54  ;;  %v3792_v54 = vld [vmem:[%s4696_s1 + $0x5f8] sm:$0xff] }
  0x6b   :  { %2314 = vmatpush.bf16.msrb.mxu1 %v3710_v55  ;;  %v557_v55 = vld [vmem:[#allocation1] sm:$0xff] }
  0x6c   :  { %2327 = vmatpush.bf16.msrb.mxu2 %v3718_v56  ;;  %v559_v56 = vld [vmem:[#allocation1 + $0x12] sm:$0xff] }
  0x6d   :  { %2340 = vmatpush.bf16.msrb.mxu3 %v3726_v57  ;;  %v558_v57 = vld [vmem:[#allocation1 + $0x9] sm:$0xff] }
  0x6e   :  { %2302 = vmatpush.bf16.msrb.mxu0 %v3701_v58  ;;  %v560_v58 = vld [vmem:[#allocation1 + $0x1b] sm:$0xff] }
  0x6f   :  { %2315 = vmatpush.bf16.msrb.mxu1 %v3709_v59  ;;  %v3767_v59 = vld [vmem:[%s4696_s1 + $0x530] sm:$0xff] }
  0x70   :  { %2328 = vmatpush.bf16.msrb.mxu2 %v3717_v60  ;;  %v3775_v60 = vld [vmem:[%s4696_s1 + $0x570] sm:$0xff] }
  0x71   :  { %2341 = vmatpush.bf16.msrb.mxu3 %v3725_v61  ;;  %v3783_v61 = vld [vmem:[%s4696_s1 + $0x5b0] sm:$0xff] }
  0x72   :  { %2303 = vmatpush.bf16.msrb.mxu0 %v3700_v62  ;;  %v3791_v62 = vld [vmem:[%s4696_s1 + $0x5f0] sm:$0xff] }
  0x73   :  { %2316 = vmatpush.bf16.msrb.mxu1 %v3708_v63  ;;  %v3766_v63 = vld [vmem:[%s4696_s1 + $0x528] sm:$0xff] }
  0x74   :  { %2329 = vmatpush.bf16.msrb.mxu2 %v3716_v0  ;;  %v3774_v0 = vld [vmem:[%s4696_s1 + $0x568] sm:$0xff] }
  0x75   :  { %2342 = vmatpush.bf16.msrb.mxu3 %v3724_v1  ;;  %v3858_v1 = vld [vmem:[%s4697_s2] ss:$0 sm:$0xff] }
  0x76   :  { %2304 = vmatpush.bf16.msrb.mxu0 %v3699_v2  ;;  %v3782_v2 = vld [vmem:[%s4696_s1 + $0x5a8] sm:$0xff] }
  0x77   :  { %2317 = vmatpush.bf16.msrb.mxu1 %v3707_v3  ;;  %v3790_v3 = vld [vmem:[%s4696_s1 + $0x5e8] sm:$0xff] }
  0x78   :  { %2330 = vmatpush.bf16.msrb.mxu2 %v3715_v4 }
  0x79   :  { %2343 = vmatpush.bf16.msrb.mxu3 %v3723_v5  ;;  %v3765_v5 = vld [vmem:[%s4696_s1 + $0x520] sm:$0xff] }
  0x7a   :  { %2305 = vmatpush.bf16.msrb.mxu0 %v3698_v6  ;;  %v3773_v6 = vld [vmem:[%s4696_s1 + $0x560] sm:$0xff] }
  0x7b   :  { %2318 = vmatpush.bf16.msrb.mxu1 %v3706_v7 }
  0x7c   :  { %2331 = vmatpush.bf16.msrb.mxu2 %v3714_v8 }
  0x7d   :  { %2344 = vmatpush.bf16.msrb.mxu3 %v3722_v9  ;;  %v3781_v9 = vld [vmem:[%s4696_s1 + $0x5a0] sm:$0xff] }
  0x7e   :  { %2306 = vmatpush.bf16.msrb.mxu0 %v3697_v15  ;;  %v3788_v15 = vld [vmem:[%s4696_s1 + $0x5d8] sm:$0xff] }
  0x7f   :  { %2319 = vmatpush.bf16.msrb.mxu1 %v3705_v16 }
  0x80   :  { %2332 = vmatpush.bf16.msrb.mxu2 %v3713_v17 }
  0x81   :  { %2345 = vmatpush.bf16.msrb.mxu3 %v3721_v18  ;;  %2307 = vmatmul.bf16.vlgmr.msrb.gmra.mxu0 %v551_v10  ;;  %v3789_v10 = vld [vmem:[%s4696_s1 + $0x5e0] sm:$0xff] }
  0x82   :  { %2351 = vmatpush.bf16.msra.mxu0 %v3736_v19  ;;  %2320 = vmatmul.bf16.vlgmr.msrb.gmra.mxu1 %v552_v12  ;;  %v3764_v12 = vld [vmem:[%s4696_s1 + $0x518] sm:$0xff] }
  0x83   :  { %2364 = vmatpush.bf16.msra.mxu1 %v3744_v20  ;;  %2333 = vmatmul.bf16.vlgmr.msrb.gmra.mxu2 %v553_v11  ;;  %v3763_v20 = vld [vmem:[%s4696_s1 + $0x510] sm:$0xff] }
  0x84   :  { %2377 = vmatpush.bf16.msra.mxu2 %v3752_v21  ;;  %2346 = vmatmul.bf16.vlgmr.msrb.gmra.mxu3 %v554_v13  ;;  %v3772_v13 = vld [vmem:[%s4696_s1 + $0x558] sm:$0xff]  ;;  %v3771_v21 = vld [vmem:[%s4696_s1 + $0x550] sm:$0xff] }
  0x85   :  { %2390 = vmatpush.bf16.msra.mxu3 %v3760_v22 }
  0x86   :  { %2352 = vmatpush.bf16.msra.mxu0 %v3735_v23 }
  0x87   :  { %2365 = vmatpush.bf16.msra.mxu1 %v3743_v24  ;;  %v3779_v24 = vld [vmem:[%s4696_s1 + $0x590] sm:$0xff] }
  0x88   :  { %2378 = vmatpush.bf16.msra.mxu2 %v3751_v25  ;;  %v3787_v25 = vld [vmem:[%s4696_s1 + $0x5d0] sm:$0xff] }
  0x89   :  { %2391 = vmatpush.bf16.msra.mxu3 %v3759_v26  ;;  %v3762_v26 = vld [vmem:[%s4696_s1 + $0x508] sm:$0xff] }
  0x8a   :  { %2353 = vmatpush.bf16.msra.mxu0 %v3734_v27  ;;  %v3770_v27 = vld [vmem:[%s4696_s1 + $0x548] sm:$0xff] }
  0x8b   :  { %2366 = vmatpush.bf16.msra.mxu1 %v3742_v28  ;;  %v3778_v28 = vld [vmem:[%s4696_s1 + $0x588] sm:$0xff] }
  0x8c   :  { %2379 = vmatpush.bf16.msra.mxu2 %v3750_v29  ;;  %v3786_v29 = vld [vmem:[%s4696_s1 + $0x5c8] sm:$0xff] }
  0x8d   :  { %2392 = vmatpush.bf16.msra.mxu3 %v3758_v30  ;;  %v561_v30 = vld [vmem:[#allocation1 + $0x24] sm:$0xff] }
  0x8e   :  { %2354 = vmatpush.bf16.msra.mxu0 %v3733_v31  ;;  %v563_v31 = vld [vmem:[#allocation1 + $0x36] sm:$0xff] }
  0x8f   :  { %2367 = vmatpush.bf16.msra.mxu1 %v3741_v32 }
  0x90   :  { %2380 = vmatpush.bf16.msra.mxu2 %v3749_v33  ;;  %v562_v33 = vld [vmem:[#allocation1 + $0x2d] sm:$0xff] }
  0x91   :  { %2393 = vmatpush.bf16.msra.mxu3 %v3757_v34  ;;  %v564_v34 = vld [vmem:[#allocation1 + $0x3f] sm:$0xff] }
  0x92   :  { %2355 = vmatpush.bf16.msra.mxu0 %v3732_v35 }
  0x93   :  { %2368 = vmatpush.bf16.msra.mxu1 %v3740_v36  ;;  %v18_v36 = vld [vmem:[%s4695_s0 + $0x18] sm:$0xff] }
  0x94   :  { %2381 = vmatpush.bf16.msra.mxu2 %v3748_v37  ;;  %566 = vst [vmem:[#allocation1] ss:$9 sm:$0xff] %v18_v36  ;;  %v3761_v37 = vld [vmem:[%s4696_s1 + $0x500] sm:$0xff]  ;;  %v3854_v36 = vld [vmem:[%s4696_s1 + $0x7e8] sm:$0xff] }
  0x95   :  { %2394 = vmatpush.bf16.msra.mxu3 %v3756_v38  ;;  %v3769_v38 = vld [vmem:[%s4696_s1 + $0x540] sm:$0xff] }
  0x96   :  { %2356 = vmatpush.bf16.msra.mxu0 %v3731_v39  ;;  %v3777_v39 = vld [vmem:[%s4696_s1 + $0x580] sm:$0xff] }
  0x97   :  { %2369 = vmatpush.bf16.msra.mxu1 %v3739_v40  ;;  %v3785_v40 = vld [vmem:[%s4696_s1 + $0x5c0] sm:$0xff] }
  0x98   :  { %2382 = vmatpush.bf16.msra.mxu2 %v3747_v41  ;;  %v3800_v41 = vld [vmem:[%s4696_s1 + $0x638] sm:$0xff] }
  0x99   :  { %2395 = vmatpush.bf16.msra.mxu3 %v3755_v42  ;;  %v3808_v42 = vld [vmem:[%s4696_s1 + $0x678] sm:$0xff] }
  0x9a   :  { %2357 = vmatpush.bf16.msra.mxu0 %v3730_v43  ;;  %v3816_v43 = vld [vmem:[%s4696_s1 + $0x6b8] sm:$0xff] }
  0x9b   :  { %2370 = vmatpush.bf16.msra.mxu1 %v3738_v44  ;;  %v3824_v44 = vld [vmem:[%s4696_s1 + $0x6f8] sm:$0xff] }
  0x9c   :  { %2383 = vmatpush.bf16.msra.mxu2 %v3746_v45  ;;  %v3799_v45 = vld [vmem:[%s4696_s1 + $0x630] sm:$0xff] }
  0x9d   :  { %2396 = vmatpush.bf16.msra.mxu3 %v3754_v46  ;;  %v3807_v46 = vld [vmem:[%s4696_s1 + $0x670] sm:$0xff] }
  0x9e   :  { %2358 = vmatpush.bf16.msra.mxu0 %v3729_v47  ;;  %v2152_v4 = vpop.f32.mrf.mxu0  ;;  %v3815_v47 = vld [vmem:[%s4696_s1 + $0x6b0] sm:$0xff] }
  0x9f   :  { %2371 = vmatpush.bf16.msra.mxu1 %v3737_v48  ;;  %v2153_v7 = vadd.f32 %v3858_v1, %v2152_v4  ;;  %v2165_v8 = vpop.f32.mrf.mxu1  ;;  %v3823_v48 = vld [vmem:[%s4696_s1 + $0x6f0] sm:$0xff] }
  0xa0   :  { %2384 = vmatpush.bf16.msra.mxu2 %v3745_v49  ;;  %v3798_v49 = vld [vmem:[%s4696_s1 + $0x628] sm:$0xff] }
  0xa1   :  { %2397 = vmatpush.bf16.msra.mxu3 %v3753_v50  ;;  %2359 = vmatmul.bf16.vlgmr.msra.gmra.mxu0 %v557_v55  ;;  %v2166_v11 = vadd.f32 %v2165_v8, %v2153_v7  ;;  %v3806_v50 = vld [vmem:[%s4696_s1 + $0x668] sm:$0xff]  ;;  %v3805_v55 = vld [vmem:[%s4696_s1 + $0x660] sm:$0xff] }
  0xa2   :  { %2403 = vmatpush.bf16.msrb.mxu0 %v3768_v51  ;;  %2372 = vmatmul.bf16.vlgmr.msra.gmra.mxu1 %v558_v57  ;;  %v3814_v51 = vld [vmem:[%s4696_s1 + $0x6a8] sm:$0xff] }
  0xa3   :  { %2416 = vmatpush.bf16.msrb.mxu1 %v3776_v52  ;;  %2385 = vmatmul.bf16.vlgmr.msra.gmra.mxu2 %v559_v56  ;;  %v3822_v52 = vld [vmem:[%s4696_s1 + $0x6e8] sm:$0xff] }
  0xa4   :  { %2429 = vmatpush.bf16.msrb.mxu2 %v3784_v53  ;;  %2398 = vmatmul.bf16.vlgmr.msra.gmra.mxu3 %v560_v58  ;;  %v3813_v58 = vld [vmem:[%s4696_s1 + $0x6a0] sm:$0xff] }
  0xa5   :  { %2442 = vmatpush.bf16.msrb.mxu3 %v3792_v54  ;;  %v3797_v54 = vld [vmem:[%s4696_s1 + $0x620] sm:$0xff] }
  0xa6   :  { %2404 = vmatpush.bf16.msrb.mxu0 %v3767_v59  ;;  %v2178_v16 = vpop.f32.mrf.mxu2  ;;  %v2154_v19 = vpop.f32.mrf.mxu0  ;;  %v3821_v59 = vld [vmem:[%s4696_s1 + $0x6e0] sm:$0xff] }
  0xa7   :  { %2417 = vmatpush.bf16.msrb.mxu1 %v3775_v60  ;;  %v2179_v17 = vadd.f32 %v2178_v16, %v2166_v11  ;;  %v2191_v18 = vpop.f32.mrf.mxu3  ;;  %v2167_v23 = vpop.f32.mrf.mxu1  ;;  %v3794_v11 = vld [vmem:[%s4696_s1 + $0x608] sm:$0xff]  ;;  %v3809_v19 = vld [vmem:[%s4696_s1 + $0x680] sm:$0xff] }
  0xa8   :  { %2430 = vmatpush.bf16.msrb.mxu2 %v3783_v61  ;;  %v3796_v61 = vld [vmem:[%s4696_s1 + $0x618] sm:$0xff] }
  0xa9   :  { %2443 = vmatpush.bf16.msrb.mxu3 %v3791_v62  ;;  %v4464_v22 = vadd.f32 %v2191_v18, %v2179_v17  ;;  %v3804_v62 = vld [vmem:[%s4696_s1 + $0x658] sm:$0xff]  ;;  %v3793_v17 = vld [vmem:[%s4696_s1 + $0x600] sm:$0xff] }
  0xaa   :  { %2405 = vmatpush.bf16.msrb.mxu0 %v3766_v63  ;;  %v3812_v63 = vld [vmem:[%s4696_s1 + $0x698] sm:$0xff]  ;;  %v3801_v18 = vld [vmem:[%s4696_s1 + $0x640] sm:$0xff] }
  0xab   :  { %2418 = vmatpush.bf16.msrb.mxu1 %v3774_v0  ;;  %v3820_v0 = vld [vmem:[%s4696_s1 + $0x6d8] sm:$0xff] }
  0xac   :  { %2431 = vmatpush.bf16.msrb.mxu2 %v3782_v2  ;;  %v3848_v23 = vld [vmem:[%s4696_s1 + $0x7b8] sm:$0xff] }
  0xad   :  { %2444 = vmatpush.bf16.msrb.mxu3 %v3790_v3 }
  0xae   :  { %2406 = vmatpush.bf16.msrb.mxu0 %v3765_v5  ;;  %v2180_v32 = vpop.f32.mrf.mxu2  ;;  %v3795_v5 = vld [vmem:[%s4696_s1 + $0x610] sm:$0xff] }
  0xaf   :  { %2419 = vmatpush.bf16.msrb.mxu1 %v3773_v6  ;;  %v2193_v35 = vpop.f32.mrf.mxu3  ;;  %v3803_v6 = vld [vmem:[%s4696_s1 + $0x650] sm:$0xff] }
  0xb0   :  { %2432 = vmatpush.bf16.msrb.mxu2 %v3781_v9  ;;  %v3811_v9 = vld [vmem:[%s4696_s1 + $0x690] sm:$0xff]  ;;  %v3846_v35 = vld [vmem:[%s4696_s1 + $0x7a8] sm:$0xff] }
  0xb1   :  { %2445 = vmatpush.bf16.msrb.mxu3 %v3789_v10  ;;  %v3819_v10 = vld [vmem:[%s4696_s1 + $0x6d0] sm:$0xff] }
  0xb2   :  { %2407 = vmatpush.bf16.msrb.mxu0 %v3764_v12  ;;  %v3802_v12 = vld [vmem:[%s4696_s1 + $0x648] sm:$0xff]  ;;  %v3855_v32 = vld [vmem:[%s4696_s1 + $0x7f0] sm:$0xff] }
  0xb3   :  { %2420 = vmatpush.bf16.msrb.mxu1 %v3772_v13  ;;  %v3810_v13 = vld [vmem:[%s4696_s1 + $0x688] sm:$0xff] }
  0xb4   :  { %2433 = vmatpush.bf16.msrb.mxu2 %v3780_v14  ;;  %v3818_v14 = vld [vmem:[%s4696_s1 + $0x6c8] sm:$0xff] }
  0xb5   :  { %2446 = vmatpush.bf16.msrb.mxu3 %v3788_v15 }
  0xb6   :  { %2408 = vmatpush.bf16.msrb.mxu0 %v3763_v20  ;;  %v3817_v20 = vld [vmem:[%s4696_s1 + $0x6c0] sm:$0xff] }
  0xb7   :  { %2421 = vmatpush.bf16.msrb.mxu1 %v3771_v21  ;;  %v3832_v21 = vld [vmem:[%s4696_s1 + $0x738] sm:$0xff] }
  0xb8   :  { %2434 = vmatpush.bf16.msrb.mxu2 %v3779_v24  ;;  %v3856_v24 = vld [vmem:[%s4696_s1 + $0x7f8] sm:$0xff] }
  0xb9   :  { %2447 = vmatpush.bf16.msrb.mxu3 %v3787_v25  ;;  %v567_v25 = vld [vmem:[#allocation1] sm:$0xff] }
  0xba   :  { %2409 = vmatpush.bf16.msrb.mxu0 %v3762_v26  ;;  %v569_v26 = vld [vmem:[#allocation1 + $0x12] sm:$0xff] }
  0xbb   :  { %2422 = vmatpush.bf16.msrb.mxu1 %v3770_v27  ;;  %v568_v27 = vld [vmem:[#allocation1 + $0x9] sm:$0xff] }
  0xbc   :  { %2435 = vmatpush.bf16.msrb.mxu2 %v3778_v28  ;;  %v570_v28 = vld [vmem:[#allocation1 + $0x1b] sm:$0xff] }
  0xbd   :  { %2448 = vmatpush.bf16.msrb.mxu3 %v3786_v29  ;;  %v3831_v29 = vld [vmem:[%s4696_s1 + $0x730] sm:$0xff] }
  0xbe   :  { %2410 = vmatpush.bf16.msrb.mxu0 %v3761_v37  ;;  %v2204_v53 = vpop.f32.mrf.mxu0 }
  0xbf   :  { %2423 = vmatpush.bf16.msrb.mxu1 %v3769_v38  ;;  %v2205_v56 = vadd.f32 %v2204_v53, %v4464_v22  ;;  %v2217_v57 = vpop.f32.mrf.mxu1  ;;  %v3840_v22 = vld [vmem:[%s4696_s1 + $0x778] sm:$0xff] }
  0xc0   :  { %2436 = vmatpush.bf16.msrb.mxu2 %v3777_v39  ;;  %v3829_v39 = vld [vmem:[%s4696_s1 + $0x720] sm:$0xff] }
  0xc1   :  { %2449 = vmatpush.bf16.msrb.mxu3 %v3785_v40  ;;  %2411 = vmatmul.bf16.vlgmr.msrb.gmra.mxu0 %v561_v30  ;;  %v2218_v60 = vadd.f32 %v2217_v57, %v2205_v56  ;;  %v3839_v30 = vld [vmem:[%s4696_s1 + $0x770] sm:$0xff]  ;;  %v3837_v40 = vld [vmem:[%s4696_s1 + $0x760] sm:$0xff] }
  0xc2   :  { %2455 = vmatpush.bf16.msra.mxu0 %v3800_v41  ;;  %2424 = vmatmul.bf16.vlgmr.msrb.gmra.mxu1 %v562_v33  ;;  %v3830_v33 = vld [vmem:[%s4696_s1 + $0x728] sm:$0xff]  ;;  %v3843_v57 = vld [vmem:[%s4696_s1 + $0x790] sm:$0xff] }
  0xc3   :  { %2468 = vmatpush.bf16.msra.mxu1 %v3808_v42  ;;  %2437 = vmatmul.bf16.vlgmr.msrb.gmra.mxu2 %v563_v31  ;;  %v3847_v31 = vld [vmem:[%s4696_s1 + $0x7b0] sm:$0xff]  ;;  %v3845_v42 = vld [vmem:[%s4696_s1 + $0x7a0] sm:$0xff] }
  0xc4   :  { %2481 = vmatpush.bf16.msra.mxu2 %v3816_v43  ;;  %2450 = vmatmul.bf16.vlgmr.msrb.gmra.mxu3 %v564_v34  ;;  %v3838_v34 = vld [vmem:[%s4696_s1 + $0x768] sm:$0xff]  ;;  %v3853_v43 = vld [vmem:[%s4696_s1 + $0x7e0] sm:$0xff] }
  0xc5   :  { %2494 = vmatpush.bf16.msra.mxu3 %v3824_v44 }
  0xc6   :  { %2456 = vmatpush.bf16.msra.mxu0 %v3799_v45  ;;  %v2230_v1 = vpop.f32.mrf.mxu2  ;;  %v2206_v4 = vpop.f32.mrf.mxu0  ;;  %v3828_v45 = vld [vmem:[%s4696_s1 + $0x718] sm:$0xff] }
  0xc7   :  { %2469 = vmatpush.bf16.msra.mxu1 %v3807_v46  ;;  %v2231_v2 = vadd.f32 %v2230_v1, %v2218_v60  ;;  %v2243_v3 = vpop.f32.mrf.mxu3  ;;  %v2219_v8 = vpop.f32.mrf.mxu1  ;;  %v3836_v46 = vld [vmem:[%s4696_s1 + $0x758] sm:$0xff]  ;;  %v3834_v60 = vld [vmem:[%s4696_s1 + $0x748] sm:$0xff]  ;;  %v3825_v1 = vld [vmem:[%s4696_s1 + $0x700] sm:$0xff] }
  0xc8   :  { %2482 = vmatpush.bf16.msra.mxu2 %v3815_v47  ;;  %v3844_v47 = vld [vmem:[%s4696_s1 + $0x798] sm:$0xff]  ;;  %v3849_v4 = vld [vmem:[%s4696_s1 + $0x7c0] sm:$0xff] }
  0xc9   :  { %2495 = vmatpush.bf16.msra.mxu3 %v3823_v48  ;;  %v2244_v7 = vadd.f32 %v2243_v3, %v2231_v2  ;;  %v3852_v48 = vld [vmem:[%s4696_s1 + $0x7d8] sm:$0xff]  ;;  %v3833_v2 = vld [vmem:[%s4696_s1 + $0x740] sm:$0xff] }
  0xca   :  { %2457 = vmatpush.bf16.msra.mxu0 %v3798_v49  ;;  %v3841_v3 = vld [vmem:[%s4696_s1 + $0x780] sm:$0xff] }
  0xcb   :  { %2470 = vmatpush.bf16.msra.mxu1 %v3806_v50  ;;  %v574_v8 = vld [vmem:[#allocation1 + $0x3f] sm:$0xff] }
  0xcc   :  { %2483 = vmatpush.bf16.msra.mxu2 %v3814_v51 }
  0xcd   :  { %2496 = vmatpush.bf16.msra.mxu3 %v3822_v52 }
  0xce   :  { %2458 = vmatpush.bf16.msra.mxu0 %v3797_v54  ;;  %v2232_v15 = vpop.f32.mrf.mxu2  ;;  %v3827_v54 = vld [vmem:[%s4696_s1 + $0x710] sm:$0xff] }
  0xcf   :  { %2471 = vmatpush.bf16.msra.mxu1 %v3805_v55  ;;  %v2245_v16 = vpop.f32.mrf.mxu3  ;;  %v3835_v55 = vld [vmem:[%s4696_s1 + $0x750] sm:$0xff] }
  0xd0   :  { %2484 = vmatpush.bf16.msra.mxu2 %v3813_v58  ;;  %v3851_v58 = vld [vmem:[%s4696_s1 + $0x7d0] sm:$0xff] }
  0xd1   :  { %2497 = vmatpush.bf16.msra.mxu3 %v3821_v59  ;;  %v3826_v59 = vld [vmem:[%s4696_s1 + $0x708] sm:$0xff] }
  0xd2   :  { %2459 = vmatpush.bf16.msra.mxu0 %v3796_v61  ;;  %v3842_v61 = vld [vmem:[%s4696_s1 + $0x788] sm:$0xff] }
  0xd3   :  { %2472 = vmatpush.bf16.msra.mxu1 %v3804_v62  ;;  %v3850_v62 = vld [vmem:[%s4696_s1 + $0x7c8] sm:$0xff]  ;;  %s3885_s1 = smov [#allocation2]  }
  0xd4   :  { %2485 = vmatpush.bf16.msra.mxu2 %v3812_v63  ;;  %s2566_s10 = sshll.u32 %s3885_s1, 4  ;;  %s2567_s10 = int_to_ptr.vmem [resolvable:$true] %s2566_s10 }
  0xd5   :  { %2498 = vmatpush.bf16.msra.mxu3 %v3820_v0 }
  0xd6   :  { %2460 = vmatpush.bf16.msra.mxu0 %v3795_v5  ;;  %v571_v5 = vld [vmem:[#allocation1 + $0x24] sm:$0xff] }
  0xd7   :  { %2473 = vmatpush.bf16.msra.mxu1 %v3803_v6  ;;  %v572_v6 = vld [vmem:[#allocation1 + $0x2d] sm:$0xff] }
  0xd8   :  { %2486 = vmatpush.bf16.msra.mxu2 %v3811_v9 }
  0xd9   :  { %2499 = vmatpush.bf16.msra.mxu3 %v3819_v10 }
  0xda   :  { %2461 = vmatpush.bf16.msra.mxu0 %v3794_v11 }
  0xdb   :  { %2474 = vmatpush.bf16.msra.mxu1 %v3802_v12 }
  0xdc   :  { %2487 = vmatpush.bf16.msra.mxu2 %v3810_v13 }
  0xdd   :  { %2500 = vmatpush.bf16.msra.mxu3 %v3818_v14 }
  0xde   :  { %2462 = vmatpush.bf16.msra.mxu0 %v3793_v17  ;;  %v2256_v37 = vpop.f32.mrf.mxu0 }
  0xdf   :  { %2475 = vmatpush.bf16.msra.mxu1 %v3801_v18  ;;  %v2257_v38 = vadd.f32 %v2256_v37, %v2244_v7  ;;  %v2269_v41 = vpop.f32.mrf.mxu1  ;;  %v573_v7 = vld [vmem:[#allocation1 + $0x36] sm:$0xff] }
  0xe0   :  { %2488 = vmatpush.bf16.msra.mxu2 %v3809_v19 }
  0xe1   :  { %2501 = vmatpush.bf16.msra.mxu3 %v3817_v20  ;;  %2463 = vmatmul.bf16.vlgmr.msra.gmra.mxu0 %v567_v25  ;;  %v2270_v44 = vadd.f32 %v2269_v41, %v2257_v38 }
  0xe2   :  { %2507 = vmatpush.bf16.msrb.mxu0 %v3832_v21  ;;  %2476 = vmatmul.bf16.vlgmr.msra.gmra.mxu1 %v568_v27 }
  0xe3   :  { %2520 = vmatpush.bf16.msrb.mxu1 %v3840_v22  ;;  %2489 = vmatmul.bf16.vlgmr.msra.gmra.mxu2 %v569_v26 }
  0xe4   :  { %2533 = vmatpush.bf16.msrb.mxu2 %v3848_v23  ;;  %2502 = vmatmul.bf16.vlgmr.msra.gmra.mxu3 %v570_v28 }
  0xe5   :  { %2546 = vmatpush.bf16.msrb.mxu3 %v3856_v24 }
  0xe6   :  { %2508 = vmatpush.bf16.msrb.mxu0 %v3831_v29  ;;  %v2282_v49 = vpop.f32.mrf.mxu2  ;;  %v2258_v52 = vpop.f32.mrf.mxu0 }
  0xe7   :  { %2521 = vmatpush.bf16.msrb.mxu1 %v3839_v30  ;;  %v2283_v50 = vadd.f32 %v2282_v49, %v2270_v44  ;;  %v2295_v51 = vpop.f32.mrf.mxu3  ;;  %v2271_v56 = vpop.f32.mrf.mxu1 }
  0xe8   :  { %2534 = vmatpush.bf16.msrb.mxu2 %v3847_v31 }
  0xe9   :  { %2547 = vmatpush.bf16.msrb.mxu3 %v3855_v32  ;;  %v2296_v53 = vadd.f32 %v2295_v51, %v2283_v50 }
  0xea   :  { %2509 = vmatpush.bf16.msrb.mxu0 %v3830_v33 }
  0xeb   :  { %2522 = vmatpush.bf16.msrb.mxu1 %v3838_v34 }
  0xec   :  { %2535 = vmatpush.bf16.msrb.mxu2 %v3846_v35 }
  0xed   :  { %2548 = vmatpush.bf16.msrb.mxu3 %v3854_v36 }
  0xee   :  { %2510 = vmatpush.bf16.msrb.mxu0 %v3829_v39  ;;  %v2284_v63 = vpop.f32.mrf.mxu2 }
  0xef   :  { %2523 = vmatpush.bf16.msrb.mxu1 %v3837_v40  ;;  %v2297_v0 = vpop.f32.mrf.mxu3 }
  0xf0   :  { %2536 = vmatpush.bf16.msrb.mxu2 %v3845_v42 }
  0xf1   :  { %2549 = vmatpush.bf16.msrb.mxu3 %v3853_v43 }
  0xf2   :  { %2511 = vmatpush.bf16.msrb.mxu0 %v3828_v45 }
  0xf3   :  { %2524 = vmatpush.bf16.msrb.mxu1 %v3836_v46 }
  0xf4   :  { %2537 = vmatpush.bf16.msrb.mxu2 %v3844_v47 }
  0xf5   :  { %2550 = vmatpush.bf16.msrb.mxu3 %v3852_v48 }
  0xf6   :  { %2512 = vmatpush.bf16.msrb.mxu0 %v3827_v54 }
  0xf7   :  { %2525 = vmatpush.bf16.msrb.mxu1 %v3835_v55 }
  0xf8   :  { %2538 = vmatpush.bf16.msrb.mxu2 %v3843_v57 }
  0xf9   :  { %2551 = vmatpush.bf16.msrb.mxu3 %v3851_v58 }
  0xfa   :  { %2513 = vmatpush.bf16.msrb.mxu0 %v3826_v59 }
  0xfb   :  { %2526 = vmatpush.bf16.msrb.mxu1 %v3834_v60 }
  0xfc   :  { %2539 = vmatpush.bf16.msrb.mxu2 %v3842_v61 }
  0xfd   :  { %2552 = vmatpush.bf16.msrb.mxu3 %v3850_v62 }
  0xfe   :  { %2514 = vmatpush.bf16.msrb.mxu0 %v3825_v1  ;;  %v2308_v9 = vpop.f32.mrf.mxu0 }
  0xff   :  { %2527 = vmatpush.bf16.msrb.mxu1 %v3833_v2  ;;  %v2309_v10 = vadd.f32 %v2308_v9, %v2296_v53  ;;  %v2321_v11 = vpop.f32.mrf.mxu1 }
 0x100   :  { %2540 = vmatpush.bf16.msrb.mxu2 %v3841_v3 }
 0x101   :  { %2553 = vmatpush.bf16.msrb.mxu3 %v3849_v4  ;;  %2515 = vmatmul.bf16.vlgmr.msrb.gmra.mxu0 %v571_v5  ;;  %v2322_v12 = vadd.f32 %v2321_v11, %v2309_v10 }
 0x102   :  { %2528 = vmatmul.bf16.vlgmr.msrb.gmra.mxu1 %v572_v6 }
 0x103   :  { %2541 = vmatmul.bf16.vlgmr.msrb.gmra.mxu2 %v573_v7 }
 0x104   :  { %2554 = vmatmul.bf16.vlgmr.msrb.gmra.mxu3 %v574_v8 }
 0x106   :  { %v2334_v13 = vpop.f32.mrf.mxu2  ;;  %v2310_v16 = vpop.f32.mrf.mxu0 }
 0x107   :  { %v2335_v14 = vadd.f32 %v2334_v13, %v2322_v12  ;;  %v2347_v15 = vpop.f32.mrf.mxu3  ;;  %v2323_v18 = vpop.f32.mrf.mxu1 }
 0x109   :  { %v2348_v17 = vadd.f32 %v2347_v15, %v2335_v14 }
 0x10e   :  { %v2336_v19 = vpop.f32.mrf.mxu2 }
 0x10f   :  { %v2349_v20 = vpop.f32.mrf.mxu3 }
 0x11e   :  { %v2360_v21 = vpop.f32.mrf.mxu0 }
 0x11f   :  { %v2361_v22 = vadd.f32 %v2360_v21, %v2348_v17  ;;  %v2373_v23 = vpop.f32.mrf.mxu1 }
 0x121   :  { %v2374_v24 = vadd.f32 %v2373_v23, %v2361_v22 }
 0x126   :  { %v2386_v25 = vpop.f32.mrf.mxu2  ;;  %v2362_v28 = vpop.f32.mrf.mxu0 }
 0x127   :  { %v2387_v26 = vadd.f32 %v2386_v25, %v2374_v24  ;;  %v2399_v27 = vpop.f32.mrf.mxu3  ;;  %v2375_v30 = vpop.f32.mrf.mxu1 }
 0x129   :  { %v2400_v29 = vadd.f32 %v2399_v27, %v2387_v26 }
 0x12e   :  { %v2388_v31 = vpop.f32.mrf.mxu2 }
 0x12f   :  { %v2401_v32 = vpop.f32.mrf.mxu3 }
 0x13e   :  { %v2412_v33 = vpop.f32.mrf.mxu0 }
 0x13f   :  { %v2425_v34 = vpop.f32.mrf.mxu1  ;;  %v2413_v44 = vadd.f32 %v2412_v33, %v2400_v29 }
 0x141   :  { %v2426_v48 = vadd.f32 %v2425_v34, %v2413_v44 }
 0x146   :  { %v2438_v35 = vpop.f32.mrf.mxu2  ;;  %v2414_v37 = vpop.f32.mrf.mxu0 }
 0x147   :  { %v2451_v36 = vpop.f32.mrf.mxu3  ;;  %v2427_v38 = vpop.f32.mrf.mxu1  ;;  %v2439_v49 = vadd.f32 %v2438_v35, %v2426_v48 }
 0x149   :  { %v2452_v52 = vadd.f32 %v2451_v36, %v2439_v49 }
 0x14e   :  { %v2440_v39 = vpop.f32.mrf.mxu2 }
 0x14f   :  { %v2453_v40 = vpop.f32.mrf.mxu3 }
 0x15e   :  { %v2464_v41 = vpop.f32.mrf.mxu0 }
 0x15f   :  { %v2477_v42 = vpop.f32.mrf.mxu1  ;;  %v2465_v53 = vadd.f32 %v2464_v41, %v2452_v52 }
 0x161   :  { %v2478_v54 = vadd.f32 %v2477_v42, %v2465_v53 }
 0x166   :  { %v2490_v43 = vpop.f32.mrf.mxu2  ;;  %v2466_v46 = vpop.f32.mrf.mxu0 }
 0x167   :  { %v2503_v45 = vpop.f32.mrf.mxu3  ;;  %v2479_v47 = vpop.f32.mrf.mxu1  ;;  %v2491_v55 = vadd.f32 %v2490_v43, %v2478_v54 }
 0x169   :  { %v2504_v56 = vadd.f32 %v2503_v45, %v2491_v55 }
 0x16e   :  { %v2492_v50 = vpop.f32.mrf.mxu2 }
 0x16f   :  { %v2505_v51 = vpop.f32.mrf.mxu3 }
 0x17e   :  { %v2516_v57 = vpop.f32.mrf.mxu0 }
 0x17f   :  { %v2529_v58 = vpop.f32.mrf.mxu1  ;;  %v2517_v59 = vadd.f32 %v2516_v57, %v2504_v56 }
 0x181   :  { %v2530_v60 = vadd.f32 %v2529_v58, %v2517_v59 }
 0x186   :  { %v2542_v61 = vpop.f32.mrf.mxu2  ;;  %v2518_v0 = vpop.f32.mrf.mxu0 }
 0x187   :  { %v2555_v62 = vpop.f32.mrf.mxu3  ;;  %v2543_v63 = vadd.f32 %v2542_v61, %v2530_v60  ;;  %v2531_v1 = vpop.f32.mrf.mxu1 }
 0x189   :  { %v2556_v2 = vadd.f32 %v2555_v62, %v2543_v63 }
 0x18b   :  { %2560 = vst.msk [vmem:[#allocation2] sm:$0x3] %vm2559_vm0, %v2556_v2 }
 0x18c   :  { %2571 = dma.vmem_to_hbm [thread:$0]  %s2567_s10, 32, %s2569_s13, [#allocation3]  }
 0x18e   :  { %v2544_v3 = vpop.f32.mrf.mxu2 }
 0x18f   :  { %v2557_v4 = vpop.f32.mrf.mxu3 }
 0x190   :  { %3883 = dma.done.wait [#allocation3], 32  }
 0x191   :  { %3884 = vsyncadd [#allocation3], 4294967264 }
 0x192   :  { %2576 = vsyncpa [#allocation3], 1 }

</bundles_post_ra>
